<compile_context>
chip_gen: v7x
topology: tpu7x:2x2x1
jax: 0.10.0
libtpu: 0.0.40
codegen_flags: <defaults>
</compile_context>

<pallas_src>
import jax
import jax.numpy as jnp
from jax.experimental import pallas as pl
from jax.experimental.pallas import tpu as pltpu


def gat_kernel(x_ref, adj_ref, bias_ref, wcat_ref, bcat_ref, gwx_ref, gwh_ref,
               gb_ref, out_ref):
    f = wcat_ref.shape[0]                             # F (in == out)
    x = x_ref[...]                                    # (rows, F) f32
    adj = adj_ref[...].astype(jnp.float32)            # (rows, rows) exact 0/1

    # [h | hA] = x @ [W^T | W^T Asym] + [b | b Asym]  -- one bf16 MXU matmul,
    # f32 accumulation.
    hcat = jnp.dot(x.astype(jnp.bfloat16), wcat_ref[...],
                   preferred_element_type=jnp.float32) + bcat_ref[...]
    h = hcat[:, :f]
    hA = hcat[:, f:]
    hb = h.astype(jnp.bfloat16)

    # e[r, c] = <hA[r], h[c]> for every node pair in the slab (dense
    # (rows, rows) matmul; cross-graph blocks are garbage, masked below).
    # A was pre-symmetrized in the wrapper, so this already equals e + e^T.
    e = jax.lax.dot_general(
        hA.astype(jnp.bfloat16), hb,
        dimension_numbers=(((1,), (1,)), ((), ())),
        preferred_element_type=jnp.float32)           # (rows, rows)
    e = jnp.maximum(e, 0.0)                           # LeakyReLU(0.0) == ReLU

    # attention = softmax(where(adj > 0, e, 0), dim=node_j) * adj, per graph.
    # adj is {0,1} and e >= 0, so where(adj>0, e, 0) == e*adj.  bias_ref is
    # 0 inside a graph's block and -1e30 across graphs -> exp() == 0 exactly,
    # so masked same-graph entries still contribute exp(-max) (as in the
    # PyTorch module) while cross-graph entries contribute nothing.
    att = e * adj + bias_ref[...]
    att = jnp.exp(att - jnp.max(att, axis=0, keepdims=True))
    att = att * pl.reciprocal(jnp.sum(att, axis=0, keepdims=True), approx=True)
    att = att * adj

    # h_prime = relu(attention @ h); cross-graph entries of att are exactly 0.
    hp = jnp.dot(att.astype(jnp.bfloat16), hb,
                 preferred_element_type=jnp.float32)  # (rows, F)
    hp = jnp.maximum(hp, 0.0)

    # coeff = sigmoid(gate(cat([x, h_prime], -1))) -- single fused reduction.
    logit = jnp.sum(x * gwx_ref[...] + hp * gwh_ref[...],
                    axis=-1, keepdims=True) + gb_ref[...]
    coeff = jax.nn.sigmoid(logit)

    out_ref[...] = (coeff * x + (1.0 - coeff) * hp).astype(out_ref.dtype)


def _num_tensorcores():
    """TensorCores per device ('parallel' grid axes are sharded across them)."""
    try:
        info = pltpu.get_tpu_info()
        for name in ("num_cores", "core_count", "num_tensor_cores",
                     "tensorcore_count"):
            v = getattr(info, name, None)
            if isinstance(v, int) and 1 <= v <= 4:
                return v
    except Exception:
        pass
    try:
        kind = jax.devices()[0].device_kind.lower()
        if ("v4" in kind) or ("v5p" in kind) or ("7" in kind):
            return 2      # megacore / dual-TC generations
    except Exception:
        pass
    return 1              # v5e / v6e: single TensorCore


def _choose_block_b(B, N, num_cores):
    """Pick bt (graphs per grid step).  Single-TC: one big step.  Multi-TC:
    a core-multiple number of steps with as many rows/step as possible.
    Rows/step capped at 512 (bounds the (rows, rows) attention block)."""
    max_rows = 512
    best_bt, best_key = 1, None
    for bt in range(1, B + 1):
        if B % bt:
            continue
        rows, steps = bt * N, B // bt
        if rows > max_rows and bt > 1:
            continue
        core_ok = (num_cores <= 1) or (steps % num_cores == 0)
        key = (core_ok, rows)
        if best_key is None or key > best_key:
            best_bt, best_key = bt, key
    return best_bt


@jax.jit
def gat_forward(x, adj, w_t, w_b, a, gate_w, gate_b):
    """x: (B, N, F_in), adj: (B, N, N). Requires F_in == F_out (as in the
    original module's gating)."""
    B, N, f_in = x.shape
    f_out = w_t.shape[1]
    assert f_in == f_out, "gating needs n_in_feature == n_out_feature"
    assert N % 8 == 0, "N must be a multiple of 8 for layout-free reshapes"

    num_cores = _num_tensorcores()
    bt = _choose_block_b(B, N, num_cores)
    G = B // bt
    rows = bt * N

    # Fused [W | W@Asym] weight and [b | b@Asym] bias (Asym = A + A^T so the
    # in-kernel e already equals e + e^T of the original module).
    a_sym = a + a.T
    wcat = jnp.concatenate([w_t, w_t @ a_sym], axis=1).astype(jnp.bfloat16)
    b_row = w_b.reshape(1, f_out)
    bcat = jnp.concatenate([b_row, b_row @ a_sym], axis=1)        # f32

    # Flatten nodes into rows for the fused linear and the output slab.
    x2 = x.reshape(B * N, f_in)

    # Block-diagonal adjacency per grid step; exact {0,1} -> bf16 is lossless
    # and halves the dominant O(rows^2) DMA stream.
    adj_g = adj.reshape(G, bt, N, N)
    eye_bt = jnp.eye(bt, dtype=adj.dtype)
    adj_bd = (adj_g[:, :, :, None, :] * eye_bt[:, None, :, None])
    adj_bd = adj_bd.reshape(B * N, rows).astype(jnp.bfloat16)

    # Cross-graph bias tile (0 in-block, -1e30 across graphs).  Same block
    # every grid step -> stays resident in VMEM.
    node = jnp.arange(rows) // N
    cross_bias = jnp.where(node[:, None] == node[None, :],
                           0.0, -1e30).astype(jnp.float32)

    # gate.weight is (1, 2*F); concatenation order in the module is [x, h'].
    gwx = gate_w[:, :f_in].reshape(1, f_in)
    gwh = gate_w[:, f_in:].reshape(1, f_out)
    gb = gate_b.reshape(1, 1)

    out2 = pl.pallas_call(
        gat_kernel,
        out_shape=jax.ShapeDtypeStruct((B * N, f_out), x.dtype),
        grid_spec=pltpu.PrefetchScalarGridSpec(
            num_scalar_prefetch=0,
            grid=(G,),
            in_specs=[
                pl.BlockSpec((rows, f_in), lambda g: (g, 0)),       # x slab
                pl.BlockSpec((rows, rows), lambda g: (g, 0)),       # adj (block-diag, bf16)
                pl.BlockSpec((rows, rows), lambda g: (0, 0)),       # cross-graph bias
                pl.BlockSpec((f_in, 2 * f_out), lambda g: (0, 0)),  # [W^T | W^T Asym]
                pl.BlockSpec((1, 2 * f_out), lambda g: (0, 0)),     # [b | b Asym]
                pl.BlockSpec((1, f_in), lambda g: (0, 0)),          # gate w (x part)
                pl.BlockSpec((1, f_out), lambda g: (0, 0)),         # gate w (h' part)
                pl.BlockSpec((1, 1), lambda g: (0, 0)),             # gate bias
            ],
            out_specs=pl.BlockSpec((rows, f_out), lambda g: (g, 0)),
        ),
        compiler_params=pltpu.CompilerParams(
            dimension_semantics=("parallel",)),
    )(x2, adj_bd, cross_bias, wcat, bcat, gwx, gwh, gb)

    return out2.reshape(B, N, f_out)


def gat_reference(x, adj, w_t, w_b, a, gate_w, gate_b):
    """Pure-JAX reference mirroring the PyTorch forward (f32 throughout,
    un-symmetrized A and explicit e + e^T)."""
    h = x @ w_t + w_b
    e = jnp.einsum('bjl,bkl->bjk', jnp.einsum('bjl,lm->bjm', h, a), h)
    e = jnp.maximum(e + jnp.transpose(e, (0, 2, 1)), 0.0)   # LeakyReLU(0.0)
    att = jnp.where(adj > 0, e, 0.0)
    att = jax.nn.softmax(att, axis=1)
    att = att * adj
    h_prime = jnp.maximum(jnp.einsum('bij,bjk->bik', att, h), 0.0)
    cat = jnp.concatenate([x, h_prime], axis=-1)
    coeff = jax.nn.sigmoid(cat @ gate_w.T + gate_b)
    return coeff * x + (1.0 - coeff) * h_prime


if __name__ == "__main__":
    # batch, nodes, features (n_in_feature == n_out_feature).
    B, N, F = 16, 16, 32

    key = jax.random.PRNGKey(0)
    kx, kadj, kw, kwb, ka, kgw, kgb = jax.random.split(key, 7)

    x = jax.random.normal(kx, (B, N, F), dtype=jnp.float32)

    # Symmetric 0/1 adjacency with self-loops.
    raw = jax.random.uniform(kadj, (B, N, N)) < 0.3
    adj = jnp.maximum(raw, jnp.transpose(raw, (0, 2, 1)))
    adj = jnp.maximum(adj, jnp.eye(N, dtype=bool)[None]).astype(jnp.float32)

    # Deterministic parameter init (shapes from the module's __init__).
    w_t = jax.random.normal(kw, (F, F), dtype=jnp.float32) * 0.1   # W.weight^T
    w_b = jax.random.normal(kwb, (F,), dtype=jnp.float32) * 0.1    # W.bias
    a = jax.random.normal(ka, (F, F), dtype=jnp.float32) * 0.1     # A
    gate_w = jax.random.normal(kgw, (1, 2 * F), dtype=jnp.float32) * 0.1  # gate.weight
    gate_b = jax.random.normal(kgb, (1,), dtype=jnp.float32) * 0.1        # gate.bias

    out = gat_forward(x, adj, w_t, w_b, a, gate_w, gate_b)
    out = jax.block_until_ready(out)

    ref = gat_reference(x, adj, w_t, w_b, a, gate_w, gate_b)
    assert out.shape == (B, N, F)
    # Tolerance accounts for bf16 MXU inputs (f32 accumulation) vs the f32
    # reference; the softmax exp() amplifies the ~0.4% bf16 rounding slightly.
    max_err = jnp.max(jnp.abs(out - ref))
    assert jnp.allclose(out, ref, atol=2e-2, rtol=2e-2), (
        f"mismatch vs reference (max |err| = {max_err})")

    print("KERNEL_OK")
</pallas_src>

<mosaic_0001>
module attributes {stable_mosaic.version = 11 : i64} {
  func.func @gat_kernel(%arg0: i32, %arg1: memref<256x32xf32, #tpu.memory_space<vmem>>, %arg2: memref<256x256xbf16, #tpu.memory_space<vmem>>, %arg3: memref<256x256xf32, #tpu.memory_space<vmem>>, %arg4: memref<32x64xbf16, #tpu.memory_space<vmem>>, %arg5: memref<1x64xf32, #tpu.memory_space<vmem>>, %arg6: memref<1x32xf32, #tpu.memory_space<vmem>>, %arg7: memref<1x32xf32, #tpu.memory_space<vmem>>, %arg8: memref<1x1xf32, #tpu.memory_space<vmem>>, %arg9: memref<256x32xf32, #tpu.memory_space<vmem>>) attributes {dimension_semantics = [#tpu.dimension_semantics<parallel>], iteration_bounds = array<i64: 1>, scalar_prefetch = 0 : i64, scratch_operands = 0 : i64, tpu.core_type = #tpu.core_type<tc>, window_params = [{transform_indices = @transform_0, window_bounds = array<i64: 256, 32>}, {transform_indices = @transform_1, window_bounds = array<i64: 256, 256>}, {pipeline_mode = #tpu.pipeline_mode<synchronous>, transform_indices = @transform_2, window_bounds = array<i64: 256, 256>}, {pipeline_mode = #tpu.pipeline_mode<synchronous>, transform_indices = @transform_3, window_bounds = array<i64: 32, 64>}, {pipeline_mode = #tpu.pipeline_mode<synchronous>, transform_indices = @transform_4, window_bounds = array<i64: 1, 64>}, {pipeline_mode = #tpu.pipeline_mode<synchronous>, transform_indices = @transform_5, window_bounds = array<i64: 1, 32>}, {pipeline_mode = #tpu.pipeline_mode<synchronous>, transform_indices = @transform_6, window_bounds = array<i64: 1, 32>}, {pipeline_mode = #tpu.pipeline_mode<synchronous>, transform_indices = @transform_7, window_bounds = array<i64: 1, 1>}, {transform_indices = @transform_8, window_bounds = array<i64: 256, 32>}]} {
    %c0 = arith.constant 0 : index
    %c0_0 = arith.constant 0 : index
    %0 = vector.load %arg1[%c0, %c0_0] : memref<256x32xf32, #tpu.memory_space<vmem>>, vector<256x32xf32>
    %c0_1 = arith.constant 0 : index
    %c0_2 = arith.constant 0 : index
    %1 = vector.load %arg2[%c0_1, %c0_2] : memref<256x256xbf16, #tpu.memory_space<vmem>>, vector<256x256xbf16>
    %2 = arith.extf %1 : vector<256x256xbf16> to vector<256x256xf32>
    %3 = arith.truncf %0 : vector<256x32xf32> to vector<256x32xbf16>
    %c0_3 = arith.constant 0 : index
    %c0_4 = arith.constant 0 : index
    %4 = vector.load %arg4[%c0_3, %c0_4] : memref<32x64xbf16, #tpu.memory_space<vmem>>, vector<32x64xbf16>
    %cst = arith.constant dense<0.000000e+00> : vector<256x64xf32>
    %5 = tpu.matmul %3, %4, %cst {dimension_numbers = #tpu.dot_dimension_numbers<[1], [0], [0], [1], [0, 0, 1, 1], [], []>} : vector<256x32xbf16>, vector<32x64xbf16>, vector<256x64xf32> -> vector<256x64xf32>
    %c0_5 = arith.constant 0 : index
    %c0_6 = arith.constant 0 : index
    %6 = vector.load %arg5[%c0_5, %c0_6] : memref<1x64xf32, #tpu.memory_space<vmem>>, vector<1x64xf32>
    %7 = vector.broadcast %6 : vector<1x64xf32> to vector<256x64xf32>
    %8 = arith.addf %5, %7 : vector<256x64xf32>
    %9 = vector.extract_strided_slice %8 {offsets = [0, 0], sizes = [256, 32], strides = [1, 1]} : vector<256x64xf32> to vector<256x32xf32>
    %10 = vector.extract_strided_slice %8 {offsets = [0, 32], sizes = [256, 32], strides = [1, 1]} : vector<256x64xf32> to vector<256x32xf32>
    %11 = arith.truncf %9 : vector<256x32xf32> to vector<256x32xbf16>
    %12 = arith.truncf %10 : vector<256x32xf32> to vector<256x32xbf16>
    %cst_7 = arith.constant dense<0.000000e+00> : vector<256x256xf32>
    %13 = tpu.matmul %12, %11, %cst_7 {dimension_numbers = #tpu.dot_dimension_numbers<[1], [1], [0], [0], [0, 0, 1, 0], [], []>} : vector<256x32xbf16>, vector<256x32xbf16>, vector<256x256xf32> -> vector<256x256xf32>
    %cst_8 = arith.constant 0.000000e+00 : f32
    %14 = vector.broadcast %cst_8 : f32 to vector<256x256xf32>
    %15 = arith.maximumf %13, %14 : vector<256x256xf32>
    %16 = arith.mulf %15, %2 : vector<256x256xf32>
    %c0_9 = arith.constant 0 : index
    %c0_10 = arith.constant 0 : index
    %17 = vector.load %arg3[%c0_9, %c0_10] : memref<256x256xf32, #tpu.memory_space<vmem>>, vector<256x256xf32>
    %18 = arith.addf %16, %17 : vector<256x256xf32>
    %cst_11 = arith.constant dense<0xFF800000> : vector<256xf32>
    %19 = vector.multi_reduction <maximumf>, %18, %cst_11 [0] : vector<256x256xf32> to vector<256xf32>
    %20 = vector.shape_cast %19 : vector<256xf32> to vector<1x256xf32>
    %21 = vector.broadcast %20 : vector<1x256xf32> to vector<256x256xf32>
    %22 = arith.subf %18, %21 : vector<256x256xf32>
    %23 = math.exp %22 : vector<256x256xf32>
    %cst_12 = arith.constant dense<0.000000e+00> : vector<256xf32>
    %24 = vector.multi_reduction <add>, %23, %cst_12 [0] : vector<256x256xf32> to vector<256xf32>
    %25 = vector.shape_cast %24 : vector<256xf32> to vector<1x256xf32>
    %26 = tpu.reciprocal %25 {approx = true} : vector<1x256xf32> -> vector<1x256xf32>
    %27 = vector.broadcast %26 : vector<1x256xf32> to vector<256x256xf32>
    %28 = arith.mulf %23, %27 : vector<256x256xf32>
    %29 = arith.mulf %28, %2 : vector<256x256xf32>
    %30 = arith.truncf %29 : vector<256x256xf32> to vector<256x256xbf16>
    %cst_13 = arith.constant dense<0.000000e+00> : vector<256x32xf32>
    %31 = tpu.matmul %30, %11, %cst_13 {dimension_numbers = #tpu.dot_dimension_numbers<[1], [0], [0], [1], [0, 0, 1, 1], [], []>} : vector<256x256xbf16>, vector<256x32xbf16>, vector<256x32xf32> -> vector<256x32xf32>
    %cst_14 = arith.constant 0.000000e+00 : f32
    %32 = vector.broadcast %cst_14 : f32 to vector<256x32xf32>
    %33 = arith.maximumf %31, %32 : vector<256x32xf32>
    %c0_15 = arith.constant 0 : index
    %c0_16 = arith.constant 0 : index
    %34 = vector.load %arg6[%c0_15, %c0_16] : memref<1x32xf32, #tpu.memory_space<vmem>>, vector<1x32xf32>
    %35 = vector.broadcast %34 : vector<1x32xf32> to vector<256x32xf32>
    %36 = arith.mulf %0, %35 : vector<256x32xf32>
    %c0_17 = arith.constant 0 : index
    %c0_18 = arith.constant 0 : index
    %37 = vector.load %arg7[%c0_17, %c0_18] : memref<1x32xf32, #tpu.memory_space<vmem>>, vector<1x32xf32>
    %38 = vector.broadcast %37 : vector<1x32xf32> to vector<256x32xf32>
    %39 = arith.mulf %33, %38 : vector<256x32xf32>
    %40 = arith.addf %36, %39 : vector<256x32xf32>
    %cst_19 = arith.constant dense<0.000000e+00> : vector<256xf32>
    %41 = vector.multi_reduction <add>, %40, %cst_19 [1] : vector<256x32xf32> to vector<256xf32>
    %42 = vector.shape_cast %41 : vector<256xf32> to vector<256x1xf32>
    %c0_20 = arith.constant 0 : index
    %c0_21 = arith.constant 0 : index
    %43 = vector.load %arg8[%c0_20, %c0_21] : memref<1x1xf32, #tpu.memory_space<vmem>>, vector<1x1xf32>
    %44 = vector.broadcast %43 : vector<1x1xf32> to vector<256x1xf32>
    %45 = arith.addf %42, %44 : vector<256x1xf32>
    %46 = arith.negf %45 : vector<256x1xf32>
    %47 = math.exp %46 : vector<256x1xf32>
    %cst_22 = arith.constant 1.000000e+00 : f32
    %48 = vector.broadcast %cst_22 : f32 to vector<256x1xf32>
    %49 = arith.addf %48, %47 : vector<256x1xf32>
    %50 = arith.divf %48, %49 : vector<256x1xf32>
    %51 = vector.broadcast %50 : vector<256x1xf32> to vector<256x32xf32>
    %52 = arith.mulf %51, %0 : vector<256x32xf32>
    %cst_23 = arith.constant 1.000000e+00 : f32
    %53 = vector.broadcast %cst_23 : f32 to vector<256x1xf32>
    %54 = arith.subf %53, %50 : vector<256x1xf32>
    %55 = vector.broadcast %54 : vector<256x1xf32> to vector<256x32xf32>
    %56 = arith.mulf %55, %33 : vector<256x32xf32>
    %57 = arith.addf %52, %56 : vector<256x32xf32>
    %c0_24 = arith.constant 0 : index
    %c0_25 = arith.constant 0 : index
    %58 = vector.load %arg9[%c0_24, %c0_25] : memref<256x32xf32, #tpu.memory_space<vmem>>, vector<256x32xf32>
    tpu.vector_store %arg9[%c0_24, %c0_25], %57 {strides = array<i32>} : memref<256x32xf32, #tpu.memory_space<vmem>>, vector<256x32xf32>,
    return
  }
  func.func @transform_0(%arg0: i32) -> (i32, i32) {
    %c0_i32 = arith.constant 0 : i32
    %c0_i32_0 = arith.constant 0 : i32
    return %arg0, %c0_i32 : i32, i32
  }
  func.func @transform_1(%arg0: i32) -> (i32, i32) {
    %c0_i32 = arith.constant 0 : i32
    %c0_i32_0 = arith.constant 0 : i32
    return %arg0, %c0_i32 : i32, i32
  }
  func.func @transform_2(%arg0: i32) -> (i32, i32) {
    %c0_i32 = arith.constant 0 : i32
    %c0_i32_0 = arith.constant 0 : i32
    %c0_i32_1 = arith.constant 0 : i32
    return %c0_i32, %c0_i32_0 : i32, i32
  }
  func.func @transform_3(%arg0: i32) -> (i32, i32) {
    %c0_i32 = arith.constant 0 : i32
    %c0_i32_0 = arith.constant 0 : i32
    %c0_i32_1 = arith.constant 0 : i32
    return %c0_i32, %c0_i32_0 : i32, i32
  }
  func.func @transform_4(%arg0: i32) -> (i32, i32) {
    %c0_i32 = arith.constant 0 : i32
    %c0_i32_0 = arith.constant 0 : i32
    %c0_i32_1 = arith.constant 0 : i32
    return %c0_i32, %c0_i32_0 : i32, i32
  }
  func.func @transform_5(%arg0: i32) -> (i32, i32) {
    %c0_i32 = arith.constant 0 : i32
    %c0_i32_0 = arith.constant 0 : i32
    %c0_i32_1 = arith.constant 0 : i32
    return %c0_i32, %c0_i32_0 : i32, i32
  }
  func.func @transform_6(%arg0: i32) -> (i32, i32) {
    %c0_i32 = arith.constant 0 : i32
    %c0_i32_0 = arith.constant 0 : i32
    %c0_i32_1 = arith.constant 0 : i32
    return %c0_i32, %c0_i32_0 : i32, i32
  }
  func.func @transform_7(%arg0: i32) -> (i32, i32) {
    %c0_i32 = arith.constant 0 : i32
    %c0_i32_0 = arith.constant 0 : i32
    %c0_i32_1 = arith.constant 0 : i32
    return %c0_i32, %c0_i32_0 : i32, i32
  }
  func.func @transform_8(%arg0: i32) -> (i32, i32) {
    %c0_i32 = arith.constant 0 : i32
    %c0_i32_0 = arith.constant 0 : i32
    return %arg0, %c0_i32 : i32, i32
  }
}

</mosaic_0001>

<bundles_post_ra>
// kernel: gat_forward.1
= control target key start
LH: loop header
LB: loop body
LE: loop exit
PB: predicated region body
PF: predicated region fallthrough
CT: control target
= control target key end

     0   :  { %s5825_s0 = inlined_call_operand.vmem [shape: f32[256,32], index: 0, kind: input, shape index: {}]   ;;  %s5826_s1 = inlined_call_operand.vmem [shape: bf16[256,256], index: 1, kind: input, shape index: {}]   ;;  %s5827_s2 = inlined_call_operand.vmem [shape: f32[256,256], index: 2, kind: input, shape index: {}]   ;;  %s5828_s3 = inlined_call_operand.vmem [shape: bf16[32,64], index: 3, kind: input, shape index: {}]   ;;  %s5829_s4 = inlined_call_operand.vmem [shape: f32[1,64], index: 4, kind: input, shape index: {}]   ;;  %s5830_s5 = inlined_call_operand.vmem [shape: f32[1,32], index: 5, kind: input, shape index: {}]   ;;  %s5831_s6 = inlined_call_operand.vmem [shape: f32[1,32], index: 6, kind: input, shape index: {}]   ;;  %s5832_s7 = inlined_call_operand.<no memory space> [shape: f32[1,1], index: 7, kind: input, shape index: {}]   ;;  %s5833_s8 = inlined_call_operand.hbm [shape: f32[256,32], index: 8, kind: output, shape index: {}]  }
   0x1   :  { %v13_v0 = vstv %s5832_s7 }
   0x2   :  { %14 = vst [vmem:[#allocation2] sm:$0x1] %v13_v0 }
   0x3   :  { %v2946_v1 = vld [vmem:[%s5828_s3] sm:$0xff]   ;;  %v2947_v2 = vld [vmem:[%s5828_s3 + $0x8] sm:$0xff]   ;;  %vm200_vm0 = vcmask 261120   ;;  %v35_v6 = vld [vmem:[%s5825_s0 + $0x10] sm:$0xff] }
   0x4   :  { %2895 = vmatprep.subr.bf16.mxu0 %v2946_v1  ;;  %v33_v3 = vld [vmem:[%s5825_s0] sm:$0xff]  ;;  %v34_v4 = vld [vmem:[%s5825_s0 + $0x8] sm:$0xff]  ;;  %v36_v7 = vld [vmem:[%s5825_s0 + $0x18] sm:$0xff] }
   0x5   :  { %2896 = vmatpush3.bf16.msra.mxu0 %v2946_v1  ;;  %v161_v5 = vpack.c.bf16 %v34_v4, %v33_v3  ;;  %v37_v8 = vld [vmem:[%s5825_s0 + $0x20] sm:$0xff]  ;;  %v38_v9 = vld [vmem:[%s5825_s0 + $0x28] sm:$0xff]  ;;  %v162_v10 = vpack.c.bf16 %v36_v7, %v35_v6  ;;  %v39_v12 = vld [vmem:[%s5825_s0 + $0x30] sm:$0xff] }
   0x6   :  { %2897 = vmatprep.subr.bf16.mxu0 %v2947_v2  ;;  %v163_v11 = vpack.c.bf16 %v38_v9, %v37_v8  ;;  %v40_v13 = vld [vmem:[%s5825_s0 + $0x38] sm:$0xff]  ;;  %v41_v14 = vld [vmem:[%s5825_s0 + $0x40] sm:$0xff]  ;;  %v42_v15 = vld [vmem:[%s5825_s0 + $0x48] sm:$0xff] }
   0x7   :  { %2899 = vmatprep.mubr.msk.bf16.mxu0 %vm200_vm0, %v161_v5 }
   0x9   :  { %2898 = vmatpush3.bf16.msra.mxu0 %v2947_v2 }
   0xc   :  { %2900 = vmatmul.mubr.msk.bf16.vlgmr.msra.gmra.mrb[0].mxu0 %vm200_vm0, %v162_v10 }
   0xd   :  { %2903 = vmatprep.mubr.msk.bf16.mxu0 %vm200_vm0, %v163_v11 }
   0xe   :  { %15 = vsyncpa [#allocation4], 0  ;;  %v164_v16 = vpack.c.bf16 %v40_v13, %v39_v12  ;;  %v165_v17 = vpack.c.bf16 %v42_v15, %v41_v14  ;;  %v43_v18 = vld [vmem:[%s5825_s0 + $0x50] sm:$0xff]  ;;  %v44_v19 = vld [vmem:[%s5825_s0 + $0x58] sm:$0xff]  ;;  %s3296_s27 = smov 96   ;;  %s3298_s29 = smov [#allocation3]  }
   0xf   :  { %v45_v20 = vld [vmem:[%s5825_s0 + $0x60] sm:$0xff]  ;;  %v46_v21 = vld [vmem:[%s5825_s0 + $0x68] sm:$0xff]  ;;  %v166_v22 = vpack.c.bf16 %v44_v19, %v43_v18  ;;  %v47_v24 = vld [vmem:[%s5825_s0 + $0x70] sm:$0xff]  ;;  %s2636_s30 = sshll.u32 %s3298_s29, 4  ;;  %s2637_s30 = int_to_ptr.vmem [resolvable:$true] %s2636_s30 }
  0x10   :  { %v167_v23 = vpack.c.bf16 %v46_v21, %v45_v20  ;;  %v48_v25 = vld [vmem:[%s5825_s0 + $0x78] sm:$0xff]  ;;  %v49_v26 = vld [vmem:[%s5825_s0 + $0x80] sm:$0xff]  ;;  %v50_v27 = vld [vmem:[%s5825_s0 + $0x88] sm:$0xff]  ;;  %s3272_s11 = scalar_lea.vmem %s2637_s30, 4096  ;;  %p3277_p1 = scmp.lt.s32.totalorder %s2637_s30, %s2637_s30 }
  0x11   :  { %v168_v28 = vpack.c.bf16 %v48_v25, %v47_v24  ;;  %v169_v29 = vpack.c.bf16 %v50_v27, %v49_v26  ;;  %v51_v30 = vld [vmem:[%s5825_s0 + $0x90] sm:$0xff]  ;;  %v52_v31 = vld [vmem:[%s5825_s0 + $0x98] sm:$0xff]  ;;  %v53_v32 = vld [vmem:[%s5825_s0 + $0xa0] sm:$0xff]  ;;  %p3273_p0 = scmp.ne.s32.totalorder %s2637_s30, %s3272_s11  ;;  %p3278_p2 = scmp.lt.s32.totalorder %s3272_s11, %s3272_s11 }
  0x12   :  { %v54_v33 = vld [vmem:[%s5825_s0 + $0xa8] sm:$0xff]  ;;  %v170_v34 = vpack.c.bf16 %v52_v31, %v51_v30  ;;  %v55_v36 = vld [vmem:[%s5825_s0 + $0xb0] sm:$0xff]  ;;  %v56_v37 = vld [vmem:[%s5825_s0 + $0xb8] sm:$0xff] }
  0x13   :  { %v171_v35 = vpack.c.bf16 %v54_v33, %v53_v32  ;;  %v57_v38 = vld [vmem:[%s5825_s0 + $0xc0] sm:$0xff]  ;;  %v58_v39 = vld [vmem:[%s5825_s0 + $0xc8] sm:$0xff]  ;;  %v172_v40 = vpack.c.bf16 %v56_v37, %v55_v36  ;;  %v59_v42 = vld [vmem:[%s5825_s0 + $0xd0] sm:$0xff]  ;;  %p3279_p3 = por %p3278_p2, %p3277_p1 }
  0x14   :  { %2904 = vmatmul.mubr.msk.bf16.gmra.mrb[4].mxu0 %vm200_vm0, %v164_v16  ;;  %v173_v41 = vpack.c.bf16 %v58_v39, %v57_v38  ;;  %v60_v43 = vld [vmem:[%s5825_s0 + $0xd8] sm:$0xff]  ;;  %v61_v44 = vld [vmem:[%s5825_s0 + $0xe0] sm:$0xff]  ;;  %v62_v45 = vld [vmem:[%s5825_s0 + $0xe8] sm:$0xff] }
  0x15   :  { %2907 = vmatprep.mubr.msk.bf16.mxu0 %vm200_vm0, %v165_v17  ;;  %v174_v46 = vpack.c.bf16 %v60_v43, %v59_v42  ;;  %v175_v47 = vpack.c.bf16 %v62_v45, %v61_v44  ;;  %v63_v48 = vld [vmem:[%s5825_s0 + $0xf0] sm:$0xff]  ;;  %v64_v49 = vld [vmem:[%s5825_s0 + $0xf8] sm:$0xff]  ;;  %v3470_v52 = vld [vmem:[%s5829_s4] ss:$0 sm:$0xff]  ;;  %p3280_p4 = pnand %p3279_p3, %p3273_p0 }
  0x16   :  { %v176_v50 = vpack.c.bf16 %v64_v49, %v63_v48 }
  0x1c   :  { %2908 = vmatmul.mubr.msk.bf16.gmra.mrb[8].mxu0 %vm200_vm0, %v166_v22 }
  0x1d   :  { %2911 = vmatprep.mubr.msk.bf16.mxu0 %vm200_vm0, %v167_v23 }
  0x24   :  { %2912 = vmatmul.mubr.msk.bf16.gmra.mrb[12].mxu0 %vm200_vm0, %v168_v28 }
  0x25   :  { %2915 = vmatprep.mubr.msk.bf16.mxu0 %vm200_vm0, %v169_v29 }
  0x2c   :  { %2916 = vmatmul.mubr.msk.bf16.gmra.mrb[16].mxu0 %vm200_vm0, %v170_v34 }
  0x2d   :  { %2919 = vmatprep.mubr.msk.bf16.mxu0 %vm200_vm0, %v171_v35 }
  0x34   :  { %2920 = vmatmul.mubr.msk.bf16.gmra.mrb[20].mxu0 %vm200_vm0, %v172_v40 }
  0x35   :  { %2923 = vmatprep.mubr.msk.bf16.mxu0 %vm200_vm0, %v173_v41 }
  0x3c   :  { %2924 = vmatmul.mubr.msk.bf16.gmra.mrb[24].mxu0 %vm200_vm0, %v174_v46 }
  0x3d   :  { %2927 = vmatprep.mubr.msk.bf16.mxu0 %vm200_vm0, %v175_v47 }
  0x44   :  { %2928 = vmatmul.mubr.msk.bf16.gmra.mrb[28].mxu0 %vm200_vm0, %v176_v50 }
  0xdf   :  { %v2901_v51 = vpop.f32.mrb[0].mxu0 }
  0xe0   :  { %v283_v53 = vpop.f32.mrb[1].mxu0  ;;  %v292_v55 = vadd.f32 %v2901_v51, %v3470_v52 }
  0xe1   :  { %v2902_v54 = vpop.f32.mrb[2].mxu0  ;;  %v284_v58 = vadd.f32 %v3470_v52, %v283_v53 }
  0xe2   :  { %v295_v56 = vadd.f32 %v2902_v54, %v3470_v52  ;;  %v286_v57 = vpop.f32.mrb[3].mxu0 }
  0xe3   :  { %v287_v59 = vadd.f32 %v3470_v52, %v286_v57 }
  0xe4   :  { %v3476_v60 = vpack.c.bf16 %v295_v56, %v292_v55 }
  0xe5   :  { %v410_v61 = vpack.c.bf16 %v287_v59, %v284_v58 }
  0xe6   :  { %v526_v50 = vsel %vm200_vm0, %v3476_v60, 0 }
  0xe7   :  { %442 = vrot.lane.b32.xlu0 %v410_v61, %s3296_s27  ;;  %v2905_v62 = vpop.f32.mrb[4].mxu0  ;;  %v523_v39 = vsel %vm200_vm0, %v410_v61, 0 }
  0xe8   :  { %v308_v63 = vadd.f32 %v2905_v62, %v3470_v52  ;;  %v299_v0 = vpop.f32.mrb[5].mxu0 }
  0xe9   :  { %v300_v1 = vadd.f32 %v3470_v52, %v299_v0  ;;  %v2906_v2 = vpop.f32.mrb[6].mxu0 }
  0xea   :  { %v311_v3 = vadd.f32 %v2906_v2, %v3470_v52  ;;  %v302_v4 = vpop.f32.mrb[7].mxu0 }
  0xeb   :  { %v303_v5 = vadd.f32 %v3470_v52, %v302_v4  ;;  %444 = vrot.lane.b32.xlu0 %v3476_v60, %s3296_s27 }
  0xec   :  { %v3485_v6 = vpack.c.bf16 %v311_v3, %v308_v63 }
  0xed   :  { %v3487_v7 = vpack.c.bf16 %v303_v5, %v300_v1 }
  0xef   :  { %446 = vrot.lane.b32.xlu1 %v3487_v7, %s3296_s27  ;;  %v2909_v8 = vpop.f32.mrb[8].mxu0  ;;  %v529_v62 = vsel %vm200_vm0, %v3487_v7, 0 }
  0xf0   :  { %v324_v9 = vadd.f32 %v2909_v8, %v3470_v52  ;;  %v315_v10 = vpop.f32.mrb[9].mxu0 }
  0xf1   :  { %v316_v11 = vadd.f32 %v3470_v52, %v315_v10  ;;  %v2910_v12 = vpop.f32.mrb[10].mxu0 }
  0xf2   :  { %v327_v13 = vadd.f32 %v2910_v12, %v3470_v52  ;;  %v318_v14 = vpop.f32.mrb[11].mxu0 }
  0xf3   :  { %448 = vrot.lane.b32.xlu1 %v3485_v6, %s3296_s27  ;;  %v319_v15 = vadd.f32 %v3470_v52, %v318_v14 }
  0xf4   :  { %v3497_v16 = vpack.c.bf16 %v327_v13, %v324_v9  ;;  %v532_v9 = vsel %vm200_vm0, %v3485_v6, 0 }
  0xf5   :  { %v3499_v17 = vpack.c.bf16 %v319_v15, %v316_v11 }
  0xf6   :  { %v538_v10 = vsel %vm200_vm0, %v3497_v16, 0 }
  0xf7   :  { %v2913_v18 = vpop.f32.mrb[12].mxu0  ;;  %452 = vrot.lane.b32.xlu1 %v3497_v16, %s3296_s27  ;;  %450 = vrot.lane.b32.xlu0 %v3499_v17, %s3296_s27 }
  0xf8   :  { %v340_v19 = vadd.f32 %v2913_v18, %v3470_v52  ;;  %v331_v20 = vpop.f32.mrb[13].mxu0 }
  0xf9   :  { %v332_v21 = vadd.f32 %v3470_v52, %v331_v20  ;;  %v2914_v22 = vpop.f32.mrb[14].mxu0 }
  0xfa   :  { %v343_v23 = vadd.f32 %v2914_v22, %v3470_v52  ;;  %v334_v24 = vpop.f32.mrb[15].mxu0 }
  0xfb   :  { %v335_v25 = vadd.f32 %v3470_v52, %v334_v24 }
  0xfc   :  { %v3509_v26 = vpack.c.bf16 %v343_v23, %v340_v19 }
  0xfd   :  { %v3511_v27 = vpack.c.bf16 %v335_v25, %v332_v21 }
  0xfe   :  { %456 = vrot.lane.b32.xlu1 %v3509_v26, %s3296_s27  ;;  %v544_v11 = vsel %vm200_vm0, %v3509_v26, 0 }
  0xff   :  { %v2917_v28 = vpop.f32.mrb[16].mxu0  ;;  %454 = vrot.lane.b32.xlu0 %v3511_v27, %s3296_s27 }
 0x100   :  { %v356_v29 = vadd.f32 %v2917_v28, %v3470_v52  ;;  %v347_v30 = vpop.f32.mrb[17].mxu0 }
 0x101   :  { %v348_v31 = vadd.f32 %v3470_v52, %v347_v30  ;;  %v2918_v32 = vpop.f32.mrb[18].mxu0  ;;  %v3606_v30 = vld [vmem:[%s5826_s1] sm:$0xff] }
 0x102   :  { %v359_v33 = vadd.f32 %v2918_v32, %v3470_v52  ;;  %v350_v34 = vpop.f32.mrb[19].mxu0  ;;  %6038 = vst [vmem:[#allocation6_spill] sm:$0xff] %v3606_v30 }
 0x103   :  { %v351_v35 = vadd.f32 %v3470_v52, %v350_v34  ;;  %v3616_v34 = vld [vmem:[%s5826_s1 + $0x10] sm:$0xff] }
 0x104   :  { %v419_v36 = vpack.c.bf16 %v359_v33, %v356_v29  ;;  %v3611_v33 = vld [vmem:[%s5826_s1 + $0x8] sm:$0xff]  ;;  %6040 = vst [vmem:[#allocation8_spill] sm:$0xff] %v3616_v34 }
 0x105   :  { %v418_v37 = vpack.c.bf16 %v351_v35, %v348_v31  ;;  %6039 = vst [vmem:[#allocation7_spill] sm:$0xff] %v3611_v33  ;;  %v5861_v35 = vunpack.c.l.bf16 %v3606_v30 }
 0x106   :  { %460 = vrot.lane.b32.xlu1 %v419_v36, %s3296_s27 }
 0x107   :  { %v2921_v38 = vpop.f32.mrb[20].mxu0  ;;  %2931 = vmatprep.subr.msk.bf16.mxu1 %vm200_vm0, %v418_v37  ;;  %2783 = vmatprep.subr.bf16.mxu0 %v418_v37 }
 0x108   :  { %v372_v40 = vadd.f32 %v2921_v38, %v3470_v52  ;;  %v363_v41 = vpop.f32.mrb[21].mxu0  ;;  %2736 = vmatpush3.bf16.xpose.msra.mxu1 %v523_v39  ;;  %2784 = vmatpush3.bf16.msra.mxu0 %v410_v61  ;;  %v3623_v39 = vld [vmem:[%s5826_s1 + $0x18] sm:$0xff] }
 0x109   :  { %v364_v42 = vadd.f32 %v3470_v52, %v363_v41  ;;  %v2922_v43 = vpop.f32.mrb[22].mxu0  ;;  %2785 = vmatprep.subr.bf16.mxu0 %v419_v36  ;;  %2932 = vmatprep.subr.msk.bf16.mxu1 %vm200_vm0, %v419_v36  ;;  %6041 = vst [vmem:[#allocation9_spill] sm:$0xff] %v3623_v39 }
 0x10a   :  { %v375_v44 = vadd.f32 %v2922_v43, %v3470_v52  ;;  %v366_v45 = vpop.f32.mrb[23].mxu0  ;;  %458 = vrot.lane.b32.xlu0 %v418_v37, %s3296_s27  ;;  %v5859_v37 = vunpack.c.h.bf16 %v3606_v30  ;;  %v5858_v43 = vunpack.c.h.bf16 %v3611_v33 }
 0x10b   :  { %v367_v46 = vadd.f32 %v3470_v52, %v366_v45 }
 0x10c   :  { %v421_v47 = vpack.c.bf16 %v375_v44, %v372_v40  ;;  %2786 = vmatpush3.bf16.msra.mxu0 %v3476_v60  ;;  %v5860_v40 = vunpack.c.l.bf16 %v3611_v33 }
 0x10d   :  { %v420_v48 = vpack.c.bf16 %v367_v46, %v364_v42  ;;  %v5851_v42 = vunpack.c.l.bf16 %v3616_v34  ;;  %v5857_v46 = vunpack.c.h.bf16 %v3616_v34 }
 0x10e   :  { %464 = vrot.lane.b32.xlu1 %v421_v47, %s3296_s27 }
 0x10f   :  { %v2925_v49 = vpop.f32.mrb[24].mxu0  ;;  %2787 = vmatprep.subr.bf16.mxu0 %v420_v48  ;;  %462 = vrot.lane.b32.xlu0 %v420_v48, %s3296_s27 }
 0x110   :  { %v388_v51 = vadd.f32 %v2925_v49, %v3470_v52  ;;  %v379_v53 = vpop.f32.mrb[25].mxu0  ;;  %2738 = vmatpush3.bf16.xpose.msra.mxu1 %v526_v50  ;;  %2788 = vmatpush3.bf16.msra.mxu0 %v3487_v7  ;;  %v5850_v50 = vunpack.c.l.bf16 %v3623_v39 }
 0x111   :  { %v380_v54 = vadd.f32 %v3470_v52, %v379_v53  ;;  %v2926_v55 = vpop.f32.mrb[26].mxu0  ;;  %2789 = vmatprep.subr.bf16.mxu0 %v421_v47  ;;  %2933 = vmatprep.subr.msk.bf16.mxu1 %vm200_vm0, %v420_v48 }
 0x112   :  { %v391_v56 = vadd.f32 %v2926_v55, %v3470_v52  ;;  %v382_v57 = vpop.f32.mrb[27].mxu0 }
 0x113   :  { %v383_v58 = vadd.f32 %v3470_v52, %v382_v57  ;;  %v5855_v57 = vunpack.c.h.bf16 %v3623_v39 }
 0x114   :  { %v423_v59 = vpack.c.bf16 %v391_v56, %v388_v51  ;;  %2790 = vmatpush3.bf16.msra.mxu0 %v3485_v6  ;;  %v541_v6 = vsel %vm200_vm0, %v3511_v27, 0  ;;  %v891_v51 = vld [vmem:[%s5827_s2] sm:$0xff] }
 0x115   :  { %v422_v60 = vpack.c.bf16 %v383_v58, %v380_v54  ;;  %v895_v54 = vld [vmem:[%s5827_s2 + $0x20] sm:$0xff]  ;;  %v892_v58 = vld [vmem:[%s5827_s2 + $0x8] sm:$0xff] }
 0x116   :  { %468 = vrot.lane.b32.xlu1 %v423_v59, %s3296_s27 }
 0x117   :  { %v2929_v61 = vpop.f32.mrb[28].mxu0  ;;  %2791 = vmatprep.subr.bf16.mxu0 %v422_v60  ;;  %466 = vrot.lane.b32.xlu0 %v422_v60, %s3296_s27 }
 0x118   :  { %v404_v63 = vadd.f32 %v2929_v61, %v3470_v52  ;;  %v395_v0 = vpop.f32.mrb[29].mxu0  ;;  %2740 = vmatpush3.bf16.xpose.msra.mxu1 %v529_v62  ;;  %2792 = vmatpush3.bf16.msra.mxu0 %v3499_v17  ;;  %v896_v61 = vld [vmem:[%s5827_s2 + $0x28] sm:$0xff] }
 0x119   :  { %v396_v1 = vadd.f32 %v3470_v52, %v395_v0  ;;  %v2930_v2 = vpop.f32.mrb[30].mxu0  ;;  %2793 = vmatprep.subr.bf16.mxu0 %v423_v59  ;;  %2934 = vmatprep.subr.msk.bf16.mxu1 %vm200_vm0, %v421_v47  ;;  %v893_v0 = vld [vmem:[%s5827_s2 + $0x10] sm:$0xff] }
 0x11a   :  { %v407_v3 = vadd.f32 %v2930_v2, %v3470_v52  ;;  %v398_v4 = vpop.f32.mrb[31].mxu0 }
 0x11b   :  { %v399_v5 = vadd.f32 %v3470_v52, %v398_v4  ;;  %v535_v52 = vsel %vm200_vm0, %v3499_v17, 0 }
 0x11c   :  { %v425_v7 = vpack.c.bf16 %v407_v3, %v404_v63  ;;  %2794 = vmatpush3.bf16.msra.mxu0 %v3497_v16  ;;  %v897_v3 = vld [vmem:[%s5827_s2 + $0x30] sm:$0xff] }
 0x11d   :  { %v424_v8 = vpack.c.bf16 %v399_v5, %v396_v1  ;;  %v3664_v5 = vld [vmem:[%s5826_s1 + $0x20] sm:$0xff] }
 0x11e   :  { %472 = vrot.lane.b32.xlu1 %v425_v7, %s3296_s27  ;;  %6042 = vst [vmem:[#allocation10_spill] sm:$0xff] %v3664_v5 }
 0x11f   :  { %2795 = vmatprep.subr.bf16.mxu0 %v424_v8  ;;  %470 = vrot.lane.b32.xlu0 %v424_v8, %s3296_s27 }
 0x120   :  { %2742 = vmatpush3.bf16.xpose.msra.mxu1 %v532_v9  ;;  %2796 = vmatpush3.bf16.msra.mxu0 %v3511_v27 }
 0x121   :  { %2797 = vmatprep.subr.bf16.mxu0 %v425_v7  ;;  %2935 = vmatprep.subr.msk.bf16.mxu1 %vm200_vm0, %v422_v60 }
 0x124   :  { %2798 = vmatpush3.bf16.msra.mxu0 %v3509_v26 }
 0x128   :  { %2744 = vmatpush3.bf16.xpose.msra.mxu1 %v535_v52 }
 0x129   :  { %2936 = vmatprep.subr.msk.bf16.mxu1 %vm200_vm0, %v423_v59 }
 0x130   :  { %2746 = vmatpush3.bf16.xpose.msra.mxu1 %v538_v10  ;;  %v898_v10 = vld [vmem:[%s5827_s2 + $0x38] sm:$0xff] }
 0x131   :  { %2937 = vmatprep.subr.msk.bf16.mxu1 %vm200_vm0, %v424_v8  ;;  %v894_v8 = vld [vmem:[%s5827_s2 + $0x18] sm:$0xff] }
 0x138   :  { %2748 = vmatpush3.bf16.xpose.msra.mxu1 %v541_v6 }
 0x139   :  { %2938 = vmatprep.subr.msk.bf16.mxu1 %vm200_vm0, %v425_v7 }
 0x140   :  { %2750 = vmatpush3.bf16.xpose.msra.mxu1 %v544_v11 }
 0x159   :  { %v443_v12 = vpop.permute.xlu0 %442 }
 0x15a   :  { %2751 = vmatprep.mubr.msk.bf16.mxu1 %vm200_vm0, %v443_v12 }
 0x15b   :  { %2752 = vmatmul.mubr.msk.bf16.vlgmr.msra.gmra.mrb[0].mxu1 %vm200_vm0, %v443_v12 }
 0x15d   :  { %v445_v13 = vpop.permute.xlu0 %444 }
 0x15e   :  { %2753 = vmatprep.mubr.msk.bf16.mxu1 %vm200_vm0, %v445_v13 }
 0x161   :  { %v447_v14 = vpop.permute.xlu1 %446 }
 0x163   :  { %2754 = vmatmul.mubr.msk.bf16.gmra.mrb[4].mxu1 %vm200_vm0, %v445_v13  ;;  %v3687_v13 = vld [vmem:[%s5826_s1 + $0x28] sm:$0xff] }
 0x164   :  { %2755 = vmatprep.mubr.msk.bf16.mxu1 %vm200_vm0, %v447_v14  ;;  %6043 = vst [vmem:[#allocation11_spill] sm:$0xff] %v3687_v13 }
 0x165   :  { %v449_v15 = vpop.permute.xlu1 %448 }
 0x169   :  { %v451_v16 = vpop.permute.xlu0 %450  ;;  %v453_v17 = vpop.permute.xlu1 %452 }
 0x16b   :  { %2756 = vmatmul.mubr.msk.bf16.gmra.mrb[8].mxu1 %vm200_vm0, %v447_v14 }
 0x16c   :  { %2757 = vmatprep.mubr.msk.bf16.mxu1 %vm200_vm0, %v449_v15 }
 0x170   :  { %v457_v19 = vpop.permute.xlu1 %456 }
 0x171   :  { %v455_v18 = vpop.permute.xlu0 %454 }
 0x173   :  { %2758 = vmatmul.mubr.msk.bf16.gmra.mrb[12].mxu1 %vm200_vm0, %v449_v15 }
 0x174   :  { %2759 = vmatprep.mubr.msk.bf16.mxu1 %vm200_vm0, %v451_v16 }
 0x178   :  { %v461_v21 = vpop.permute.xlu1 %460 }
 0x17b   :  { %2760 = vmatmul.mubr.msk.bf16.gmra.mrb[16].mxu1 %vm200_vm0, %v451_v16 }
 0x17c   :  { %2761 = vmatprep.mubr.msk.bf16.mxu1 %vm200_vm0, %v453_v17  ;;  %v459_v20 = vpop.permute.xlu0 %458 }
 0x180   :  { %v465_v23 = vpop.permute.xlu1 %464 }
 0x181   :  { %v463_v22 = vpop.permute.xlu0 %462 }
 0x183   :  { %2762 = vmatmul.mubr.msk.bf16.gmra.mrb[20].mxu1 %vm200_vm0, %v453_v17  ;;  %v5847_v17 = vunpack.c.l.bf16 %v3664_v5 }
 0x184   :  { %2763 = vmatprep.mubr.msk.bf16.mxu1 %vm200_vm0, %v455_v18 }
 0x188   :  { %v469_v25 = vpop.permute.xlu1 %468 }
 0x189   :  { %v467_v24 = vpop.permute.xlu0 %466 }
 0x18b   :  { %2764 = vmatmul.mubr.msk.bf16.gmra.mrb[24].mxu1 %vm200_vm0, %v455_v18 }
 0x18c   :  { %2765 = vmatprep.mubr.msk.bf16.mxu1 %vm200_vm0, %v457_v19 }
 0x190   :  { %v473_v27 = vpop.permute.xlu1 %472 }
 0x191   :  { %v471_v26 = vpop.permute.xlu0 %470 }
 0x193   :  { %2766 = vmatmul.mubr.msk.bf16.gmra.mrb[28].mxu1 %vm200_vm0, %v457_v19 }
 0x194   :  { %2767 = vmatprep.mubr.msk.bf16.mxu1 %vm200_vm0, %v459_v20 }
 0x19b   :  { %2768 = vmatmul.mubr.msk.bf16.gmra.mrb[32].mxu1 %vm200_vm0, %v459_v20 }
 0x19c   :  { %2769 = vmatprep.mubr.msk.bf16.mxu1 %vm200_vm0, %v461_v21 }
 0x1a3   :  { %2770 = vmatmul.mubr.msk.bf16.gmra.mrb[36].mxu1 %vm200_vm0, %v461_v21 }
 0x1a4   :  { %2771 = vmatprep.mubr.msk.bf16.mxu1 %vm200_vm0, %v463_v22 }
 0x1ab   :  { %2772 = vmatmul.mubr.msk.bf16.gmra.mrb[40].mxu1 %vm200_vm0, %v463_v22  ;;  %v5849_v22 = vunpack.c.h.bf16 %v3664_v5 }
 0x1ac   :  { %2773 = vmatprep.mubr.msk.bf16.mxu1 %vm200_vm0, %v465_v23 }
 0x1b3   :  { %2774 = vmatmul.mubr.msk.bf16.gmra.mrb[44].mxu1 %vm200_vm0, %v465_v23 }
 0x1b4   :  { %2775 = vmatprep.mubr.msk.bf16.mxu1 %vm200_vm0, %v467_v24 }
 0x1bb   :  { %2776 = vmatmul.mubr.msk.bf16.gmra.mrb[48].mxu1 %vm200_vm0, %v467_v24 }
 0x1bc   :  { %2777 = vmatprep.mubr.msk.bf16.mxu1 %vm200_vm0, %v469_v25 }
 0x1c3   :  { %2778 = vmatmul.mubr.msk.bf16.gmra.mrb[52].mxu1 %vm200_vm0, %v469_v25 }
 0x1c4   :  { %2779 = vmatprep.mubr.msk.bf16.mxu1 %vm200_vm0, %v471_v26 }
 0x1cb   :  { %2780 = vmatmul.mubr.msk.bf16.gmra.mrb[56].mxu1 %vm200_vm0, %v471_v26  ;;  %v5845_v26 = vunpack.c.l.bf16 %v3687_v13 }
 0x1cc   :  { %2781 = vmatprep.mubr.msk.bf16.mxu1 %vm200_vm0, %v473_v27 }
 0x1d3   :  { %2782 = vmatmul.mubr.msk.bf16.gmra.mrb[60].mxu1 %vm200_vm0, %v473_v27 }
 0x22e   :  { %v604_v28 = vpop.f32.mrb[0].mxu1 }
 0x22f   :  { %v606_v29 = vpop.f32.mrb[1].mxu1  ;;  %v763_v36 = vmax.f32 %v604_v28, 0.0  ;;  %v899_v28 = vld [vmem:[%s5827_s2 + $0x40] sm:$0xff] }
 0x230   :  { %v608_v31 = vpop.f32.mrb[2].mxu1  ;;  %v764_v38 = vmax.f32 %v606_v29, 0.0 }
 0x231   :  { %v610_v32 = vpop.f32.mrb[3].mxu1  ;;  %v765_v41 = vmax.f32 %v608_v31, 0.0  ;;  %v827_v47 = vmul.f32 %v763_v36, %v5861_v35  ;;  %v3955_v35 = vld [vmem:[%s5826_s1 + $0x80] sm:$0xff] }
 0x232   :  { %v766_v44 = vmax.f32 %v610_v32, 0.0  ;;  %v828_v53 = vmul.f32 %v764_v38, %v5859_v37  ;;  %v5848_v32 = vunpack.c.h.bf16 %v3687_v13  ;;  %v900_v38 = vld [vmem:[%s5827_s2 + $0x48] sm:$0xff]  ;;  %6060 = vst [vmem:[#allocation28_spill] sm:$0xff] %v3955_v35 }
 0x233   :  { %v829_v59 = vmul.f32 %v765_v41, %v5860_v40  ;;  %v3666_v7 = vadd.f32 %v891_v51, %v827_v47  ;;  %v901_v47 = vld [vmem:[%s5827_s2 + $0x50] sm:$0xff] }
 0x234   :  { %v830_v1 = vmul.f32 %v766_v44, %v5858_v43  ;;  %v3678_v6 = vadd.f32 %v892_v58, %v828_v53  ;;  %v3741_v58 = vld [vmem:[%s5826_s1 + $0x38] sm:$0xff]  ;;  %v921_v40 = vld [vmem:[%s5827_s2 + $0xf0] sm:$0xff] }
 0x235   :  { %v3689_v14 = vadd.f32 %v893_v0, %v829_v59  ;;  %6045 = vst [vmem:[#allocation13_spill] sm:$0xff] %v3741_v58 }
 0x236   :  { %v614_v45 = vpop.f32.mrb[4].mxu1  ;;  %v3696_v18 = vadd.f32 %v894_v8, %v830_v1  ;;  %v5838_v8 = vunpack.c.l.bf16 %v3741_v58 }
 0x237   :  { %v767_v48 = vmax.f32 %v614_v45, 0.0  ;;  %v616_v49 = vpop.f32.mrb[5].mxu1 }
 0x238   :  { %v768_v55 = vmax.f32 %v616_v49, 0.0  ;;  %v618_v56 = vpop.f32.mrb[6].mxu1  ;;  %v3725_v49 = vld [vmem:[%s5826_s1 + $0x30] sm:$0xff] }
 0x239   :  { %v831_v60 = vmul.f32 %v767_v48, %v5851_v42  ;;  %v769_v62 = vmax.f32 %v618_v56, 0.0  ;;  %v620_v63 = vpop.f32.mrb[7].mxu1  ;;  %6044 = vst [vmem:[#allocation12_spill] sm:$0xff] %v3725_v49  ;;  %v5841_v1 = vunpack.c.h.bf16 %v3725_v49  ;;  %v3909_v42 = vld [vmem:[%s5826_s1 + $0x70] sm:$0xff] }
 0x23a   :  { %v832_v2 = vmul.f32 %v768_v55, %v5857_v46  ;;  %v770_v4 = vmax.f32 %v620_v63, 0.0  ;;  %6056 = vst [vmem:[#allocation24_spill] sm:$0xff] %v3909_v42 }
 0x23b   :  { %v3671_v9 = vadd.f32 %v895_v54, %v831_v60  ;;  %v833_v52 = vmul.f32 %v769_v62, %v5850_v50  ;;  %v902_v54 = vld [vmem:[%s5827_s2 + $0x58] sm:$0xff]  ;;  %v917_v50 = vld [vmem:[%s5827_s2 + $0xd0] sm:$0xff] }
 0x23c   :  { %v3680_v11 = vadd.f32 %v896_v61, %v832_v2  ;;  %v834_v12 = vmul.f32 %v770_v4, %v5855_v57  ;;  %v5839_v61 = vunpack.c.l.bf16 %v3725_v49 }
 0x23d   :  { %v1019_v15 = vmax.f32 %v3666_v7, %v3671_v9  ;;  %v3693_v16 = vadd.f32 %v897_v3, %v833_v52 }
 0x23e   :  { %v1056_v19 = vmax.f32 %v3678_v6, %v3680_v11  ;;  %v3700_v20 = vadd.f32 %v898_v10, %v834_v12  ;;  %v624_v21 = vpop.f32.mrb[8].mxu1  ;;  %v903_v10 = vld [vmem:[%s5827_s2 + $0x60] sm:$0xff] }
 0x23f   :  { %v1020_v23 = vmax.f32 %v3689_v14, %v3693_v16  ;;  %v771_v24 = vmax.f32 %v624_v21, 0.0  ;;  %v626_v25 = vpop.f32.mrb[9].mxu1 }
 0x240   :  { %v1057_v27 = vmax.f32 %v3696_v18, %v3700_v20  ;;  %v772_v29 = vmax.f32 %v626_v25, 0.0  ;;  %v628_v31 = vpop.f32.mrb[10].mxu1 }
 0x241   :  { %v835_v36 = vmul.f32 %v771_v24, %v5847_v17  ;;  %v773_v41 = vmax.f32 %v628_v31, 0.0  ;;  %v630_v44 = vpop.f32.mrb[11].mxu1  ;;  %v3771_v31 = vld [vmem:[%s5826_s1 + $0x40] sm:$0xff] }
 0x242   :  { %v836_v45 = vmul.f32 %v772_v29, %v5849_v22  ;;  %v774_v48 = vmax.f32 %v630_v44, 0.0  ;;  %6046 = vst [vmem:[#allocation14_spill] sm:$0xff] %v3771_v31 }
 0x243   :  { %v3727_v51 = vadd.f32 %v899_v28, %v835_v36  ;;  %v837_v53 = vmul.f32 %v773_v41, %v5845_v26  ;;  %v905_v28 = vld [vmem:[%s5827_s2 + $0x70] sm:$0xff]  ;;  %v906_v41 = vld [vmem:[%s5827_s2 + $0x78] sm:$0xff] }
 0x244   :  { %v3734_v55 = vadd.f32 %v900_v38, %v836_v45  ;;  %v838_v56 = vmul.f32 %v774_v48, %v5848_v32 }
 0x245   :  { %v1021_v59 = vmax.f32 %v1019_v15, %v3727_v51  ;;  %v3744_v60 = vadd.f32 %v901_v47, %v837_v53  ;;  %v3787_v47 = vld [vmem:[%s5826_s1 + $0x48] sm:$0xff] }
 0x246   :  { %v1058_v62 = vmax.f32 %v1056_v19, %v3734_v55  ;;  %v3748_v63 = vadd.f32 %v902_v54, %v838_v56  ;;  %v634_v0 = vpop.f32.mrb[12].mxu1  ;;  %v5840_v19 = vunpack.c.h.bf16 %v3741_v58  ;;  %6047 = vst [vmem:[#allocation15_spill] sm:$0xff] %v3787_v47  ;;  %v5835_v54 = vunpack.c.l.bf16 %v3771_v31  ;;  %v929_v58 = vld [vmem:[%s5827_s2 + $0x130] sm:$0xff] }
 0x247   :  { %v1022_v2 = vmax.f32 %v1020_v23, %v3744_v60  ;;  %v775_v3 = vmax.f32 %v634_v0, 0.0  ;;  %v636_v4 = vpop.f32.mrb[13].mxu1  ;;  %v904_v23 = vld [vmem:[%s5827_s2 + $0x68] sm:$0xff] }
 0x248   :  { %v1059_v52 = vmax.f32 %v1057_v27, %v3748_v63  ;;  %v776_v12 = vmax.f32 %v636_v4, 0.0  ;;  %v638_v15 = vpop.f32.mrb[14].mxu1  ;;  %v5837_v4 = vunpack.c.h.bf16 %v3771_v31 }
 0x249   :  { %v839_v21 = vmul.f32 %v775_v3, %v5839_v61  ;;  %v777_v24 = vmax.f32 %v638_v15, 0.0  ;;  %v640_v25 = vpop.f32.mrb[15].mxu1 }
 0x24a   :  { %v840_v27 = vmul.f32 %v776_v12, %v5841_v1  ;;  %v778_v29 = vmax.f32 %v640_v25, 0.0  ;;  %v3863_v1 = vld [vmem:[%s5826_s1 + $0x60] sm:$0xff] }
 0x24b   :  { %v3773_v36 = vadd.f32 %v903_v10, %v839_v21  ;;  %v841_v38 = vmul.f32 %v777_v24, %v5838_v8  ;;  %v5834_v21 = vunpack.c.l.bf16 %v3787_v47  ;;  %6052 = vst [vmem:[#allocation20_spill] sm:$0xff] %v3863_v1 }
 0x24c   :  { %v3780_v44 = vadd.f32 %v904_v23, %v840_v27  ;;  %v842_v45 = vmul.f32 %v778_v29, %v5840_v19  ;;  %v913_v19 = vld [vmem:[%s5827_s2 + $0xb0] sm:$0xff] }
 0x24d   :  { %v1023_v48 = vmax.f32 %v1021_v59, %v3773_v36  ;;  %v3790_v53 = vadd.f32 %v905_v28, %v841_v38  ;;  %v907_v59 = vld [vmem:[%s5827_s2 + $0x80] sm:$0xff]  ;;  %v909_v38 = vld [vmem:[%s5827_s2 + $0x90] sm:$0xff] }
 0x24e   :  { %v1060_v56 = vmax.f32 %v1058_v62, %v3780_v44  ;;  %v3794_v0 = vadd.f32 %v906_v41, %v842_v45  ;;  %v644_v3 = vpop.f32.mrb[16].mxu1  ;;  %v5836_v62 = vunpack.c.h.bf16 %v3787_v47  ;;  %v3817_v45 = vld [vmem:[%s5826_s1 + $0x50] sm:$0xff] }
 0x24f   :  { %v1024_v10 = vmax.f32 %v1022_v2, %v3790_v53  ;;  %v779_v12 = vmax.f32 %v644_v3, 0.0  ;;  %v646_v15 = vpop.f32.mrb[17].mxu1  ;;  %v908_v2 = vld [vmem:[%s5827_s2 + $0x88] sm:$0xff]  ;;  %6048 = vst [vmem:[#allocation16_spill] sm:$0xff] %v3817_v45 }
 0x250   :  { %v1061_v23 = vmax.f32 %v1059_v52, %v3794_v0  ;;  %v780_v24 = vmax.f32 %v646_v15, 0.0  ;;  %v648_v25 = vpop.f32.mrb[18].mxu1  ;;  %v910_v15 = vld [vmem:[%s5827_s2 + $0x98] sm:$0xff] }
 0x251   :  { %v843_v27 = vmul.f32 %v779_v12, %v5835_v54  ;;  %v781_v28 = vmax.f32 %v648_v25, 0.0  ;;  %v650_v29 = vpop.f32.mrb[19].mxu1 }
 0x252   :  { %v844_v52 = vmul.f32 %v780_v24, %v5837_v4  ;;  %v782_v41 = vmax.f32 %v650_v29, 0.0  ;;  %v3833_v29 = vld [vmem:[%s5826_s1 + $0x58] sm:$0xff] }
 0x253   :  { %v3819_v3 = vadd.f32 %v907_v59, %v843_v27  ;;  %v845_v12 = vmul.f32 %v781_v28, %v5834_v21  ;;  %6050 = vst [vmem:[#allocation18_spill] sm:$0xff] %v3833_v29  ;;  %v5842_v28 = vunpack.c.l.bf16 %v3817_v45  ;;  %v5844_v8 = vunpack.c.l.bf16 %v3833_v29 }
 0x254   :  { %v3826_v24 = vadd.f32 %v908_v2, %v844_v52  ;;  %v846_v25 = vmul.f32 %v782_v41, %v5836_v62  ;;  %v5843_v52 = vunpack.c.h.bf16 %v3817_v45 }
 0x255   :  { %v1025_v59 = vmax.f32 %v1023_v48, %v3819_v3  ;;  %v3836_v27 = vadd.f32 %v909_v38, %v845_v12  ;;  %v911_v48 = vld [vmem:[%s5827_s2 + $0xa0] sm:$0xff] }
 0x256   :  { %6049 = vst [vmem:[#allocation17_spill] sm:$0xff] %v3826_v24  ;;  %v1062_v21 = vmax.f32 %v1060_v56, %v3826_v24  ;;  %v3840_v54 = vadd.f32 %v910_v15, %v846_v25  ;;  %v654_v2 = vpop.f32.mrb[20].mxu1  ;;  %v5846_v56 = vunpack.c.h.bf16 %v3833_v29 }
 0x257   :  { %v1026_v41 = vmax.f32 %v1024_v10, %v3836_v27  ;;  %v783_v62 = vmax.f32 %v654_v2, 0.0  ;;  %v656_v4 = vpop.f32.mrb[21].mxu1  ;;  %v912_v10 = vld [vmem:[%s5827_s2 + $0xa8] sm:$0xff] }
 0x258   :  { %6051 = vst [vmem:[#allocation19_spill] sm:$0xff] %v3840_v54  ;;  %v1063_v61 = vmax.f32 %v1061_v23, %v3840_v54  ;;  %v784_v38 = vmax.f32 %v656_v4, 0.0  ;;  %v658_v12 = vpop.f32.mrb[22].mxu1 }
 0x259   :  { %v847_v15 = vmul.f32 %v783_v62, %v5842_v28  ;;  %v785_v25 = vmax.f32 %v658_v12, 0.0  ;;  %v660_v2 = vpop.f32.mrb[23].mxu1  ;;  %v914_v12 = vld [vmem:[%s5827_s2 + $0xb8] sm:$0xff] }
 0x25a   :  { %v848_v23 = vmul.f32 %v784_v38, %v5843_v52  ;;  %v786_v4 = vmax.f32 %v660_v2, 0.0  ;;  %v3879_v2 = vld [vmem:[%s5826_s1 + $0x68] sm:$0xff] }
 0x25b   :  { %v3865_v62 = vadd.f32 %v911_v48, %v847_v15  ;;  %v849_v28 = vmul.f32 %v785_v25, %v5844_v8  ;;  %6054 = vst [vmem:[#allocation22_spill] sm:$0xff] %v3879_v2  ;;  %v5852_v25 = vunpack.c.l.bf16 %v3863_v1  ;;  %v5854_v32 = vunpack.c.l.bf16 %v3879_v2 }
 0x25c   :  { %v3872_v38 = vadd.f32 %v912_v10, %v848_v23  ;;  %v850_v52 = vmul.f32 %v786_v4, %v5846_v56  ;;  %v5853_v23 = vunpack.c.h.bf16 %v3863_v1 }
 0x25d   :  { %v1027_v48 = vmax.f32 %v1025_v59, %v3865_v62  ;;  %v3882_v15 = vadd.f32 %v913_v19, %v849_v28  ;;  %v915_v19 = vld [vmem:[%s5827_s2 + $0xc0] sm:$0xff] }
 0x25e   :  { %6053 = vst [vmem:[#allocation21_spill] sm:$0xff] %v3872_v38  ;;  %v1064_v8 = vmax.f32 %v1062_v21, %v3872_v38  ;;  %v3886_v26 = vadd.f32 %v914_v12, %v850_v52  ;;  %v664_v10 = vpop.f32.mrb[24].mxu1  ;;  %v5856_v21 = vunpack.c.h.bf16 %v3879_v2  ;;  %v925_v2 = vld [vmem:[%s5827_s2 + $0x110] sm:$0xff] }
 0x25f   :  { %v1028_v4 = vmax.f32 %v1026_v41, %v3882_v15  ;;  %v787_v56 = vmax.f32 %v664_v10, 0.0  ;;  %v666_v17 = vpop.f32.mrb[25].mxu1  ;;  %v916_v41 = vld [vmem:[%s5827_s2 + $0xc8] sm:$0xff] }
 0x260   :  { %6055 = vst [vmem:[#allocation23_spill] sm:$0xff] %v3886_v26  ;;  %v1065_v22 = vmax.f32 %v1063_v61, %v3886_v26  ;;  %v788_v59 = vmax.f32 %v666_v17, 0.0  ;;  %v668_v28 = vpop.f32.mrb[26].mxu1 }
 0x261   :  { %v851_v52 = vmul.f32 %v787_v56, %v5852_v25  ;;  %v789_v12 = vmax.f32 %v668_v28, 0.0  ;;  %v670_v10 = vpop.f32.mrb[27].mxu1  ;;  %v918_v28 = vld [vmem:[%s5827_s2 + $0xd8] sm:$0xff] }
 0x262   :  { %v852_v61 = vmul.f32 %v788_v59, %v5853_v23  ;;  %v790_v17 = vmax.f32 %v670_v10, 0.0  ;;  %v3925_v10 = vld [vmem:[%s5826_s1 + $0x78] sm:$0xff] }
 0x263   :  { %v3911_v56 = vadd.f32 %v915_v19, %v851_v52  ;;  %v853_v25 = vmul.f32 %v789_v12, %v5854_v32  ;;  %6058 = vst [vmem:[#allocation26_spill] sm:$0xff] %v3925_v10  ;;  %v5862_v12 = vunpack.c.l.bf16 %v3909_v42  ;;  %v5864_v43 = vunpack.c.l.bf16 %v3925_v10 }
 0x264   :  { %v3918_v59 = vadd.f32 %v916_v41, %v852_v61  ;;  %v854_v23 = vmul.f32 %v790_v17, %v5856_v21  ;;  %v5863_v61 = vunpack.c.h.bf16 %v3909_v42 }
 0x265   :  { %v1029_v19 = vmax.f32 %v1027_v48, %v3911_v56  ;;  %v3928_v52 = vadd.f32 %v917_v50, %v853_v25  ;;  %v919_v50 = vld [vmem:[%s5827_s2 + $0xe0] sm:$0xff] }
 0x266   :  { %6057 = vst [vmem:[#allocation25_spill] sm:$0xff] %v3918_v59  ;;  %v1066_v32 = vmax.f32 %v1064_v8, %v3918_v59  ;;  %v3932_v57 = vadd.f32 %v918_v28, %v854_v23  ;;  %v674_v41 = vpop.f32.mrb[28].mxu1  ;;  %v5867_v8 = vunpack.c.h.bf16 %v3925_v10 }
 0x267   :  { %v1030_v17 = vmax.f32 %v1028_v4, %v3928_v52  ;;  %v791_v21 = vmax.f32 %v674_v41, 0.0  ;;  %v676_v46 = vpop.f32.mrb[29].mxu1  ;;  %v920_v4 = vld [vmem:[%s5827_s2 + $0xe8] sm:$0xff] }
 0x268   :  { %6059 = vst [vmem:[#allocation27_spill] sm:$0xff] %v3932_v57  ;;  %v1067_v37 = vmax.f32 %v1065_v22, %v3932_v57  ;;  %v792_v48 = vmax.f32 %v676_v46, 0.0  ;;  %v678_v25 = vpop.f32.mrb[30].mxu1 }
 0x269   :  { %v855_v23 = vmul.f32 %v791_v21, %v5862_v12  ;;  %v793_v28 = vmax.f32 %v678_v25, 0.0  ;;  %v680_v41 = vpop.f32.mrb[31].mxu1  ;;  %v922_v25 = vld [vmem:[%s5827_s2 + $0xf8] sm:$0xff] }
 0x26a   :  { %v856_v22 = vmul.f32 %v792_v48, %v5863_v61  ;;  %v794_v46 = vmax.f32 %v680_v41, 0.0  ;;  %v3971_v41 = vld [vmem:[%s5826_s1 + $0x88] sm:$0xff] }
 0x26b   :  { %v3957_v21 = vadd.f32 %v919_v50, %v855_v23  ;;  %v857_v12 = vmul.f32 %v793_v28, %v5864_v43  ;;  %6062 = vst [vmem:[#allocation30_spill] sm:$0xff] %v3971_v41  ;;  %v5874_v28 = vunpack.c.l.bf16 %v3955_v35 }
 0x26c   :  { %v3964_v48 = vadd.f32 %v920_v4, %v856_v22  ;;  %v858_v61 = vmul.f32 %v794_v46, %v5867_v8  ;;  %v5877_v22 = vunpack.c.h.bf16 %v3955_v35 }
 0x26d   :  { %v1031_v50 = vmax.f32 %v1029_v19, %v3957_v21  ;;  %v3974_v23 = vadd.f32 %v921_v40, %v857_v12  ;;  %v923_v40 = vld [vmem:[%s5827_s2 + $0x100] sm:$0xff] }
 0x26e   :  { %6061 = vst [vmem:[#allocation29_spill] sm:$0xff] %v3964_v48  ;;  %v1068_v43 = vmax.f32 %v1066_v32, %v3964_v48  ;;  %v3978_v42 = vadd.f32 %v922_v25, %v858_v61  ;;  %v684_v4 = vpop.f32.mrb[32].mxu1  ;;  %v4001_v32 = vld [vmem:[%s5826_s1 + $0x90] sm:$0xff] }
 0x26f   :  { %v1032_v46 = vmax.f32 %v1030_v17, %v3974_v23  ;;  %v795_v8 = vmax.f32 %v684_v4, 0.0  ;;  %v686_v10 = vpop.f32.mrb[33].mxu1  ;;  %v924_v17 = vld [vmem:[%s5827_s2 + $0x108] sm:$0xff]  ;;  %6064 = vst [vmem:[#allocation32_spill] sm:$0xff] %v4001_v32 }
 0x270   :  { %6063 = vst [vmem:[#allocation31_spill] sm:$0xff] %v3978_v42  ;;  %v1069_v1 = vmax.f32 %v1067_v37, %v3978_v42  ;;  %v796_v19 = vmax.f32 %v686_v10, 0.0  ;;  %v688_v12 = vpop.f32.mrb[34].mxu1 }
 0x271   :  { %v859_v61 = vmul.f32 %v795_v8, %v5874_v28  ;;  %v797_v25 = vmax.f32 %v688_v12, 0.0  ;;  %v690_v4 = vpop.f32.mrb[35].mxu1  ;;  %v6065_v28 = vunpack.c.l.bf16 %v3971_v41  ;;  %v926_v12 = vld [vmem:[%s5827_s2 + $0x118] sm:$0xff] }
 0x272   :  { %v860_v37 = vmul.f32 %v796_v19, %v5877_v22  ;;  %v798_v10 = vmax.f32 %v690_v4, 0.0  ;;  %v6067_v22 = vunpack.c.h.bf16 %v3971_v41  ;;  %v4017_v4 = vld [vmem:[%s5826_s1 + $0x98] sm:$0xff] }
 0x273   :  { %v4003_v8 = vadd.f32 %v923_v40, %v859_v61  ;;  %v861_v29 = vmul.f32 %v797_v25, %v6065_v28  ;;  %6068 = vst [vmem:[#allocation34_spill] sm:$0xff] %v4017_v4  ;;  %v5888_v28 = vunpack.c.l.bf16 %v4001_v32 }
 0x274   :  { %v4010_v19 = vadd.f32 %v924_v17, %v860_v37  ;;  %v862_v45 = vmul.f32 %v798_v10, %v6067_v22  ;;  %v5891_v37 = vunpack.c.h.bf16 %v4001_v32 }
 0x275   :  { %v1033_v40 = vmax.f32 %v1031_v50, %v4003_v8  ;;  %v4020_v61 = vadd.f32 %v925_v2, %v861_v29  ;;  %v927_v29 = vld [vmem:[%s5827_s2 + $0x120] sm:$0xff] }
 0x276   :  { %6066 = vst [vmem:[#allocation33_spill] sm:$0xff] %v4010_v19  ;;  %v1070_v25 = vmax.f32 %v1068_v43, %v4010_v19  ;;  %v4024_v47 = vadd.f32 %v926_v12, %v862_v45  ;;  %v694_v17 = vpop.f32.mrb[36].mxu1  ;;  %v4049_v45 = vld [vmem:[%s5826_s1 + $0xa0] sm:$0xff] }
 0x277   :  { %v1034_v22 = vmax.f32 %v1032_v46, %v4020_v61  ;;  %v799_v10 = vmax.f32 %v694_v17, 0.0  ;;  %v696_v31 = vpop.f32.mrb[37].mxu1  ;;  %v928_v46 = vld [vmem:[%s5827_s2 + $0x128] sm:$0xff]  ;;  %6070 = vst [vmem:[#allocation36_spill] sm:$0xff] %v4049_v45 }
 0x278   :  { %6069 = vst [vmem:[#allocation35_spill] sm:$0xff] %v4024_v47  ;;  %v4030_v49 = vmax.f32 %v1069_v1, %v4024_v47  ;;  %v800_v2 = vmax.f32 %v696_v31, 0.0  ;;  %v698_v43 = vpop.f32.mrb[38].mxu1 }
 0x279   :  { %v863_v50 = vmul.f32 %v799_v10, %v5888_v28  ;;  %v801_v12 = vmax.f32 %v698_v43, 0.0  ;;  %v700_v17 = vpop.f32.mrb[39].mxu1  ;;  %v6071_v28 = vunpack.c.l.bf16 %v4017_v4  ;;  %v930_v43 = vld [vmem:[%s5827_s2 + $0x138] sm:$0xff] }
 0x27a   :  { %v864_v1 = vmul.f32 %v800_v2, %v5891_v37  ;;  %v802_v31 = vmax.f32 %v700_v17, 0.0  ;;  %v6073_v37 = vunpack.c.h.bf16 %v4017_v4  ;;  %v4065_v17 = vld [vmem:[%s5826_s1 + $0xa8] sm:$0xff] }
 0x27b   :  { %v4051_v10 = vadd.f32 %v927_v29, %v863_v50  ;;  %v865_v13 = vmul.f32 %v801_v12, %v6071_v28  ;;  %6074 = vst [vmem:[#allocation38_spill] sm:$0xff] %v4065_v17  ;;  %v5902_v28 = vunpack.c.l.bf16 %v4049_v45 }
 0x27c   :  { %v4058_v2 = vadd.f32 %v928_v46, %v864_v1  ;;  %v866_v5 = vmul.f32 %v802_v31, %v6073_v37  ;;  %v5905_v1 = vunpack.c.h.bf16 %v4049_v45 }
 0x27d   :  { %v1035_v29 = vmax.f32 %v1033_v40, %v4051_v10  ;;  %v4068_v50 = vadd.f32 %v929_v58, %v865_v13  ;;  %v931_v13 = vld [vmem:[%s5827_s2 + $0x140] sm:$0xff]  ;;  %v933_v40 = vld [vmem:[%s5827_s2 + $0x150] sm:$0xff] }
 0x27e   :  { %6072 = vst [vmem:[#allocation37_spill] sm:$0xff] %v4058_v2  ;;  %v1072_v12 = vmax.f32 %v1070_v25, %v4058_v2  ;;  %v4072_v39 = vadd.f32 %v930_v43, %v866_v5  ;;  %v704_v46 = vpop.f32.mrb[40].mxu1 }
 0x27f   :  { %v1036_v37 = vmax.f32 %v1034_v22, %v4068_v50  ;;  %v803_v31 = vmax.f32 %v704_v46, 0.0  ;;  %v706_v34 = vpop.f32.mrb[41].mxu1  ;;  %v932_v22 = vld [vmem:[%s5827_s2 + $0x148] sm:$0xff] }
 0x280   :  { %6075 = vst [vmem:[#allocation39_spill] sm:$0xff] %v4072_v39  ;;  %v804_v58 = vmax.f32 %v706_v34, 0.0  ;;  %v708_v25 = vpop.f32.mrb[42].mxu1  ;;  %v4095_v34 = vld [vmem:[%s5826_s1 + $0xb0] sm:$0xff] }
 0x281   :  { %v867_v5 = vmul.f32 %v803_v31, %v5902_v28  ;;  %v805_v43 = vmax.f32 %v708_v25, 0.0  ;;  %v710_v46 = vpop.f32.mrb[43].mxu1  ;;  %6076 = vst [vmem:[#allocation40_spill] sm:$0xff] %v4095_v34  ;;  %v6077_v31 = vunpack.c.l.bf16 %v4065_v17  ;;  %v5916_v45 = vunpack.c.l.bf16 %v4095_v34 }
 0x282   :  { %v868_v33 = vmul.f32 %v804_v58, %v5905_v1  ;;  %v4106_v58 = vld [vmem:[%s5826_s1 + $0xb8] sm:$0xff]  ;;  %v6083_v48 = vunpack.c.h.bf16 %v4095_v34 }
 0x283   :  { %v4097_v30 = vadd.f32 %v931_v13, %v867_v5  ;;  %v869_v28 = vmul.f32 %v805_v43, %v6077_v31  ;;  %6079 = vst [vmem:[#allocation42_spill] sm:$0xff] %v4106_v58  ;;  %v935_v31 = vld [vmem:[%s5827_s2 + $0x160] sm:$0xff]  ;;  %v4184_v34 = vld [vmem:[%s5826_s1 + $0xd8] sm:$0xff] }
 0x284   :  { %v4101_v4 = vadd.f32 %v932_v22, %v868_v33  ;;  %v5923_v22 = vunpack.c.l.bf16 %v4106_v58  ;;  %6088 = vst [vmem:[#allocation46_spill] sm:$0xff] %v4184_v34 }
 0x285   :  { %v1037_v25 = vmax.f32 %v1035_v29, %v4097_v30  ;;  %v4109_v1 = vadd.f32 %v933_v40, %v869_v28 }
 0x286   :  { %6078 = vst [vmem:[#allocation41_spill] sm:$0xff] %v4101_v4  ;;  %v4113_v32 = vmax.f32 %v1072_v12, %v4101_v4  ;;  %v714_v13 = vpop.f32.mrb[44].mxu1  ;;  %v937_v12 = vld [vmem:[%s5827_s2 + $0x170] sm:$0xff] }
 0x287   :  { %v1038_v5 = vmax.f32 %v1036_v37, %v4109_v1  ;;  %v807_v43 = vmax.f32 %v714_v13, 0.0  ;;  %v716_v33 = vpop.f32.mrb[45].mxu1  ;;  %v4128_v37 = vld [vmem:[%s5826_s1 + $0xc0] sm:$0xff] }
 0x288   :  { %v718_v41 = vpop.f32.mrb[46].mxu1  ;;  %6080 = vst [vmem:[#allocation43_spill] sm:$0xff] %v4128_v37  ;;  %v5934_v47 = vunpack.c.l.bf16 %v4128_v37 }
 0x289   :  { %v871_v29 = vmul.f32 %v807_v43, %v5916_v45  ;;  %v809_v28 = vmax.f32 %v718_v41, 0.0  ;;  %v720_v40 = vpop.f32.mrb[47].mxu1  ;;  %v4138_v41 = vld [vmem:[%s5826_s1 + $0xc8] sm:$0xff]  ;;  %v806_v43 = vmax.f32 %v710_v46, 0.0  ;;  %v6087_v46 = vunpack.c.h.bf16 %v4128_v37 }
 0x28a   :  { %6081 = vst [vmem:[#allocation44_spill] sm:$0xff] %v4138_v41  ;;  %v810_v57 = vmax.f32 %v720_v40, 0.0  ;;  %v934_v40 = vld [vmem:[%s5827_s2 + $0x158] sm:$0xff] }
 0x28b   :  { %v4130_v13 = vadd.f32 %v935_v31, %v871_v29  ;;  %v873_v35 = vmul.f32 %v809_v28, %v5923_v22  ;;  %v808_v29 = vmax.f32 %v716_v33, 0.0  ;;  %v6082_v33 = vunpack.c.h.bf16 %v4065_v17 }
 0x28d   :  { %v1039_v45 = vmax.f32 %v1037_v25, %v4130_v13  ;;  %v4141_v2 = vadd.f32 %v937_v12, %v873_v35  ;;  %v939_v35 = vld [vmem:[%s5827_s2 + $0x180] sm:$0xff]  ;;  %v870_v31 = vmul.f32 %v806_v43, %v6082_v33  ;;  %v872_v42 = vmul.f32 %v808_v29, %v6083_v48  ;;  %v936_v43 = vld [vmem:[%s5827_s2 + $0x168] sm:$0xff] }
 0x28e   :  { %v724_v19 = vpop.f32.mrb[48].mxu1  ;;  %v6085_v48 = vunpack.c.l.bf16 %v4138_v41  ;;  %v6086_v33 = vunpack.c.h.bf16 %v4106_v58 }
 0x28f   :  { %v1040_v28 = vmax.f32 %v1038_v5, %v4141_v2  ;;  %v811_v22 = vmax.f32 %v724_v19, 0.0  ;;  %v726_v4 = vpop.f32.mrb[49].mxu1  ;;  %v4186_v26 = vadd.f32 %v934_v40, %v870_v31  ;;  %v6091_v31 = vunpack.c.h.bf16 %v4138_v41 }
 0x290   :  { %v812_v25 = vmax.f32 %v726_v4, 0.0  ;;  %v728_v12 = vpop.f32.mrb[50].mxu1  ;;  %v941_v4 = vld [vmem:[%s5827_s2 + $0x190] sm:$0xff] }
 0x291   :  { %v875_v19 = vmul.f32 %v811_v22, %v5934_v47  ;;  %v813_v5 = vmax.f32 %v728_v12, 0.0  ;;  %v730_v59 = vpop.f32.mrb[51].mxu1  ;;  %v4168_v22 = vld [vmem:[%s5826_s1 + $0xd0] sm:$0xff]  ;;  %v874_v47 = vmul.f32 %v810_v57, %v6086_v33  ;;  %6089 = vst [vmem:[#allocation47_spill] sm:$0xff] %v4186_v26  ;;  %v940_v57 = vld [vmem:[%s5827_s2 + $0x188] sm:$0xff]  ;;  %v6094_v33 = vmax.f32 %v4030_v49, %v4072_v39 }
 0x292   :  { %v814_v17 = vmax.f32 %v730_v59, 0.0  ;;  %6084 = vst [vmem:[#allocation45_spill] sm:$0xff] %v4168_v22  ;;  %v876_v59 = vmul.f32 %v812_v25, %v6087_v46  ;;  %v4200_v25 = vadd.f32 %v936_v43, %v872_v42  ;;  %v6095_v41 = vunpack.c.l.bf16 %v4168_v22  ;;  %v945_v49 = vld [vmem:[%s5827_s2 + $0x1b0] sm:$0xff] }
 0x293   :  { %v4173_v12 = vadd.f32 %v939_v35, %v875_v19  ;;  %v877_v29 = vmul.f32 %v813_v5, %v6085_v48  ;;  %v938_v35 = vld [vmem:[%s5827_s2 + $0x178] sm:$0xff] }
 0x294   :  { %6090 = vst [vmem:[#allocation48_spill] sm:$0xff] %v4200_v25  ;;  %v878_v40 = vmul.f32 %v814_v17, %v6091_v31  ;;  %v4212_v46 = vadd.f32 %v938_v35, %v874_v47  ;;  %v4214_v42 = vadd.f32 %v940_v57, %v876_v59  ;;  %v943_v17 = vld [vmem:[%s5827_s2 + $0x1a0] sm:$0xff]  ;;  %v944_v47 = vld [vmem:[%s5827_s2 + $0x1a8] sm:$0xff]  ;;  %v1076_v57 = vmax.f32 %v4113_v32, %v4200_v25 }
 0x295   :  { %v4192_v19 = vmax.f32 %v1039_v45, %v4173_v12  ;;  %v4197_v5 = vadd.f32 %v941_v4, %v877_v29  ;;  %v942_v45 = vld [vmem:[%s5827_s2 + $0x198] sm:$0xff] }
 0x296   :  { %v734_v48 = vpop.f32.mrb[52].mxu1  ;;  %6092 = vst [vmem:[#allocation49_spill] sm:$0xff] %v4212_v46  ;;  %6093 = vst [vmem:[#allocation50_spill] sm:$0xff] %v4214_v42 }
 0x297   :  { %v4206_v37 = vmax.f32 %v1040_v28, %v4197_v5  ;;  %v815_v58 = vmax.f32 %v734_v48, 0.0  ;;  %v736_v4 = vpop.f32.mrb[53].mxu1  ;;  %v1075_v48 = vmax.f32 %v6094_v33, %v4186_v26  ;;  %v6097_v28 = vunpack.c.h.bf16 %v4168_v22  ;;  %v953_v26 = vld [vmem:[%s5827_s2 + $0x1f0] sm:$0xff] }
 0x298   :  { %v816_v43 = vmax.f32 %v736_v4, 0.0  ;;  %v738_v31 = vpop.f32.mrb[54].mxu1  ;;  %v4231_v4 = vadd.f32 %v942_v45, %v878_v40  ;;  %v946_v40 = vld [vmem:[%s5827_s2 + $0x1b8] sm:$0xff] }
 0x299   :  { %v879_v29 = vmul.f32 %v815_v58, %v6095_v41  ;;  %v817_v59 = vmax.f32 %v738_v31, 0.0  ;;  %v740_v35 = vpop.f32.mrb[55].mxu1  ;;  %v4241_v58 = vld [vmem:[%s5826_s1 + $0xe0] sm:$0xff]  ;;  %v6099_v31 = vunpack.c.l.bf16 %v4184_v34  ;;  %v1077_v45 = vmax.f32 %v1075_v48, %v4212_v46 }
 0x29a   :  { %6096 = vst [vmem:[#allocation51_spill] sm:$0xff] %v4231_v4  ;;  %v880_v38 = vmul.f32 %v816_v43, %v6097_v28  ;;  %v818_v33 = vmax.f32 %v740_v35, 0.0  ;;  %6098 = vst [vmem:[#allocation52_spill] sm:$0xff] %v4241_v58  ;;  %v1078_v43 = vmax.f32 %v1076_v57, %v4214_v42  ;;  %v6101_v35 = vunpack.c.h.bf16 %v4184_v34 }
 0x29b   :  { %v4243_v41 = vadd.f32 %v943_v17, %v879_v29  ;;  %v881_v32 = vmul.f32 %v817_v59, %v6099_v31  ;;  %v4259_v29 = vld [vmem:[%s5826_s1 + $0xe8] sm:$0xff]  ;;  %v5953_v31 = vunpack.c.l.bf16 %v4241_v58  ;;  %v1079_v48 = vmax.f32 %v1077_v45, %v4231_v4  ;;  %v949_v4 = vld [vmem:[%s5827_s2 + $0x1d0] sm:$0xff] }
 0x29c   :  { %v4252_v28 = vadd.f32 %v944_v47, %v880_v38  ;;  %v882_v22 = vmul.f32 %v818_v33, %v6101_v35  ;;  %6102 = vst [vmem:[#allocation54_spill] sm:$0xff] %v4259_v29 }
 0x29d   :  { %v1043_v17 = vmax.f32 %v4192_v19, %v4243_v41  ;;  %v4263_v59 = vadd.f32 %v945_v49, %v881_v32  ;;  %v947_v32 = vld [vmem:[%s5827_s2 + $0x1c0] sm:$0xff]  ;;  %v6104_v19 = vunpack.c.h.bf16 %v4241_v58 }
 0x29e   :  { %6100 = vst [vmem:[#allocation53_spill] sm:$0xff] %v4252_v28  ;;  %v1080_v38 = vmax.f32 %v1078_v43, %v4252_v28  ;;  %v4268_v47 = vadd.f32 %v946_v40, %v882_v22  ;;  %v744_v57 = vpop.f32.mrb[56].mxu1  ;;  %v4292_v22 = vld [vmem:[%s5826_s1 + $0xf0] sm:$0xff] }
 0x29f   :  { %v1044_v35 = vmax.f32 %v4206_v37, %v4263_v59  ;;  %v819_v34 = vmax.f32 %v744_v57, 0.0  ;;  %v746_v42 = vpop.f32.mrb[57].mxu1  ;;  %v948_v37 = vld [vmem:[%s5827_s2 + $0x1c8] sm:$0xff]  ;;  %6105 = vst [vmem:[#allocation56_spill] sm:$0xff] %v4292_v22 }
 0x2a0   :  { %6103 = vst [vmem:[#allocation55_spill] sm:$0xff] %v4268_v47  ;;  %v1081_v49 = vmax.f32 %v1079_v48, %v4268_v47  ;;  %v820_v45 = vmax.f32 %v746_v42, 0.0  ;;  %v748_v43 = vpop.f32.mrb[58].mxu1 }
 0x2a1   :  { %v883_v40 = vmul.f32 %v819_v34, %v5953_v31  ;;  %v821_v57 = vmax.f32 %v748_v43, 0.0  ;;  %v750_v33 = vpop.f32.mrb[59].mxu1  ;;  %v6106_v31 = vunpack.c.l.bf16 %v4259_v29  ;;  %v950_v43 = vld [vmem:[%s5827_s2 + $0x1d8] sm:$0xff] }
 0x2a2   :  { %v884_v48 = vmul.f32 %v820_v45, %v6104_v19  ;;  %v822_v42 = vmax.f32 %v750_v33, 0.0  ;;  %v6108_v45 = vunpack.c.h.bf16 %v4259_v29  ;;  %v4308_v33 = vld [vmem:[%s5826_s1 + $0xf8] sm:$0xff] }
 0x2a3   :  { %v4294_v34 = vadd.f32 %v947_v32, %v883_v40  ;;  %v885_v46 = vmul.f32 %v821_v57, %v6106_v31  ;;  %6109 = vst [vmem:[#allocation58_spill] sm:$0xff] %v4308_v33  ;;  %v5967_v31 = vunpack.c.l.bf16 %v4292_v22 }
 0x2a4   :  { %v4301_v19 = vadd.f32 %v948_v37, %v884_v48  ;;  %v886_v58 = vmul.f32 %v822_v42, %v6108_v45  ;;  %v5970_v48 = vunpack.c.h.bf16 %v4292_v22 }
 0x2a5   :  { %v1045_v32 = vmax.f32 %v1043_v17, %v4294_v34  ;;  %v4311_v40 = vadd.f32 %v949_v4, %v885_v46  ;;  %v951_v46 = vld [vmem:[%s5827_s2 + $0x1e0] sm:$0xff] }
 0x2a6   :  { %6107 = vst [vmem:[#allocation57_spill] sm:$0xff] %v4301_v19  ;;  %v1082_v57 = vmax.f32 %v1080_v38, %v4301_v19  ;;  %v4315_v25 = vadd.f32 %v950_v43, %v886_v58  ;;  %v754_v37 = vpop.f32.mrb[60].mxu1  ;;  %v6111_v58 = vunpack.c.l.bf16 %v4308_v33 }
 0x2a7   :  { %v1046_v42 = vmax.f32 %v1044_v35, %v4311_v40  ;;  %v823_v45 = vmax.f32 %v754_v37, 0.0  ;;  %v756_v29 = vpop.f32.mrb[61].mxu1  ;;  %v952_v35 = vld [vmem:[%s5827_s2 + $0x1e8] sm:$0xff] }
 0x2a8   :  { %6110 = vst [vmem:[#allocation59_spill] sm:$0xff] %v4315_v25  ;;  %v1083_v47 = vmax.f32 %v1081_v49, %v4315_v25  ;;  %v824_v4 = vmax.f32 %v756_v29, 0.0  ;;  %v758_v17 = vpop.f32.mrb[62].mxu1 }
 0x2a9   :  { %v887_v38 = vmul.f32 %v823_v45, %v5967_v31  ;;  %v825_v43 = vmax.f32 %v758_v17, 0.0  ;;  %v760_v37 = vpop.f32.mrb[63].mxu1  ;;  %v954_v45 = vld [vmem:[%s5827_s2 + $0x1f8] sm:$0xff]  ;;  %v6112_v17 = vunpack.c.h.bf16 %v4308_v33 }
 0x2aa   :  { %v888_v49 = vmul.f32 %v824_v4, %v5970_v48  ;;  %v826_v29 = vmax.f32 %v760_v37, 0.0 }
 0x2ab   :  { %v4335_v25 = vadd.f32 %v951_v46, %v887_v38  ;;  %v889_v19 = vmul.f32 %v825_v43, %v6111_v58 }
 0x2ac   :  { %v4342_v31 = vadd.f32 %v952_v35, %v888_v49  ;;  %v890_v22 = vmul.f32 %v826_v29, %v6112_v17 }
 0x2ad   :  { %v1047_v4 = vmax.f32 %v1045_v32, %v4335_v25  ;;  %v4347_v48 = vadd.f32 %v953_v26, %v889_v19 }
 0x2ae   :  { %v1084_v37 = vmax.f32 %v1082_v57, %v4342_v31  ;;  %v4350_v46 = vadd.f32 %v954_v45, %v890_v22  ;;  %v6123_v45 = vld [vmem:[#allocation35_spill] sm:$0xff] }
 0x2af   :  { %v1048_v38 = vmax.f32 %v1046_v42, %v4347_v48 }
 0x2b0   :  { %v1085_v58 = vmax.f32 %v1083_v47, %v4350_v46 }
 0x2b1   :  { %v1049_v43 = vmax.f32 %v1047_v4, %v1048_v38 }
 0x2b2   :  { %v1086_v28 = vmax.f32 %v1084_v37, %v1085_v58 }
 0x2b3   :  { %v1050_v39 = vrot.slane %v1049_v43, 4 }
 0x2b4   :  { %v1087_v35 = vrot.slane %v1086_v28, 4 }
 0x2b5   :  { %v1051_v49 = vmax.f32 %v1049_v43, %v1050_v39 }
 0x2b6   :  { %v1088_v54 = vmax.f32 %v1086_v28, %v1087_v35 }
 0x2b7   :  { %v1052_v33 = vrot.slane %v1051_v49, 2 }
 0x2b8   :  { %v1089_v29 = vrot.slane %v1088_v54, 2 }
 0x2b9   :  { %v1053_v17 = vmax.f32 %v1051_v49, %v1052_v33  ;;  %v6121_v49 = vld [vmem:[#allocation31_spill] sm:$0xff] }
 0x2ba   :  { %v1090_v32 = vmax.f32 %v1088_v54, %v1089_v29 }
 0x2bb   :  { %v1054_v26 = vrot.slane %v1053_v17, 1 }
 0x2bc   :  { %v1091_v19 = vrot.slane %v1090_v32, 1 }
 0x2bd   :  { %v4354_v24 = vmax.f32 %v1053_v17, %v1054_v26 }
 0x2be   :  { %v4356_v22 = vmax.f32 %v1090_v32, %v1091_v19  ;;  %v6126_v32 = vld [vmem:[#allocation39_spill] sm:$0xff] }
 0x2bf   :  { %v1093_v57 = vsub.f32 %v3666_v7, %v4354_v24  ;;  %v1095_v47 = vsub.f32 %v3689_v14, %v4354_v24  ;;  %v1097_v39 = vsub.f32 %v3671_v9, %v4354_v24  ;;  %v1099_v28 = vsub.f32 %v3693_v16, %v4354_v24 }
 0x2c0   :  { %v1101_v54 = vsub.f32 %v3727_v51, %v4354_v24  ;;  %v1103_v33 = vsub.f32 %v3744_v60, %v4354_v24  ;;  %v1105_v42 = vsub.f32 %v3773_v36, %v4354_v24  ;;  %v1107_v7 = vsub.f32 %v3790_v53, %v4354_v24  ;;  %v6130_v53 = vld [vmem:[#allocation55_spill] sm:$0xff] }
 0x2c1   :  { %v1109_v14 = vsub.f32 %v3819_v3, %v4354_v24  ;;  %v1111_v9 = vsub.f32 %v3836_v27, %v4354_v24  ;;  %v1113_v16 = vsub.f32 %v3865_v62, %v4354_v24  ;;  %v1115_v51 = vsub.f32 %v3882_v15, %v4354_v24  ;;  %v6124_v27 = vld [vmem:[#allocation37_spill] sm:$0xff]  ;;  %v6132_v15 = vld [vmem:[#allocation59_spill] sm:$0xff] }
 0x2c2   :  { %v1117_v60 = vsub.f32 %v3911_v56, %v4354_v24  ;;  %v1157_v43 = vmul.f32 1.442695, %v1093_v57  ;;  %v1161_v29 = vmul.f32 1.442695, %v1095_v47  ;;  %v1165_v58 = vmul.f32 1.442695, %v1097_v39 }
 0x2c3   :  { %v1169_v26 = vmul.f32 1.442695, %v1099_v28  ;;  %v1173_v19 = vmul.f32 1.442695, %v1101_v54  ;;  %v1177_v38 = vmul.f32 1.442695, %v1103_v33  ;;  %v6136_v47 = vsub.f32 %v3957_v21, %v4354_v24 }
 0x2c4   :  { %2948 = vpow2.f32 %v1157_v43  ;;  %v1181_v35 = vmul.f32 1.442695, %v1105_v42  ;;  %v1185_v37 = vmul.f32 1.442695, %v1107_v7  ;;  %v1189_v54 = vmul.f32 1.442695, %v1109_v14 }
 0x2c5   :  { %2950 = vpow2.f32 %v1161_v29  ;;  %v6113_v7 = vld [vmem:[#allocation17_spill] sm:$0xff]  ;;  %v6114_v29 = vld [vmem:[#allocation19_spill] sm:$0xff]  ;;  %v1193_v39 = vmul.f32 1.442695, %v1111_v9  ;;  %v1201_v57 = vmul.f32 1.442695, %v1115_v51  ;;  %v6141_v21 = vsub.f32 %v4020_v61, %v4354_v24 }
 0x2c6   :  { %2952 = vpow2.f32 %v1165_v58  ;;  %v6116_v14 = vld [vmem:[#allocation23_spill] sm:$0xff]  ;;  %v6117_v42 = vld [vmem:[#allocation25_spill] sm:$0xff]  ;;  %v1205_v62 = vmul.f32 1.442695, %v1117_v60  ;;  %v1213_v51 = vmul.f32 1.442695, %v6136_v47 }
 0x2c7   :  { %2954 = vpow2.f32 %v1169_v26  ;;  %v6120_v26 = vld [vmem:[#allocation29_spill] sm:$0xff]  ;;  %v1225_v47 = vmul.f32 1.442695, %v6141_v21 }
 0x2c8   :  { %2956 = vpow2.f32 %v1173_v19  ;;  %v6115_v19 = vld [vmem:[#allocation21_spill] sm:$0xff] }
 0x2c9   :  { %2958 = vpow2.f32 %v1177_v38  ;;  %v6118_v38 = vld [vmem:[#allocation27_spill] sm:$0xff]  ;;  %v6122_v9 = vld [vmem:[#allocation33_spill] sm:$0xff] }
 0x2ca   :  { %2960 = vpow2.f32 %v1181_v35  ;;  %v6127_v28 = vld [vmem:[#allocation41_spill] sm:$0xff] }
 0x2cb   :  { %2962 = vpow2.f32 %v1185_v37  ;;  %v1197_v37 = vmul.f32 1.442695, %v1113_v16 }
 0x2cc   :  { %2964 = vpow2.f32 %v1189_v54  ;;  %v6129_v54 = vld [vmem:[#allocation53_spill] sm:$0xff] }
 0x2cd   :  { %2966 = vpow2.f32 %v1193_v39 }
 0x2ce   :  { %v4434_v58 = vpop.eup %2948  ;;  %2968 = vpow2.f32 %v1197_v37 }
 0x2cf   :  { %v4442_v43 = vpop.eup %2950  ;;  %2970 = vpow2.f32 %v1201_v57  ;;  %v6138_v57 = vsub.f32 %v3974_v23, %v4354_v24 }
 0x2d0   :  { %v1285_v33 = vadd.f32 %v4442_v43, %v4434_v58  ;;  %v4456_v35 = vpop.eup %2952  ;;  %2972 = vpow2.f32 %v1205_v62 }
 0x2d1   :  { %6119 = vst [vmem:[#allocation17_spill] sm:$0xff] %v4456_v35  ;;  %v4469_v3 = vpop.eup %2954 }
 0x2d2   :  { %v1286_v17 = vadd.f32 %v4456_v35, %v1285_v33  ;;  %6125 = vst [vmem:[#allocation19_spill] sm:$0xff] %v4469_v3  ;;  %v4479_v36 = vpop.eup %2956 }
 0x2d3   :  { %6128 = vst [vmem:[#allocation21_spill] sm:$0xff] %v4479_v36  ;;  %v4494_v39 = vpop.eup %2958 }
 0x2d4   :  { %v1287_v33 = vadd.f32 %v4469_v3, %v1286_v17  ;;  %v6131_v17 = vld [vmem:[#allocation57_spill] sm:$0xff]  ;;  %v6134_v3 = vsub.f32 %v3928_v52, %v4354_v24  ;;  %v6139_v52 = vsub.f32 %v4003_v8, %v4354_v24  ;;  %v6144_v8 = vsub.f32 %v3696_v18, %v4356_v22 }
 0x2d6   :  { %v1288_v16 = vadd.f32 %v4479_v36, %v1287_v33  ;;  %v4503_v33 = vpop.eup %2960  ;;  %v1209_v4 = vmul.f32 1.442695, %v6134_v3  ;;  %v1221_v3 = vmul.f32 1.442695, %v6139_v52 }
 0x2d7   :  { %6133 = vst [vmem:[#allocation23_spill] sm:$0xff] %v4503_v33  ;;  %v4509_v36 = vpop.eup %2962 }
 0x2d8   :  { %v1289_v60 = vadd.f32 %v4494_v39, %v1288_v16  ;;  %6135 = vst [vmem:[#allocation25_spill] sm:$0xff] %v4509_v36  ;;  %v4515_v35 = vpop.eup %2964  ;;  %2974 = vpow2.f32 %v1209_v4  ;;  %v1217_v16 = vmul.f32 1.442695, %v6138_v57  ;;  %v6142_v4 = vsub.f32 %v3678_v6, %v4356_v22 }
 0x2d9   :  { %6137 = vst [vmem:[#allocation27_spill] sm:$0xff] %v4515_v35  ;;  %v4524_v62 = vpop.eup %2966  ;;  %2976 = vpow2.f32 %v1213_v51  ;;  %v6145_v51 = vsub.f32 %v4051_v10, %v4354_v24  ;;  %v6147_v6 = vsub.f32 %v3680_v11, %v4356_v22  ;;  %v6150_v10 = vsub.f32 %v3700_v20, %v4356_v22 }
 0x2da   :  { %v1290_v37 = vadd.f32 %v4503_v33, %v1289_v60  ;;  %6140 = vst [vmem:[#allocation29_spill] sm:$0xff] %v4524_v62  ;;  %v1159_v23 = vmul.f32 1.442695, %v6142_v4  ;;  %v4533_v57 = vpop.eup %2968  ;;  %2978 = vpow2.f32 %v1217_v16  ;;  %v6148_v16 = vsub.f32 %v4068_v50, %v4354_v24 }
 0x2db   :  { %6143 = vst [vmem:[#allocation31_spill] sm:$0xff] %v4533_v57  ;;  %2980 = vpow2.f32 %v1221_v3  ;;  %v1229_v52 = vmul.f32 1.442695, %v6145_v51  ;;  %v4542_v21 = vpop.eup %2970  ;;  %v6153_v50 = vsub.f32 %v3734_v55, %v4356_v22 }
 0x2dc   :  { %v1291_v56 = vadd.f32 %v4509_v36, %v1290_v37  ;;  %6146 = vst [vmem:[#allocation33_spill] sm:$0xff] %v4542_v21  ;;  %2982 = vpow2.f32 %v1225_v47  ;;  %v1233_v4 = vmul.f32 1.442695, %v6148_v16  ;;  %v4551_v3 = vpop.eup %2972  ;;  %v6151_v47 = vsub.f32 %v4097_v30, %v4354_v24 }
 0x2dd   :  { %2984 = vpow2.f32 %v1159_v23  ;;  %6149 = vst [vmem:[#allocation35_spill] sm:$0xff] %v4551_v3  ;;  %v1175_v23 = vmul.f32 1.442695, %v6153_v50  ;;  %v6156_v30 = vsub.f32 %v3748_v63, %v4356_v22  ;;  %v6160_v63 = vsub.f32 %v4141_v2, %v4354_v24 }
 0x2de   :  { %v1292_v60 = vadd.f32 %v4515_v35, %v1291_v56  ;;  %v1163_v56 = vmul.f32 1.442695, %v6144_v8  ;;  %v1237_v11 = vmul.f32 1.442695, %v6151_v47 }
 0x2e0   :  { %v1293_v37 = vadd.f32 %v4524_v62, %v1292_v60  ;;  %v1167_v60 = vmul.f32 1.442695, %v6147_v6  ;;  %2986 = vpow2.f32 %v1163_v56  ;;  %v6154_v56 = vsub.f32 %v4109_v1, %v4354_v24  ;;  %v6214_v62 = vld [vmem:[#allocation36_spill] sm:$0xff] }
 0x2e1   :  { %2988 = vpow2.f32 %v1229_v52  ;;  %v1179_v6 = vmul.f32 1.442695, %v6156_v30  ;;  %v6159_v1 = vsub.f32 %v3780_v44, %v4356_v22  ;;  %v6162_v44 = vsub.f32 %v4173_v12, %v4354_v24 }
 0x2e2   :  { %v1294_v61 = vadd.f32 %v4533_v57, %v1293_v37  ;;  %v1171_v37 = vmul.f32 1.442695, %v6150_v10  ;;  %v4560_v51 = vpop.eup %2974  ;;  %2990 = vpow2.f32 %v1167_v60  ;;  %v1241_v20 = vmul.f32 1.442695, %v6154_v56 }
 0x2e3   :  { %6152 = vst [vmem:[#allocation37_spill] sm:$0xff] %v4560_v51  ;;  %2992 = vpow2.f32 %v1233_v4  ;;  %v6157_v60 = vsub.f32 %v4130_v13, %v4354_v24 }
 0x2e4   :  { %v1295_v18 = vadd.f32 %v4542_v21, %v1294_v61  ;;  %v4569_v61 = vpop.eup %2976  ;;  %2994 = vpow2.f32 %v1171_v37  ;;  %v1249_v37 = vmul.f32 1.442695, %v6160_v63 }
 0x2e5   :  { %6155 = vst [vmem:[#allocation39_spill] sm:$0xff] %v4569_v61  ;;  %2996 = vpow2.f32 %v1237_v11  ;;  %v1245_v55 = vmul.f32 1.442695, %v6157_v60  ;;  %v4578_v4 = vpop.eup %2978  ;;  %v6161_v11 = vsub.f32 %v3794_v0, %v4356_v22  ;;  %v6164_v0 = vsub.f32 %v4197_v5, %v4354_v24 }
 0x2e6   :  { %v1296_v8 = vadd.f32 %v4551_v3, %v1295_v18  ;;  %6158 = vst [vmem:[#allocation41_spill] sm:$0xff] %v4578_v4  ;;  %2998 = vpow2.f32 %v1175_v23  ;;  %v1183_v18 = vmul.f32 1.442695, %v6159_v1  ;;  %v4583_v10 = vpop.eup %2980  ;;  %v1253_v23 = vmul.f32 1.442695, %v6162_v44 }
 0x2e7   :  { %3000 = vpow2.f32 %v1241_v20  ;;  %v4589_v13 = vpop.eup %2982  ;;  %v6163_v20 = vsub.f32 %v6113_v7, %v4356_v22  ;;  %v6168_v44 = vsub.f32 %v4263_v59, %v4354_v24 }
 0x2e8   :  { %v1297_v52 = vadd.f32 %v4560_v51, %v1296_v8  ;;  %3002 = vpow2.f32 %v1179_v6  ;;  %v1187_v8 = vmul.f32 1.442695, %v6161_v11  ;;  %v4594_v50 = vpop.eup %2984  ;;  %v1257_v6 = vmul.f32 1.442695, %v6164_v0 }
 0x2e9   :  { %3004 = vpow2.f32 %v1245_v55  ;;  %v6167_v11 = vsub.f32 %v6115_v19, %v4356_v22 }
 0x2ea   :  { %v1298_v16 = vadd.f32 %v4569_v61, %v1297_v52  ;;  %v4600_v2 = vpop.eup %2986  ;;  %3006 = vpow2.f32 %v1183_v18  ;;  %v1191_v52 = vmul.f32 1.442695, %v6163_v20  ;;  %v6166_v18 = vsub.f32 %v4243_v41, %v4354_v24 }
 0x2eb   :  { %v4605_v30 = vpop.eup %2988  ;;  %3008 = vpow2.f32 %v1249_v37  ;;  %v1322_v12 = vadd.f32 %v4600_v2, %v4594_v50 }
 0x2ec   :  { %v1299_v47 = vadd.f32 %v4578_v4, %v1298_v16  ;;  %v4613_v55 = vpop.eup %2990  ;;  %3010 = vpow2.f32 %v1187_v8  ;;  %v6165_v16 = vsub.f32 %v6114_v29, %v4356_v22  ;;  %v1261_v5 = vmul.f32 1.442695, %v6166_v18 }
 0x2ed   :  { %v4618_v1 = vpop.eup %2992  ;;  %3012 = vpow2.f32 %v1253_v23  ;;  %v1323_v37 = vadd.f32 %v4613_v55, %v1322_v12  ;;  %v1199_v8 = vmul.f32 1.442695, %v6167_v11  ;;  %v1265_v23 = vmul.f32 1.442695, %v6168_v44 }
 0x2ee   :  { %v1300_v56 = vadd.f32 %v4583_v10, %v1299_v47  ;;  %v1195_v7 = vmul.f32 1.442695, %v6165_v16  ;;  %v4625_v47 = vpop.eup %2994  ;;  %3014 = vpow2.f32 %v1191_v52  ;;  %v6169_v52 = vsub.f32 %v6116_v14, %v4356_v22 }
 0x2ef   :  { %v4630_v29 = vpop.eup %2996  ;;  %3016 = vpow2.f32 %v1257_v6  ;;  %v6170_v6 = vsub.f32 %v4294_v34, %v4354_v24 }
 0x2f0   :  { %v1301_v60 = vadd.f32 %v4589_v13, %v1300_v56  ;;  %v1324_v56 = vadd.f32 %v4625_v47, %v1323_v37  ;;  %v4637_v20 = vpop.eup %2998  ;;  %3018 = vpow2.f32 %v1195_v7  ;;  %v1203_v0 = vmul.f32 1.442695, %v6169_v52 }
 0x2f1   :  { %v4642_v19 = vpop.eup %3000  ;;  %3020 = vpow2.f32 %v1261_v5  ;;  %v6171_v7 = vsub.f32 %v6117_v42, %v4356_v22  ;;  %v6172_v5 = vsub.f32 %v4311_v40, %v4354_v24 }
 0x2f2   :  { %v1302_v63 = vadd.f32 %v4605_v30, %v1301_v60  ;;  %v1269_v60 = vmul.f32 1.442695, %v6170_v6  ;;  %v1325_v12 = vadd.f32 %v4637_v20, %v1324_v56  ;;  %v4649_v16 = vpop.eup %3002  ;;  %3022 = vpow2.f32 %v1199_v8 }
 0x2f3   :  { %v1207_v18 = vmul.f32 1.442695, %v6171_v7  ;;  %v4654_v14 = vpop.eup %3004  ;;  %3024 = vpow2.f32 %v1265_v23  ;;  %v6173_v8 = vsub.f32 %v6118_v38, %v4356_v22  ;;  %v6174_v23 = vsub.f32 %v4335_v25, %v4354_v24 }
 0x2f4   :  { %v1303_v41 = vadd.f32 %v4618_v1, %v1302_v63  ;;  %v1273_v63 = vmul.f32 1.442695, %v6172_v5  ;;  %v1326_v37 = vadd.f32 %v4649_v16, %v1325_v12  ;;  %v4661_v11 = vpop.eup %3006  ;;  %3026 = vpow2.f32 %v1203_v0 }
 0x2f5   :  { %v1211_v44 = vmul.f32 1.442695, %v6173_v8  ;;  %v4666_v42 = vpop.eup %3008  ;;  %3028 = vpow2.f32 %v1269_v60  ;;  %v6175_v0 = vsub.f32 %v6120_v26, %v4356_v22  ;;  %v6176_v60 = vsub.f32 %v4347_v48, %v4354_v24 }
 0x2f6   :  { %v1304_v59 = vadd.f32 %v4630_v29, %v1303_v41  ;;  %v1277_v41 = vmul.f32 1.442695, %v6174_v23  ;;  %v1327_v56 = vadd.f32 %v4661_v11, %v1326_v37  ;;  %v4673_v52 = vpop.eup %3010  ;;  %3030 = vpow2.f32 %v1207_v18 }
 0x2f7   :  { %v1215_v6 = vmul.f32 1.442695, %v6175_v0  ;;  %v4678_v38 = vpop.eup %3012  ;;  %3032 = vpow2.f32 %v1273_v63  ;;  %v6178_v18 = vsub.f32 %v6121_v49, %v4356_v22  ;;  %v6180_v48 = vsub.f32 %v6122_v9, %v4356_v22 }
 0x2f8   :  { %v1305_v34 = vadd.f32 %v4642_v19, %v1304_v59  ;;  %v1281_v59 = vmul.f32 1.442695, %v6176_v60  ;;  %v1328_v12 = vadd.f32 %v4673_v52, %v1327_v56  ;;  %v4685_v7 = vpop.eup %3014  ;;  %3034 = vpow2.f32 %v1211_v44 }
 0x2f9   :  { %6177 = vst [vmem:[#allocation53_spill] sm:$0xff] %v4685_v7  ;;  %v1219_v5 = vmul.f32 1.442695, %v6178_v18  ;;  %v4690_v26 = vpop.eup %3016  ;;  %3036 = vpow2.f32 %v1277_v41  ;;  %v1223_v37 = vmul.f32 1.442695, %v6180_v48  ;;  %v6182_v41 = vsub.f32 %v6123_v45, %v4356_v22 }
 0x2fa   :  { %v1306_v40 = vadd.f32 %v4654_v14, %v1305_v34  ;;  %v1329_v34 = vadd.f32 %v4685_v7, %v1328_v12  ;;  %v4694_v24 = vpop.eup %3018  ;;  %3038 = vpow2.f32 %v1215_v6  ;;  %v6184_v60 = vsub.f32 %v6124_v27, %v4356_v22 }
 0x2fb   :  { %6179 = vst [vmem:[#allocation55_spill] sm:$0xff] %v4694_v24  ;;  %v4699_v8 = vpop.eup %3020  ;;  %3040 = vpow2.f32 %v1281_v59 }
 0x2fc   :  { %v1307_v25 = vadd.f32 %v4666_v42, %v1306_v40  ;;  %v1330_v44 = vadd.f32 %v4694_v24, %v1329_v34  ;;  %v4703_v23 = vpop.eup %3022  ;;  %3042 = vpow2.f32 %v1219_v5  ;;  %v1227_v40 = vmul.f32 1.442695, %v6182_v41  ;;  %v6186_v5 = vld [vmem:[#allocation47_spill] sm:$0xff]  ;;  %v6189_v41 = vld [vmem:[#allocation48_spill] sm:$0xff] }
 0x2fd   :  { %6181 = vst [vmem:[#allocation57_spill] sm:$0xff] %v4703_v23  ;;  %v4708_v56 = vpop.eup %3024  ;;  %3044 = vpow2.f32 %v1223_v37  ;;  %v1231_v59 = vmul.f32 1.442695, %v6184_v60  ;;  %v6187_v34 = vsub.f32 %v6126_v32, %v4356_v22 }
 0x2fe   :  { %v1308_v63 = vadd.f32 %v4678_v38, %v1307_v25  ;;  %v1331_v9 = vadd.f32 %v4703_v23, %v1330_v44  ;;  %v4712_v6 = vpop.eup %3026  ;;  %3046 = vpow2.f32 %v1227_v40 }
 0x2ff   :  { %6183 = vst [vmem:[#allocation59_spill] sm:$0xff] %v4712_v6  ;;  %v4717_v25 = vpop.eup %3028  ;;  %v1235_v48 = vmul.f32 1.442695, %v6187_v34  ;;  %3048 = vpow2.f32 %v1231_v59 }
 0x300   :  { %v1309_v49 = vadd.f32 %v4690_v26, %v1308_v63  ;;  %v1332_v45 = vadd.f32 %v4712_v6, %v1331_v9  ;;  %v4721_v18 = vpop.eup %3030  ;;  %v1136_v63 = vsub.f32 %v6186_v5, %v4356_v22  ;;  %v6190_v9 = vsub.f32 %v6127_v28, %v4356_v22 }
 0x301   :  { %6185 = vst [vmem:[#allocation60_spill] sm:$0xff] %v4721_v18  ;;  %v4728_v37 = vpop.eup %3032  ;;  %3050 = vpow2.f32 %v1235_v48 }
 0x302   :  { %v1310_v0 = vadd.f32 %v4699_v8, %v1309_v49  ;;  %v1333_v49 = vadd.f32 %v4721_v18, %v1332_v45  ;;  %v4732_v44 = vpop.eup %3034  ;;  %v1239_v40 = vmul.f32 1.442695, %v6190_v9  ;;  %v1243_v4 = vmul.f32 1.442695, %v1136_v63  ;;  %v6194_v9 = vld [vmem:[#allocation50_spill] sm:$0xff]  ;;  %v6195_v63 = vld [vmem:[#allocation51_spill] sm:$0xff] }
 0x303   :  { %6188 = vst [vmem:[#allocation47_spill] sm:$0xff] %v4732_v44  ;;  %v4739_v60 = vpop.eup %3036  ;;  %v1144_v48 = vsub.f32 %v6195_v63, %v4356_v22 }
 0x304   :  { %v1311_v12 = vadd.f32 %v4708_v56, %v1310_v0  ;;  %v1138_v0 = vsub.f32 %v6189_v41, %v4356_v22  ;;  %v1334_v5 = vadd.f32 %v4732_v44, %v1333_v49  ;;  %v4743_v34 = vpop.eup %3038  ;;  %3052 = vpow2.f32 %v1239_v40 }
 0x305   :  { %6191 = vst [vmem:[#allocation48_spill] sm:$0xff] %v4743_v34  ;;  %v4747_v61 = vpop.eup %3040  ;;  %3054 = vpow2.f32 %v1243_v4 }
 0x306   :  { %v1312_v27 = vadd.f32 %v4717_v25, %v1311_v12  ;;  %v6192_v12 = vld [vmem:[#allocation49_spill] sm:$0xff]  ;;  %v1335_v28 = vadd.f32 %v4743_v34, %v1334_v5  ;;  %v4751_v41 = vpop.eup %3042  ;;  %v1247_v49 = vmul.f32 1.442695, %v1138_v0 }
 0x307   :  { %v1140_v45 = vsub.f32 %v6192_v12, %v4356_v22  ;;  %6193 = vst [vmem:[#allocation49_spill] sm:$0xff] %v4751_v41  ;;  %v4757_v12 = vpop.eup %3044 }
 0x308   :  { %v1313_v32 = vadd.f32 %v4728_v37, %v1312_v27  ;;  %v1142_v27 = vsub.f32 %v6194_v9, %v4356_v22  ;;  %v1336_v3 = vadd.f32 %v4751_v41, %v1335_v28  ;;  %v4762_v34 = vpop.eup %3046  ;;  %3056 = vpow2.f32 %v1247_v49 }
 0x309   :  { %v1259_v28 = vmul.f32 1.442695, %v1144_v48 }
 0x30a   :  { %v1314_v59 = vadd.f32 %v4739_v60, %v1313_v32  ;;  %v1251_v32 = vmul.f32 1.442695, %v1140_v45  ;;  %v1337_v5 = vadd.f32 %v4757_v12, %v1336_v3  ;;  %v1255_v9 = vmul.f32 1.442695, %v1142_v27 }
 0x30b   :  { %v6196_v3 = vsub.f32 %v6129_v54, %v4356_v22 }
 0x30c   :  { %v1315_v51 = vadd.f32 %v4747_v61, %v1314_v59  ;;  %v1338_v0 = vadd.f32 %v4762_v34, %v1337_v5  ;;  %v4765_v59 = vpop.eup %3048  ;;  %3058 = vpow2.f32 %v1251_v32  ;;  %v6198_v5 = vsub.f32 %v6131_v17, %v4356_v22 }
 0x30d   :  { %v4768_v63 = vpop.eup %3050  ;;  %3060 = vpow2.f32 %v1255_v9  ;;  %v1263_v4 = vmul.f32 1.442695, %v6196_v3  ;;  %v6200_v3 = vsub.f32 %v4342_v31, %v4356_v22 }
 0x30e   :  { %v1316_v44 = vrot.slane %v1315_v51, 4  ;;  %v1339_v18 = vadd.f32 %v4765_v59, %v1338_v0  ;;  %v4774_v27 = vpop.eup %3052  ;;  %3062 = vpow2.f32 %v1259_v28  ;;  %v1271_v54 = vmul.f32 1.442695, %v6198_v5 }
 0x30f   :  { %v4780_v32 = vpop.eup %3054  ;;  %3064 = vpow2.f32 %v1263_v4  ;;  %v6199_v0 = vsub.f32 %v6132_v15, %v4356_v22  ;;  %v1279_v17 = vmul.f32 1.442695, %v6200_v3 }
 0x310   :  { %v1317_v40 = vadd.f32 %v1316_v44, %v1315_v51  ;;  %v1340_v45 = vadd.f32 %v4768_v63, %v1339_v18  ;;  %v6197_v51 = vsub.f32 %v6130_v53, %v4356_v22 }
 0x311   :  { %v1275_v53 = vmul.f32 1.442695, %v6199_v0 }
 0x312   :  { %v1318_v41 = vrot.slane %v1317_v40, 2  ;;  %v1267_v44 = vmul.f32 1.442695, %v6197_v51  ;;  %v1341_v48 = vadd.f32 %v4774_v27, %v1340_v45  ;;  %v4786_v18 = vpop.eup %3056  ;;  %v6201_v51 = vsub.f32 %v4350_v46, %v4356_v22 }
 0x314   :  { %v1319_v49 = vadd.f32 %v1318_v41, %v1317_v40  ;;  %v1342_v9 = vadd.f32 %v4780_v32, %v1341_v48  ;;  %3066 = vpow2.f32 %v1267_v44  ;;  %v1283_v15 = vmul.f32 1.442695, %v6201_v51 }
 0x315   :  { %3068 = vpow2.f32 %v1271_v54 }
 0x316   :  { %v1320_v28 = vrot.slane %v1319_v49, 1  ;;  %v1343_v41 = vadd.f32 %v4786_v18, %v1342_v9  ;;  %v4792_v40 = vpop.eup %3058  ;;  %3070 = vpow2.f32 %v1275_v53 }
 0x317   :  { %v4798_v45 = vpop.eup %3060  ;;  %3072 = vpow2.f32 %v1279_v17 }
 0x318   :  { %v1344_v4 = vadd.f32 %v4792_v40, %v1343_v41  ;;  %v1321_v44 = vadd.f32 %v1320_v28, %v1319_v49  ;;  %v4804_v5 = vpop.eup %3062  ;;  %3074 = vpow2.f32 %v1283_v15 }
 0x319   :  { %v4807_v9 = vpop.eup %3064 }
 0x31a   :  { %v1345_v48 = vadd.f32 %v4798_v45, %v1344_v4  ;;  %3076 = vrcp.f32 %v1321_v44 }
 0x31c   :  { %v1346_v54 = vadd.f32 %v4804_v5, %v1345_v48 }
 0x31e   :  { %v1347_v31 = vadd.f32 %v4807_v9, %v1346_v54  ;;  %v4810_v0 = vpop.eup %3066 }
 0x31f   :  { %v4813_v46 = vpop.eup %3068 }
 0x320   :  { %v1348_v53 = vadd.f32 %v4810_v0, %v1347_v31  ;;  %v4816_v49 = vpop.eup %3070 }
 0x321   :  { %v4819_v41 = vpop.eup %3072 }
 0x322   :  { %v1349_v22 = vadd.f32 %v4813_v46, %v1348_v53  ;;  %v3075_v17 = vpop.eup %3074  ;;  %v6202_v53 = vld [vmem:[#allocation28_spill] sm:$0xff] }
 0x324   :  { %v1350_v28 = vadd.f32 %v4816_v49, %v1349_v22  ;;  %v4822_v4 = vpop.eup %3076  ;;  %v6203_v22 = vunpack.c.l.bf16 %v6202_v53 }
 0x325   :  { %v1393_v44 = vmul.f32 %v4822_v4, %v4583_v10  ;;  %v1395_v48 = vmul.f32 %v4822_v4, %v4589_v13  ;;  %v1397_v31 = vmul.f32 %v4822_v4, %v4605_v30  ;;  %v1401_v10 = vmul.f32 %v4822_v4, %v4630_v29  ;;  %v6208_v13 = vld [vmem:[#allocation32_spill] sm:$0xff] }
 0x326   :  { %v1351_v3 = vadd.f32 %v4819_v41, %v1350_v28  ;;  %v6205_v28 = vld [vmem:[#allocation30_spill] sm:$0xff]  ;;  %v1403_v30 = vmul.f32 %v4822_v4, %v4642_v19  ;;  %v1405_v29 = vmul.f32 %v4822_v4, %v4654_v14  ;;  %v1407_v19 = vmul.f32 %v4822_v4, %v4666_v42 }
 0x327   :  { %v4832_v21 = vmul.f32 %v1393_v44, %v6203_v22  ;;  %v6206_v57 = vunpack.c.l.bf16 %v6205_v28  ;;  %v6211_v22 = vld [vmem:[#allocation34_spill] sm:$0xff]  ;;  %v1409_v44 = vmul.f32 %v4822_v4, %v4678_v38  ;;  %v1411_v14 = vmul.f32 %v4822_v4, %v4690_v26 }
 0x328   :  { %v1352_v51 = vadd.f32 %v3075_v17, %v1351_v3  ;;  %v1399_v3 = vmul.f32 %v4822_v4, %v4618_v1  ;;  %v6215_v1 = vunpack.c.l.bf16 %v6214_v62  ;;  %v1415_v26 = vmul.f32 %v4822_v4, %v4708_v56 }
 0x329   :  { %6204 = vst [vmem:[#allocation50_spill] sm:$0xff] %v4832_v21  ;;  %v4836_v6 = vmul.f32 %v1395_v48, %v6206_v57  ;;  %v6212_v57 = vunpack.c.l.bf16 %v6211_v22  ;;  %v6226_v21 = vld [vmem:[#allocation43_spill] sm:$0xff]  ;;  %v1417_v42 = vmul.f32 %v4822_v4, %v4717_v25 }
 0x32a   :  { %v1353_v15 = vrot.slane %v1352_v51, 4  ;;  %v4856_v35 = vmul.f32 %v1401_v10, %v6215_v1 }
 0x32b   :  { %6207 = vst [vmem:[#allocation51_spill] sm:$0xff] %v4836_v6  ;;  %v4852_v48 = vmul.f32 %v1399_v3, %v6212_v57  ;;  %v6220_v57 = vld [vmem:[#allocation40_spill] sm:$0xff]  ;;  %v6227_v3 = vunpack.c.l.bf16 %v6226_v21 }
 0x32c   :  { %v1354_v54 = vadd.f32 %v1353_v15, %v1352_v51  ;;  %v6209_v51 = vunpack.c.l.bf16 %v6208_v13  ;;  %6216 = vst [vmem:[#allocation32_spill] sm:$0xff] %v4856_v35  ;;  %v6221_v10 = vunpack.c.l.bf16 %v6220_v57 }
 0x32d   :  { %6213 = vst [vmem:[#allocation30_spill] sm:$0xff] %v4852_v48 }
 0x32e   :  { %v1355_v23 = vrot.slane %v1354_v54, 2  ;;  %v4844_v15 = vmul.f32 %v1397_v31, %v6209_v51  ;;  %v6217_v31 = vld [vmem:[#allocation38_spill] sm:$0xff]  ;;  %v4872_v1 = vmul.f32 %v1405_v29, %v6221_v10  ;;  %v6229_v29 = vld [vmem:[#allocation44_spill] sm:$0xff] }
 0x32f   :  { %v6218_v51 = vunpack.c.l.bf16 %v6217_v31  ;;  %v6230_v10 = vunpack.c.l.bf16 %v6229_v29 }
 0x330   :  { %6210 = vst [vmem:[#allocation28_spill] sm:$0xff] %v4844_v15  ;;  %v1356_v24 = vadd.f32 %v1355_v23, %v1354_v54  ;;  %6222 = vst [vmem:[#allocation36_spill] sm:$0xff] %v4872_v1  ;;  %v1413_v23 = vmul.f32 %v4822_v4, %v4699_v8  ;;  %v4886_v15 = vmul.f32 %v1409_v44, %v6227_v3  ;;  %v6232_v8 = vld [vmem:[#allocation45_spill] sm:$0xff] }
 0x331   :  { %v4862_v7 = vmul.f32 %v1403_v30, %v6218_v51  ;;  %v6223_v30 = vld [vmem:[#allocation42_spill] sm:$0xff]  ;;  %v4890_v48 = vmul.f32 %v1411_v14, %v6230_v10  ;;  %v6233_v6 = vunpack.c.l.bf16 %v6232_v8  ;;  %v1419_v44 = vmul.f32 %v4822_v4, %v4728_v37 }
 0x332   :  { %v1357_v54 = vrot.slane %v1356_v24, 1  ;;  %v6224_v51 = vunpack.c.l.bf16 %v6223_v30  ;;  %6228 = vst [vmem:[#allocation40_spill] sm:$0xff] %v4886_v15  ;;  %v1421_v3 = vmul.f32 %v4822_v4, %v4739_v60  ;;  %v6235_v14 = vld [vmem:[#allocation46_spill] sm:$0xff]  ;;  %v6244_v60 = vld [vmem:[#allocation56_spill] sm:$0xff] }
 0x333   :  { %6219 = vst [vmem:[#allocation34_spill] sm:$0xff] %v4862_v7  ;;  %6231 = vst [vmem:[#allocation42_spill] sm:$0xff] %v4890_v48  ;;  %v4896_v36 = vmul.f32 %v1413_v23, %v6233_v6  ;;  %v6236_v10 = vunpack.c.l.bf16 %v6235_v14  ;;  %v6238_v23 = vld [vmem:[#allocation52_spill] sm:$0xff]  ;;  %v6245_v1 = vunpack.c.l.bf16 %v6244_v60  ;;  %v6260_v7 = vld [vmem:[#allocation9_spill] sm:$0xff] }
 0x334   :  { %v4882_v38 = vmul.f32 %v1407_v19, %v6224_v51  ;;  %v1358_v19 = vadd.f32 %v1357_v54, %v1356_v24  ;;  %v6239_v35 = vunpack.c.l.bf16 %v6238_v23  ;;  %v1423_v24 = vmul.f32 %v4822_v4, %v4747_v61  ;;  %v6241_v54 = vld [vmem:[#allocation54_spill] sm:$0xff] }
 0x335   :  { %6234 = vst [vmem:[#allocation43_spill] sm:$0xff] %v4896_v36  ;;  %v4910_v6 = vmul.f32 %v1415_v26, %v6236_v10  ;;  %v6242_v37 = vunpack.c.l.bf16 %v6241_v54  ;;  %v6247_v10 = vld [vmem:[#allocation58_spill] sm:$0xff] }
 0x336   :  { %6225 = vst [vmem:[#allocation38_spill] sm:$0xff] %v4882_v38  ;;  %v4914_v25 = vmul.f32 %v1417_v42, %v6239_v35  ;;  %3078 = vrcp.f32 %v1358_v19  ;;  %v4924_v38 = vmul.f32 %v1421_v3, %v6245_v1  ;;  %v6248_v56 = vunpack.c.l.bf16 %v6247_v10 }
 0x337   :  { %6237 = vst [vmem:[#allocation44_spill] sm:$0xff] %v4910_v6  ;;  %v4920_v51 = vmul.f32 %v1419_v44, %v6242_v37  ;;  %v1361_v42 = vmul.f32 %v4822_v4, %v4434_v58  ;;  %v1363_v1 = vmul.f32 %v4822_v4, %v4442_v43  ;;  %v6250_v44 = vld [vmem:[#allocation17_spill] sm:$0xff]  ;;  %v6251_v58 = vld [vmem:[#allocation6_spill] sm:$0xff]  ;;  %v6253_v43 = vld [vmem:[#allocation7_spill] sm:$0xff] }
 0x338   :  { %6240 = vst [vmem:[#allocation45_spill] sm:$0xff] %v4914_v25  ;;  %6246 = vst [vmem:[#allocation52_spill] sm:$0xff] %v4924_v38  ;;  %v4930_v15 = vmul.f32 %v1423_v24, %v6248_v56  ;;  %v1365_v3 = vmul.f32 %v4822_v4, %v6250_v44  ;;  %v6252_v35 = vunpack.c.l.bf16 %v6251_v58  ;;  %v6254_v38 = vunpack.c.l.bf16 %v6253_v43  ;;  %v6255_v25 = vld [vmem:[#allocation19_spill] sm:$0xff]  ;;  %v6258_v6 = vld [vmem:[#allocation8_spill] sm:$0xff] }
 0x339   :  { %6243 = vst [vmem:[#allocation46_spill] sm:$0xff] %v4920_v51 }
 0x33a   :  { %6249 = vst [vmem:[#allocation54_spill] sm:$0xff] %v4930_v15  ;;  %v1425_v26 = vmul.f32 %v1361_v42, %v6252_v35  ;;  %v1427_v15 = vmul.f32 %v1363_v1, %v6254_v38  ;;  %v6261_v35 = vunpack.c.h.bf16 %v6260_v7 }
 0x340   :  { %v4940_v19 = vpop.eup %3078 }
 0x341   :  { %v1424_v56 = vmul.f32 %v4940_v19, %v3075_v17  ;;  %v1362_v24 = vmul.f32 %v4940_v19, %v4594_v50  ;;  %v1364_v37 = vmul.f32 %v4940_v19, %v4600_v2  ;;  %v1366_v61 = vmul.f32 %v4940_v19, %v4613_v55 }
 0x342   :  { %v1368_v44 = vmul.f32 %v4940_v19, %v4625_v47  ;;  %v1367_v17 = vmul.f32 %v4822_v4, %v6255_v25  ;;  %v6256_v50 = vunpack.c.h.bf16 %v6251_v58  ;;  %v6257_v2 = vunpack.c.h.bf16 %v6253_v43  ;;  %v6262_v25 = vld [vmem:[#allocation21_spill] sm:$0xff] }
 0x343   :  { %v6259_v55 = vunpack.c.h.bf16 %v6258_v6  ;;  %v1370_v38 = vmul.f32 %v4940_v19, %v4637_v20  ;;  %v1372_v47 = vmul.f32 %v4940_v19, %v4649_v16  ;;  %v1369_v1 = vmul.f32 %v4822_v4, %v6262_v25  ;;  %v6265_v16 = vld [vmem:[#allocation10_spill] sm:$0xff] }
 0x344   :  { %v1426_v51 = vmul.f32 %v1362_v24, %v6256_v50  ;;  %v1428_v36 = vmul.f32 %v1364_v37, %v6257_v2  ;;  %v1432_v42 = vmul.f32 %v1368_v44, %v6261_v35  ;;  %v1489_v24 = vpack.c.bf16 %v1427_v15, %v1425_v26  ;;  %v6267_v15 = vld [vmem:[#allocation11_spill] sm:$0xff] }
 0x345   :  { %v1430_v48 = vmul.f32 %v1366_v61, %v6259_v55  ;;  %v6263_v58 = vunpack.c.l.bf16 %v6258_v6  ;;  %v6264_v43 = vunpack.c.l.bf16 %v6260_v7  ;;  %v1371_v44 = vmul.f32 %v4822_v4, %v4494_v39 }
 0x346   :  { %v1490_v33 = vpack.c.bf16 %v1428_v36, %v1426_v51  ;;  %v1374_v20 = vmul.f32 %v4940_v19, %v4661_v11  ;;  %v6266_v51 = vunpack.c.h.bf16 %v6265_v16  ;;  %v6268_v26 = vunpack.c.h.bf16 %v6267_v15 }
 0x347   :  { %v1429_v37 = vmul.f32 %v1365_v3, %v6263_v58  ;;  %v1431_v61 = vmul.f32 %v1367_v17, %v6264_v43  ;;  %v1492_v36 = vpack.c.bf16 %v1432_v42, %v1430_v48  ;;  %v6269_v3 = vunpack.c.l.bf16 %v6265_v16 }
 0x348   :  { %1553 = vmatprep.mubr.bf16.mxu0 %v1490_v33  ;;  %v1434_v50 = vmul.f32 %v1370_v38, %v6266_v51  ;;  %v1436_v6 = vmul.f32 %v1372_v47, %v6268_v26  ;;  %v6270_v2 = vunpack.c.l.bf16 %v6267_v15  ;;  %v1394_v33 = vmul.f32 %v4940_v19, %v4757_v12  ;;  %v6272_v47 = vld [vmem:[#allocation12_spill] sm:$0xff] }
 0x349   :  { %1554 = vmatmul.mubr.bf16.vlgmr.msra.gmra.mrb[32].mxu0 %v1489_v24  ;;  %v1433_v7 = vmul.f32 %v1369_v1, %v6269_v3  ;;  %v1491_v17 = vpack.c.bf16 %v1431_v61, %v1429_v37  ;;  %v1396_v11 = vmul.f32 %v4940_v19, %v4762_v34  ;;  %v6271_v48 = vunpack.c.h.bf16 %v6247_v10 }
 0x34a   :  { %1561 = vmatprep.mubr.bf16.mxu0 %v1492_v36  ;;  %v1435_v39 = vmul.f32 %v1371_v44, %v6270_v2  ;;  %v1376_v35 = vmul.f32 %v4940_v19, %v4673_v52  ;;  %v1398_v42 = vmul.f32 %v4940_v19, %v4765_v59  ;;  %v1400_v38 = vmul.f32 %v4940_v19, %v4768_v63 }
 0x34b   :  { %v4995_v55 = vmul.f32 %v1424_v56, %v6271_v48  ;;  %v6273_v25 = vunpack.c.h.bf16 %v6272_v47  ;;  %v6274_v12 = vunpack.c.h.bf16 %v6202_v53  ;;  %v6275_v34 = vunpack.c.h.bf16 %v6205_v28 }
 0x34c   :  { %v1402_v52 = vmul.f32 %v4940_v19, %v4774_v27  ;;  %v1494_v56 = vpack.c.bf16 %v1436_v6, %v1434_v50  ;;  %v6276_v59 = vunpack.c.h.bf16 %v6208_v13  ;;  %v6277_v63 = vunpack.c.h.bf16 %v6211_v22 }
 0x34d   :  { %v1438_v1 = vmul.f32 %v1374_v20, %v6273_v25  ;;  %v5007_v24 = vmul.f32 %v1394_v33, %v6274_v12  ;;  %v5011_v10 = vmul.f32 %v1396_v11, %v6275_v34  ;;  %v1404_v53 = vmul.f32 %v4940_v19, %v4780_v32  ;;  %v6291_v25 = vld [vmem:[#allocation23_spill] sm:$0xff]  ;;  %v6292_v12 = vld [vmem:[#allocation25_spill] sm:$0xff] }
 0x34e   :  { %v5017_v58 = vmul.f32 %v1398_v42, %v6276_v59  ;;  %v5021_v37 = vmul.f32 %v1400_v38, %v6277_v63  ;;  %v6278_v43 = vunpack.c.h.bf16 %v6214_v62  ;;  %v1406_v27 = vmul.f32 %v4940_v19, %v4786_v18  ;;  %v6294_v59 = vld [vmem:[#allocation55_spill] sm:$0xff] }
 0x34f   :  { %v1506_v28 = vpack.c.bf16 %v5011_v10, %v5007_v24  ;;  %v1408_v13 = vmul.f32 %v4940_v19, %v4792_v40  ;;  %v6279_v44 = vunpack.c.h.bf16 %v6217_v31  ;;  %v1410_v32 = vmul.f32 %v4940_v19, %v4798_v45  ;;  %v6344_v10 = vld [vmem:[#allocation38_spill] sm:$0xff] }
 0x350   :  { %v5029_v61 = vmul.f32 %v1402_v52, %v6278_v43  ;;  %v1508_v22 = vpack.c.bf16 %v5021_v37, %v5017_v58  ;;  %v1412_v62 = vmul.f32 %v4940_v19, %v4804_v5  ;;  %v6280_v20 = vunpack.c.h.bf16 %v6220_v57  ;;  %v6347_v37 = vld [vmem:[#allocation42_spill] sm:$0xff] }
 0x351   :  { %v5039_v36 = vmul.f32 %v1404_v53, %v6279_v44  ;;  %1562 = vmatmul.mubr.bf16.gmra.mrb[36].mxu0 %v1491_v17  ;;  %v6281_v40 = vunpack.c.h.bf16 %v6223_v30  ;;  %v1414_v31 = vmul.f32 %v4940_v19, %v4807_v9  ;;  %v1416_v51 = vmul.f32 %v4940_v19, %v4810_v0  ;;  %v6299_v44 = vld [vmem:[#allocation15_spill] sm:$0xff] }
 0x352   :  { %v5047_v18 = vmul.f32 %v1406_v27, %v6280_v20  ;;  %1569 = vmatprep.mubr.bf16.mxu0 %v1494_v56  ;;  %v6282_v5 = vunpack.c.h.bf16 %v6226_v21  ;;  %v6283_v57 = vunpack.c.h.bf16 %v6229_v29  ;;  %v1418_v30 = vmul.f32 %v4940_v19, %v4813_v46  ;;  %v6286_v29 = vld [vmem:[#allocation13_spill] sm:$0xff]  ;;  %v6297_v27 = vld [vmem:[#allocation14_spill] sm:$0xff] }
 0x353   :  { %v5051_v16 = vmul.f32 %v1408_v13, %v6281_v40  ;;  %v1510_v45 = vpack.c.bf16 %v5039_v36, %v5029_v61  ;;  %v6284_v0 = vunpack.c.h.bf16 %v6232_v8  ;;  %v6285_v6 = vunpack.c.h.bf16 %v6235_v14  ;;  %v6293_v56 = vld [vmem:[#allocation53_spill] sm:$0xff]  ;;  %v6301_v40 = vld [vmem:[#allocation27_spill] sm:$0xff]  ;;  %v6350_v36 = vld [vmem:[#allocation44_spill] sm:$0xff] }
 0x354   :  { %v5061_v50 = vmul.f32 %v1410_v32, %v6282_v5  ;;  %v5065_v15 = vmul.f32 %v1412_v62, %v6283_v57  ;;  %v1420_v21 = vmul.f32 %v4940_v19, %v4816_v49  ;;  %v6287_v17 = vunpack.c.h.bf16 %v6286_v29 }
 0x355   :  { %v1512_v9 = vpack.c.bf16 %v5051_v16, %v5047_v18  ;;  %v5073_v26 = vmul.f32 %v1414_v31, %v6284_v0  ;;  %v5077_v3 = vmul.f32 %v1416_v51, %v6285_v6  ;;  %v6288_v33 = vunpack.c.h.bf16 %v6238_v23  ;;  %v6302_v51 = vld [vmem:[#allocation29_spill] sm:$0xff]  ;;  %v6304_v0 = vld [vmem:[#allocation59_spill] sm:$0xff]  ;;  %v6353_v16 = vld [vmem:[#allocation46_spill] sm:$0xff] }
 0x356   :  { %v1440_v2 = vmul.f32 %v1376_v35, %v6287_v17  ;;  %v1514_v46 = vpack.c.bf16 %v5065_v15, %v5061_v50  ;;  %v1422_v8 = vmul.f32 %v4940_v19, %v4819_v41  ;;  %v6289_v48 = vunpack.c.h.bf16 %v6241_v54  ;;  %v6356_v15 = vld [vmem:[#allocation54_spill] sm:$0xff] }
 0x357   :  { %v5087_v11 = vmul.f32 %v1418_v30, %v6288_v33  ;;  %v1516_v14 = vpack.c.bf16 %v5077_v3, %v5073_v26  ;;  %v6290_v49 = vunpack.c.h.bf16 %v6244_v60  ;;  %v1493_v38 = vpack.c.bf16 %v1435_v39, %v1433_v7  ;;  %v6303_v30 = vld [vmem:[#allocation57_spill] sm:$0xff]  ;;  %v6307_v33 = vld [vmem:[#allocation16_spill] sm:$0xff] }
 0x358   :  { %v5095_v42 = vmul.f32 %v1420_v21, %v6289_v48  ;;  %v1373_v23 = vmul.f32 %v4822_v4, %v6291_v25  ;;  %v1375_v34 = vmul.f32 %v4822_v4, %v6292_v12  ;;  %v1496_v52 = vpack.c.bf16 %v1440_v2, %v1438_v1  ;;  %v6311_v12 = vld [vmem:[#allocation31_spill] sm:$0xff] }
 0x359   :  { %v5099_v35 = vmul.f32 %v1422_v8, %v6290_v49  ;;  %v1378_v54 = vmul.f32 %v4940_v19, %v6293_v56  ;;  %v1380_v63 = vmul.f32 %v4940_v19, %v6294_v59  ;;  %1570 = vmatmul.mubr.bf16.gmra.mrb[40].mxu0 %v1493_v38  ;;  %v6295_v7 = vunpack.c.l.bf16 %v6272_v47  ;;  %v6309_v49 = vld [vmem:[#allocation18_spill] sm:$0xff]  ;;  %v6313_v59 = vld [vmem:[#allocation60_spill] sm:$0xff] }
 0x35a   :  { %v1518_v41 = vpack.c.bf16 %v5095_v42, %v5087_v11  ;;  %1577 = vmatprep.mubr.bf16.mxu0 %v1496_v52  ;;  %v6296_v53 = vunpack.c.l.bf16 %v6286_v29  ;;  %v6298_v13 = vunpack.c.h.bf16 %v6297_v27  ;;  %v6300_v32 = vunpack.c.h.bf16 %v6299_v44  ;;  %v6312_v52 = vld [vmem:[#allocation33_spill] sm:$0xff] }
 0x35b   :  { %v1520_v60 = vpack.c.bf16 %v4995_v55, %v5099_v35  ;;  %v1437_v39 = vmul.f32 %v1373_v23, %v6295_v7  ;;  %v1377_v31 = vmul.f32 %v4822_v4, %v6301_v40  ;;  %v1379_v5 = vmul.f32 %v4822_v4, %v6302_v51  ;;  %v6314_v7 = vld [vmem:[#allocation47_spill] sm:$0xff] }
 0x35c   :  { %v1439_v43 = vmul.f32 %v1375_v34, %v6296_v53  ;;  %v1442_v1 = vmul.f32 %v1378_v54, %v6298_v13  ;;  %v1444_v62 = vmul.f32 %v1380_v63, %v6300_v32  ;;  %v1382_v47 = vmul.f32 %v4940_v19, %v6303_v30  ;;  %v6321_v51 = vld [vmem:[#allocation35_spill] sm:$0xff] }
 0x35d   :  { %v1384_v6 = vmul.f32 %v4940_v19, %v6304_v0  ;;  %v6305_v21 = vunpack.c.l.bf16 %v6297_v27  ;;  %v6306_v17 = vunpack.c.l.bf16 %v6299_v44  ;;  %v6308_v8 = vunpack.c.h.bf16 %v6307_v33  ;;  %v6323_v0 = vld [vmem:[#allocation48_spill] sm:$0xff] }
 0x35e   :  { %v1495_v20 = vpack.c.bf16 %v1439_v43, %v1437_v39  ;;  %v1498_v57 = vpack.c.bf16 %v1444_v62, %v1442_v1  ;;  %v6310_v38 = vunpack.c.h.bf16 %v6309_v49  ;;  %v1381_v34 = vmul.f32 %v4822_v4, %v6311_v12  ;;  %v6317_v1 = vld [vmem:[#allocation20_spill] sm:$0xff]  ;;  %v6319_v62 = vld [vmem:[#allocation22_spill] sm:$0xff] }
 0x35f   :  { %v1441_v29 = vmul.f32 %v1377_v31, %v6305_v21  ;;  %v1443_v2 = vmul.f32 %v1379_v5, %v6306_v17  ;;  %v1446_v48 = vmul.f32 %v1382_v47, %v6308_v8  ;;  %v1383_v56 = vmul.f32 %v4822_v4, %v6312_v52  ;;  %v6324_v21 = vld [vmem:[#allocation49_spill] sm:$0xff]  ;;  %v6331_v52 = vld [vmem:[#allocation39_spill] sm:$0xff] }
 0x360   :  { %v1448_v25 = vmul.f32 %v1384_v6, %v6310_v38  ;;  %v1386_v63 = vmul.f32 %v4940_v19, %v6313_v59  ;;  %v1388_v39 = vmul.f32 %v4940_v19, %v6314_v7  ;;  %v6315_v53 = vunpack.c.l.bf16 %v6307_v33 }
 0x361   :  { %1578 = vmatmul.mubr.bf16.gmra.mrb[44].mxu0 %v1495_v20  ;;  %v1497_v23 = vpack.c.bf16 %v1443_v2, %v1441_v29  ;;  %v6316_v27 = vunpack.c.l.bf16 %v6309_v49  ;;  %v6318_v44 = vunpack.c.h.bf16 %v6317_v1  ;;  %v6320_v20 = vunpack.c.h.bf16 %v6319_v62 }
 0x362   :  { %1585 = vmatprep.mubr.bf16.mxu0 %v1498_v57  ;;  %v1500_v54 = vpack.c.bf16 %v1448_v25, %v1446_v48  ;;  %v1445_v43 = vmul.f32 %v1381_v34, %v6315_v53  ;;  %v1385_v5 = vmul.f32 %v4822_v4, %v6321_v51  ;;  %v6322_v57 = vld [vmem:[#allocation37_spill] sm:$0xff]  ;;  %v1390_v6 = vmul.f32 %v4940_v19, %v6323_v0  ;;  %v6327_v48 = vld [vmem:[#allocation24_spill] sm:$0xff]  ;;  %v6329_v25 = vld [vmem:[#allocation26_spill] sm:$0xff] }
 0x363   :  { %v1447_v13 = vmul.f32 %v1383_v56, %v6316_v27  ;;  %v1450_v32 = vmul.f32 %v1386_v63, %v6318_v44  ;;  %v1452_v40 = vmul.f32 %v1388_v39, %v6320_v20  ;;  %v1387_v30 = vmul.f32 %v4822_v4, %v6322_v57  ;;  %v6335_v27 = vld [vmem:[#allocation51_spill] sm:$0xff]  ;;  %v6339_v44 = vld [vmem:[#allocation28_spill] sm:$0xff] }
 0x364   :  { %v1392_v29 = vmul.f32 %v4940_v19, %v6324_v21  ;;  %v6325_v17 = vunpack.c.l.bf16 %v6317_v1  ;;  %v6326_v33 = vunpack.c.l.bf16 %v6319_v62  ;;  %v6328_v49 = vunpack.c.h.bf16 %v6327_v48  ;;  %v6341_v62 = vld [vmem:[#allocation34_spill] sm:$0xff]  ;;  %v6342_v20 = vld [vmem:[#allocation32_spill] sm:$0xff] }
 0x365   :  { %v1499_v31 = vpack.c.bf16 %v1447_v13, %v1445_v43  ;;  %v1502_v47 = vpack.c.bf16 %v1452_v40, %v1450_v32  ;;  %v1389_v56 = vmul.f32 %v4822_v4, %v6331_v52  ;;  %v6333_v63 = vunpack.c.l.bf16 %v6327_v48  ;;  %v6336_v13 = vld [vmem:[#allocation50_spill] sm:$0xff]  ;;  %v5228_v40 = vld [vmem:[%s5830_s5] ss:$0 sm:$0xff] }
 0x366   :  { %v1449_v2 = vmul.f32 %v1385_v5, %v6325_v17  ;;  %v1451_v8 = vmul.f32 %v1387_v30, %v6326_v33  ;;  %v1454_v38 = vmul.f32 %v1390_v6, %v6328_v49  ;;  %v6334_v39 = vunpack.c.l.bf16 %v6329_v25  ;;  %v3209_v30 = vld [vmem:[%s5825_s0 + $0x8] sm:$0xff] }
 0x367   :  { %v1453_v7 = vmul.f32 %v1389_v56, %v6333_v63  ;;  %v6337_v1 = vpack.c.bf16 %v6335_v27, %v6336_v13  ;;  %v6343_v24 = vpack.c.bf16 %v6341_v62, %v6342_v20  ;;  %v3211_v56 = vld [vmem:[%s5825_s0 + $0x18] sm:$0xff] }
 0x368   :  { %v1501_v34 = vpack.c.bf16 %v1451_v8, %v1449_v2 }
 0x369   :  { %1586 = vmatmul.mubr.bf16.gmra.mrb[48].mxu0 %v1497_v23  ;;  %v6330_v23 = vunpack.c.h.bf16 %v6329_v25 }
 0x36a   :  { %1593 = vmatprep.mubr.bf16.mxu0 %v1500_v54  ;;  %v6332_v54 = vld [vmem:[#allocation41_spill] sm:$0xff] }
 0x36b   :  { %v1456_v12 = vmul.f32 %v1392_v29, %v6330_v23  ;;  %v1391_v19 = vmul.f32 %v4822_v4, %v6332_v54  ;;  %v6338_v4 = vld [vmem:[#allocation30_spill] sm:$0xff]  ;;  %v3210_v23 = vld [vmem:[%s5825_s0 + $0x10] sm:$0xff]  ;;  %v1724_v54 = vmul.f32 %v3211_v56, %v5228_v40 }
 0x36c   :  { %v6340_v32 = vpack.c.bf16 %v6338_v4, %v6339_v44  ;;  %v3212_v44 = vld [vmem:[%s5825_s0 + $0x20] sm:$0xff]  ;;  %v3217_v56 = vld [vmem:[%s5825_s0 + $0x48] sm:$0xff] }
 0x36d   :  { %v1504_v59 = vpack.c.bf16 %v1456_v12, %v1454_v38  ;;  %v1455_v53 = vmul.f32 %v1391_v19, %v6334_v39  ;;  %v1723_v12 = vmul.f32 %v3210_v23, %v5228_v40 }
 0x36f   :  { %v1503_v43 = vpack.c.bf16 %v1455_v53, %v1453_v7 }
 0x371   :  { %1594 = vmatmul.mubr.bf16.gmra.mrb[52].mxu0 %v1499_v31  ;;  %v3208_v31 = vld [vmem:[%s5825_s0] sm:$0xff] }
 0x372   :  { %1601 = vmatprep.mubr.bf16.mxu0 %v1502_v47  ;;  %v1721_v51 = vmul.f32 %v3208_v31, %v5228_v40  ;;  %v1722_v47 = vmul.f32 %v3209_v30, %v5228_v40 }
 0x379   :  { %1602 = vmatmul.mubr.bf16.gmra.mrb[56].mxu0 %v1501_v34 }
 0x37a   :  { %1609 = vmatprep.mubr.bf16.mxu0 %v1504_v59 }
 0x381   :  { %1610 = vmatmul.mubr.bf16.gmra.mrb[60].mxu0 %v1503_v43 }
 0x382   :  { %1617 = vmatprep.mubr.bf16.mxu0 %v1506_v28  ;;  %v6345_v28 = vld [vmem:[#allocation36_spill] sm:$0xff] }
 0x383   :  { %v6346_v58 = vpack.c.bf16 %v6344_v10, %v6345_v28  ;;  %v3213_v10 = vld [vmem:[%s5825_s0 + $0x28] sm:$0xff] }
 0x384   :  { %v1726_v28 = vmul.f32 %v3213_v10, %v5228_v40  ;;  %v3218_v10 = vld [vmem:[%s5825_s0 + $0x50] sm:$0xff] }
 0x389   :  { %1618 = vmatmul.mubr.bf16.gmra.mrb[64].mxu0 %v6337_v1 }
 0x38a   :  { %1625 = vmatprep.mubr.bf16.mxu0 %v1508_v22  ;;  %v6348_v22 = vld [vmem:[#allocation40_spill] sm:$0xff] }
 0x38b   :  { %v6349_v61 = vpack.c.bf16 %v6347_v37, %v6348_v22 }
 0x391   :  { %1626 = vmatmul.mubr.bf16.gmra.mrb[68].mxu0 %v6340_v32  ;;  %v1725_v32 = vmul.f32 %v3212_v44, %v5228_v40 }
 0x392   :  { %1633 = vmatprep.mubr.bf16.mxu0 %v1510_v45  ;;  %v6351_v45 = vld [vmem:[#allocation43_spill] sm:$0xff] }
 0x393   :  { %v6352_v18 = vpack.c.bf16 %v6350_v36, %v6351_v45 }
 0x399   :  { %1634 = vmatmul.mubr.bf16.gmra.mrb[72].mxu0 %v6343_v24 }
 0x39a   :  { %1641 = vmatprep.mubr.bf16.mxu0 %v1512_v9  ;;  %v6354_v9 = vld [vmem:[#allocation45_spill] sm:$0xff] }
 0x39b   :  { %v6355_v50 = vpack.c.bf16 %v6353_v16, %v6354_v9 }
 0x3a1   :  { %1642 = vmatmul.mubr.bf16.gmra.mrb[76].mxu0 %v6346_v58 }
 0x3a2   :  { %1649 = vmatprep.mubr.bf16.mxu0 %v1514_v46  ;;  %v6357_v46 = vld [vmem:[#allocation52_spill] sm:$0xff] }
 0x3a3   :  { %v6358_v26 = vpack.c.bf16 %v6356_v15, %v6357_v46 }
 0x3a9   :  { %1650 = vmatmul.mubr.bf16.gmra.mrb[80].mxu0 %v6349_v61 }
 0x3aa   :  { %1657 = vmatprep.mubr.bf16.mxu0 %v1516_v14 }
 0x3b1   :  { %1658 = vmatmul.mubr.bf16.gmra.mrb[84].mxu0 %v6352_v18 }
 0x3b2   :  { %1665 = vmatprep.mubr.bf16.mxu0 %v1518_v41  ;;  %v5235_v41 = vld [vmem:[%s5831_s6] ss:$0 sm:$0xff] }
 0x3b9   :  { %1666 = vmatmul.mubr.bf16.gmra.mrb[88].mxu0 %v6355_v50 }
 0x3ba   :  { %1673 = vmatprep.mubr.bf16.mxu0 %v1520_v60 }
 0x3c1   :  { %1674 = vmatmul.mubr.bf16.gmra.mrb[92].mxu0 %v6358_v26  ;;  %v3214_v26 = vld [vmem:[%s5825_s0 + $0x30] sm:$0xff] }
 0x41c   :  { %v2799_v3 = vpop.f32.mrb[32].mxu0 }
 0x41d   :  { %v2800_v14 = vpop.f32.mrb[33].mxu0 }
 0x41e   :  { %v5230_v11 = vadd.f32 %v2800_v14, %v2799_v3  ;;  %v2802_v42 = vpop.f32.mrb[34].mxu0  ;;  %v1727_v3 = vmul.f32 %v3214_v26, %v5228_v40 }
 0x41f   :  { %v2803_v55 = vpop.f32.mrb[35].mxu0 }
 0x420   :  { %v1682_v35 = vmax.f32 %v5230_v11, 0.0  ;;  %v5238_v60 = vadd.f32 %v2803_v55, %v2802_v42  ;;  %v3215_v55 = vld [vmem:[%s5825_s0 + $0x38] sm:$0xff] }
 0x421   :  { %v1728_v31 = vmul.f32 %v3215_v55, %v5228_v40 }
 0x422   :  { %v1760_v5 = vmul.f32 %v5235_v41, %v1682_v35  ;;  %v1683_v57 = vmax.f32 %v5238_v60, 0.0  ;;  %v3242_v60 = vld [vmem:[%s5825_s0 + $0x10] sm:$0xff] }
 0x424   :  { %v1761_v0 = vmul.f32 %v5235_v41, %v1683_v57  ;;  %v2805_v6 = vpop.f32.mrb[36].mxu0  ;;  %v1792_v21 = vadd.f32 %v1760_v5, %v1721_v51 }
 0x425   :  { %v2806_v29 = vpop.f32.mrb[37].mxu0 }
 0x426   :  { %v5255_v17 = vadd.f32 %v2806_v29, %v2805_v6  ;;  %v2808_v2 = vpop.f32.mrb[38].mxu0  ;;  %v1824_v33 = vsel %vm200_vm0, %v1792_v21, 0.0  ;;  %v1793_v8 = vadd.f32 %v1761_v0, %v1722_v47 }
 0x427   :  { %v2809_v48 = vpop.f32.mrb[39].mxu0  ;;  %1825 = vadd.xlane.f32.xlu0 %v1824_v33 }
 0x428   :  { %v1684_v49 = vmax.f32 %v5255_v17, 0.0  ;;  %v5259_v38 = vadd.f32 %v2809_v48, %v2808_v2  ;;  %v1827_v25 = vsel %vm200_vm0, %v1793_v8, 0.0 }
 0x429   :  { %1828 = vadd.xlane.f32.xlu1 %v1827_v25  ;;  %v3216_v25 = vld [vmem:[%s5825_s0 + $0x40] sm:$0xff] }
 0x42a   :  { %v1762_v34 = vmul.f32 %v5235_v41, %v1684_v49  ;;  %v1685_v52 = vmax.f32 %v5259_v38, 0.0  ;;  %v1729_v23 = vmul.f32 %v3216_v25, %v5228_v40  ;;  %v3245_v38 = vld [vmem:[%s5825_s0 + $0x28] sm:$0xff] }
 0x42c   :  { %v1763_v19 = vmul.f32 %v5235_v41, %v1685_v52  ;;  %v2811_v59 = vpop.f32.mrb[40].mxu0  ;;  %v1794_v63 = vadd.f32 %v1762_v34, %v1723_v12 }
 0x42d   :  { %v2812_v7 = vpop.f32.mrb[41].mxu0 }
 0x42e   :  { %v5277_v39 = vadd.f32 %v2812_v7, %v2811_v59  ;;  %v2814_v53 = vpop.f32.mrb[42].mxu0  ;;  %v1830_v43 = vsel %vm200_vm0, %v1794_v63, 0.0  ;;  %v1795_v27 = vadd.f32 %v1763_v19, %v1724_v54  ;;  %v1730_v54 = vmul.f32 %v3217_v56, %v5228_v40 }
 0x42f   :  { %v2815_v13 = vpop.f32.mrb[43].mxu0  ;;  %1831 = vadd.xlane.f32.xlu0 %v1830_v43 }
 0x430   :  { %v1686_v1 = vmax.f32 %v5277_v39, 0.0  ;;  %v5281_v4 = vadd.f32 %v2815_v13, %v2814_v53  ;;  %v1833_v24 = vsel %vm200_vm0, %v1795_v27, 0.0 }
 0x432   :  { %v1764_v62 = vmul.f32 %v5235_v41, %v1686_v1  ;;  %v1687_v20 = vmax.f32 %v5281_v4, 0.0 }
 0x433   :  { %1834 = vadd.xlane.f32.xlu0 %v1833_v24 }
 0x434   :  { %v1765_v58 = vmul.f32 %v5235_v41, %v1687_v20  ;;  %v2817_v37 = vpop.f32.mrb[44].mxu0  ;;  %v1796_v22 = vadd.f32 %v1764_v62, %v1725_v32 }
 0x435   :  { %v2818_v61 = vpop.f32.mrb[45].mxu0 }
 0x436   :  { %v5299_v36 = vadd.f32 %v2818_v61, %v2817_v37  ;;  %v2820_v45 = vpop.f32.mrb[46].mxu0  ;;  %v1836_v18 = vsel %vm200_vm0, %v1796_v22, 0.0  ;;  %v1797_v16 = vadd.f32 %v1765_v58, %v1726_v28  ;;  %v1731_v28 = vmul.f32 %v3218_v10, %v5228_v40  ;;  %v3219_v22 = vld [vmem:[%s5825_s0 + $0x58] sm:$0xff] }
 0x437   :  { %v2821_v9 = vpop.f32.mrb[47].mxu0  ;;  %1837 = vadd.xlane.f32.xlu1 %v1836_v18  ;;  %v1732_v61 = vmul.f32 %v3219_v22, %v5228_v40 }
 0x438   :  { %v1688_v50 = vmax.f32 %v5299_v36, 0.0  ;;  %v5303_v15 = vadd.f32 %v2821_v9, %v2820_v45  ;;  %v1839_v46 = vsel %vm200_vm0, %v1797_v16, 0.0 }
 0x439   :  { %1840 = vadd.xlane.f32.xlu0 %v1839_v46 }
 0x43a   :  { %v1766_v14 = vmul.f32 %v5235_v41, %v1688_v50  ;;  %v1689_v42 = vmax.f32 %v5303_v15, 0.0 }
 0x43c   :  { %v1767_v51 = vmul.f32 %v5235_v41, %v1689_v42  ;;  %v2823_v5 = vpop.f32.mrb[48].mxu0  ;;  %v1798_v30 = vadd.f32 %v1766_v14, %v1727_v3 }
 0x43d   :  { %v2824_v47 = vpop.f32.mrb[49].mxu0 }
 0x43e   :  { %v5321_v0 = vadd.f32 %v2824_v47, %v2823_v5  ;;  %v2826_v6 = vpop.f32.mrb[50].mxu0  ;;  %v1842_v21 = vsel %vm200_vm0, %v1798_v30, 0.0  ;;  %v1799_v29 = vadd.f32 %v1767_v51, %v1728_v31  ;;  %v3220_v30 = vld [vmem:[%s5825_s0 + $0x60] sm:$0xff] }
 0x43f   :  { %v2827_v2 = vpop.f32.mrb[51].mxu0  ;;  %1843 = vadd.xlane.f32.xlu1 %v1842_v21  ;;  %v1733_v47 = vmul.f32 %v3220_v30, %v5228_v40 }
 0x440   :  { %v1690_v33 = vmax.f32 %v5321_v0, 0.0  ;;  %v5325_v8 = vadd.f32 %v2827_v2, %v2826_v6  ;;  %v1845_v48 = vsel %vm200_vm0, %v1799_v29, 0.0  ;;  %v3221_v29 = vld [vmem:[%s5825_s0 + $0x68] sm:$0xff] }
 0x441   :  { %1846 = vadd.xlane.f32.xlu0 %v1845_v48  ;;  %v1734_v2 = vmul.f32 %v3221_v29, %v5228_v40  ;;  %v3297_v29 = vmov 0  }
 0x442   :  { %v1768_v12 = vmul.f32 %v5235_v41, %v1690_v33  ;;  %v1691_v34 = vmax.f32 %v5325_v8, 0.0  ;;  %2944 = vset.pattern.permute.xlu1 %v3297_v29  ;;  %2945 = vset.pattern.permute.xlu0 %v3297_v29  ;;  %v3253_v8 = vld [vmem:[%s5825_s0 + $0x70] sm:$0xff] }
 0x444   :  { %v1769_v19 = vmul.f32 %v5235_v41, %v1691_v34  ;;  %v2829_v59 = vpop.f32.mrb[52].mxu0  ;;  %v1800_v63 = vadd.f32 %v1768_v12, %v1729_v23 }
 0x445   :  { %v2830_v7 = vpop.f32.mrb[53].mxu0 }
 0x446   :  { %v5343_v53 = vadd.f32 %v2830_v7, %v2829_v59  ;;  %v2832_v43 = vpop.f32.mrb[54].mxu0  ;;  %v1848_v27 = vsel %vm200_vm0, %v1800_v63, 0.0  ;;  %v1801_v13 = vadd.f32 %v1769_v19, %v1730_v54 }
 0x447   :  { %v2833_v44 = vpop.f32.mrb[55].mxu0  ;;  %1849 = vadd.xlane.f32.xlu1 %v1848_v27 }
 0x448   :  { %v1692_v32 = vmax.f32 %v5343_v53, 0.0  ;;  %v5347_v62 = vadd.f32 %v2833_v44, %v2832_v43  ;;  %v1851_v24 = vsel %vm200_vm0, %v1801_v13, 0.0  ;;  %v3222_v13 = vld [vmem:[%s5825_s0 + $0x70] sm:$0xff]  ;;  %v3251_v53 = vld [vmem:[%s5825_s0 + $0x60] sm:$0xff] }
 0x449   :  { %1852 = vadd.xlane.f32.xlu0 %v1851_v24  ;;  %v1735_v44 = vmul.f32 %v3222_v13, %v5228_v40 }
 0x44a   :  { %v1770_v58 = vmul.f32 %v5235_v41, %v1692_v32  ;;  %v6037_v37 = vmax.f32 %v5347_v62, 0.0 }
 0x44c   :  { %v1771_v45 = vmul.f32 %v5235_v41, %v6037_v37  ;;  %v2835_v18 = vpop.f32.mrb[56].mxu0  ;;  %v1802_v16 = vadd.f32 %v1770_v58, %v1731_v28  ;;  %v3223_v28 = vld [vmem:[%s5825_s0 + $0x78] sm:$0xff] }
 0x44d   :  { %v2836_v9 = vpop.f32.mrb[57].mxu0  ;;  %v1736_v58 = vmul.f32 %v3223_v28, %v5228_v40 }
 0x44e   :  { %v5365_v46 = vadd.f32 %v2836_v9, %v2835_v18  ;;  %v2838_v26 = vpop.f32.mrb[58].mxu0  ;;  %v1854_v3 = vsel %vm200_vm0, %v1802_v16, 0.0  ;;  %v1803_v14 = vadd.f32 %v1771_v45, %v1732_v61 }
 0x44f   :  { %v2839_v55 = vpop.f32.mrb[59].mxu0  ;;  %1855 = vadd.xlane.f32.xlu1 %v1854_v3 }
 0x450   :  { %v1694_v31 = vmax.f32 %v5365_v46, 0.0  ;;  %v5369_v51 = vadd.f32 %v2839_v55, %v2838_v26  ;;  %v1857_v5 = vsel %vm200_vm0, %v1803_v14, 0.0  ;;  %v3224_v55 = vld [vmem:[%s5825_s0 + $0x80] sm:$0xff]  ;;  %v6359_v46 = vmax.f32 %v5347_v62, 0.0 }
 0x451   :  { %1858 = vadd.xlane.f32.xlu0 %v1857_v5  ;;  %v1737_v5 = vmul.f32 %v3224_v55, %v5228_v40  ;;  %v3255_v62 = vld [vmem:[%s5825_s0 + $0x80] sm:$0xff] }
 0x452   :  { %v1772_v6 = vmul.f32 %v5235_v41, %v1694_v31  ;;  %v6035_v21 = vmax.f32 %v5369_v51, 0.0 }
 0x454   :  { %v1773_v48 = vmul.f32 %v5235_v41, %v6035_v21  ;;  %v2841_v25 = vpop.f32.mrb[60].mxu0  ;;  %v1804_v23 = vadd.f32 %v1772_v6, %v1733_v47 }
 0x455   :  { %v2842_v12 = vpop.f32.mrb[61].mxu0 }
 0x456   :  { %v5387_v56 = vadd.f32 %v2842_v12, %v2841_v25  ;;  %v2844_v54 = vpop.f32.mrb[62].mxu0  ;;  %v1860_v19 = vsel %vm200_vm0, %v1804_v23, 0.0  ;;  %v1805_v59 = vadd.f32 %v1773_v48, %v1734_v2  ;;  %v3225_v25 = vld [vmem:[%s5825_s0 + $0x88] sm:$0xff] }
 0x457   :  { %v2845_v63 = vpop.f32.mrb[63].mxu0  ;;  %1861 = vadd.xlane.f32.xlu1 %v1860_v19  ;;  %v1738_v23 = vmul.f32 %v3225_v25, %v5228_v40 }
 0x458   :  { %v6036_v7 = vmax.f32 %v5387_v56, 0.0  ;;  %v5391_v43 = vadd.f32 %v2845_v63, %v2844_v54  ;;  %v1863_v27 = vsel %vm200_vm0, %v1805_v59, 0.0 }
 0x459   :  { %1864 = vadd.xlane.f32.xlu0 %v1863_v27 }
 0x45a   :  { %v1774_v24 = vmul.f32 %v5235_v41, %v6036_v7  ;;  %v6030_v10 = vmax.f32 %v5391_v43, 0.0 }
 0x45c   :  { %v1775_v22 = vmul.f32 %v5235_v41, %v6030_v10  ;;  %v2847_v61 = vpop.f32.mrb[64].mxu0  ;;  %v1806_v45 = vadd.f32 %v1774_v24, %v1735_v44 }
 0x45d   :  { %v2848_v18 = vpop.f32.mrb[65].mxu0 }
 0x45e   :  { %v5409_v16 = vadd.f32 %v2848_v18, %v2847_v61  ;;  %v2850_v9 = vpop.f32.mrb[66].mxu0  ;;  %v1866_v26 = vsel %vm200_vm0, %v1806_v45, 0.0  ;;  %v1807_v3 = vadd.f32 %v1775_v22, %v1736_v58  ;;  %v3226_v61 = vld [vmem:[%s5825_s0 + $0x90] sm:$0xff] }
 0x45f   :  { %v2851_v14 = vpop.f32.mrb[67].mxu0  ;;  %1867 = vadd.xlane.f32.xlu1 %v1866_v26  ;;  %v1739_v45 = vmul.f32 %v3226_v61, %v5228_v40  ;;  %v3227_v26 = vld [vmem:[%s5825_s0 + $0x98] sm:$0xff] }
 0x460   :  { %v6033_v30 = vmax.f32 %v5409_v16, 0.0  ;;  %v5417_v47 = vadd.f32 %v2851_v14, %v2850_v9  ;;  %v1869_v6 = vsel %vm200_vm0, %v1807_v3, 0.0  ;;  %v1740_v3 = vmul.f32 %v3227_v26, %v5228_v40 }
 0x461   :  { %1870 = vadd.xlane.f32.xlu0 %v1869_v6 }
 0x462   :  { %v1776_v2 = vmul.f32 %v5235_v41, %v6033_v30  ;;  %v6026_v48 = vmax.f32 %v5417_v47, 0.0 }
 0x464   :  { %v1777_v12 = vmul.f32 %v5235_v41, %v6026_v48  ;;  %v2853_v54 = vpop.f32.mrb[68].mxu0  ;;  %v1808_v19 = vadd.f32 %v1776_v2, %v1737_v5 }
 0x465   :  { %v2854_v59 = vpop.f32.mrb[69].mxu0 }
 0x466   :  { %v5431_v63 = vadd.f32 %v2854_v59, %v2853_v54  ;;  %v2856_v27 = vpop.f32.mrb[70].mxu0  ;;  %v1872_v13 = vsel %vm200_vm0, %v1808_v19, 0.0  ;;  %v1809_v44 = vadd.f32 %v1777_v12, %v1738_v23 }
 0x467   :  { %v2857_v24 = vpop.f32.mrb[71].mxu0  ;;  %1873 = vadd.xlane.f32.xlu1 %v1872_v13 }
 0x468   :  { %v6029_v28 = vmax.f32 %v5431_v63, 0.0  ;;  %v5435_v58 = vadd.f32 %v2857_v24, %v2856_v27  ;;  %v1875_v22 = vsel %vm200_vm0, %v1809_v44, 0.0  ;;  %v3228_v27 = vld [vmem:[%s5825_s0 + $0xa0] sm:$0xff] }
 0x469   :  { %1876 = vadd.xlane.f32.xlu0 %v1875_v22  ;;  %v1741_v13 = vmul.f32 %v3228_v27, %v5228_v40  ;;  %v3229_v22 = vld [vmem:[%s5825_s0 + $0xa8] sm:$0xff] }
 0x46a   :  { %v1778_v18 = vmul.f32 %v5235_v41, %v6029_v28  ;;  %v6022_v9 = vmax.f32 %v5435_v58, 0.0  ;;  %v1742_v61 = vmul.f32 %v3229_v22, %v5228_v40  ;;  %v3231_v22 = vld [vmem:[%s5825_s0 + $0xb8] sm:$0xff] }
 0x46c   :  { %v1779_v14 = vmul.f32 %v5235_v41, %v6022_v9  ;;  %v2859_v55 = vpop.f32.mrb[72].mxu0  ;;  %v1810_v5 = vadd.f32 %v1778_v18, %v1739_v45 }
 0x46d   :  { %v2860_v6 = vpop.f32.mrb[73].mxu0 }
 0x46e   :  { %v5453_v29 = vadd.f32 %v2860_v6, %v2859_v55  ;;  %v2862_v2 = vpop.f32.mrb[74].mxu0  ;;  %v1878_v25 = vsel %vm200_vm0, %v1810_v5, 0.0  ;;  %v1811_v23 = vadd.f32 %v1779_v14, %v1740_v3 }
 0x46f   :  { %v2863_v12 = vpop.f32.mrb[75].mxu0  ;;  %1879 = vadd.xlane.f32.xlu1 %v1878_v25 }
 0x470   :  { %v6025_v54 = vmax.f32 %v5453_v29, 0.0  ;;  %v5457_v19 = vadd.f32 %v2863_v12, %v2862_v2  ;;  %v1881_v59 = vsel %vm200_vm0, %v1811_v23, 0.0 }
 0x471   :  { %1882 = vadd.xlane.f32.xlu0 %v1881_v59  ;;  %v3230_v59 = vld [vmem:[%s5825_s0 + $0xb0] sm:$0xff] }
 0x472   :  { %v1780_v44 = vmul.f32 %v5235_v41, %v6025_v54  ;;  %v6018_v24 = vmax.f32 %v5457_v19, 0.0  ;;  %v1743_v27 = vmul.f32 %v3230_v59, %v5228_v40 }
 0x474   :  { %v1781_v45 = vmul.f32 %v5235_v41, %v6018_v24  ;;  %v2865_v18 = vpop.f32.mrb[76].mxu0  ;;  %v1812_v26 = vadd.f32 %v1780_v44, %v1741_v13 }
 0x475   :  { %v2866_v3 = vpop.f32.mrb[77].mxu0 }
 0x476   :  { %v5475_v14 = vadd.f32 %v2866_v3, %v2865_v18  ;;  %v2868_v55 = vpop.f32.mrb[78].mxu0  ;;  %v1884_v5 = vsel %vm200_vm0, %v1812_v26, 0.0  ;;  %v1813_v6 = vadd.f32 %v1781_v45, %v1742_v61  ;;  %v1744_v61 = vmul.f32 %v3231_v22, %v5228_v40 }
 0x477   :  { %v2869_v2 = vpop.f32.mrb[79].mxu0  ;;  %1885 = vadd.xlane.f32.xlu1 %v1884_v5 }
 0x478   :  { %v6021_v25 = vmax.f32 %v5475_v14, 0.0  ;;  %v5479_v23 = vadd.f32 %v2869_v2, %v2868_v55  ;;  %v1887_v12 = vsel %vm200_vm0, %v1813_v6, 0.0 }
 0x479   :  { %1888 = vadd.xlane.f32.xlu0 %v1887_v12 }
 0x47a   :  { %v1782_v13 = vmul.f32 %v5235_v41, %v6021_v25  ;;  %v6019_v44 = vmax.f32 %v5479_v23, 0.0 }
 0x47c   :  { %v1783_v45 = vmul.f32 %v5235_v41, %v6019_v44  ;;  %v2871_v18 = vpop.f32.mrb[80].mxu0  ;;  %v1814_v26 = vadd.f32 %v1782_v13, %v1743_v27  ;;  %v3232_v44 = vld [vmem:[%s5825_s0 + $0xc0] sm:$0xff] }
 0x47d   :  { %v2872_v3 = vpop.f32.mrb[81].mxu0  ;;  %v1745_v27 = vmul.f32 %v3232_v44, %v5228_v40 }
 0x47e   :  { %v5497_v55 = vadd.f32 %v2872_v3, %v2871_v18  ;;  %v2874_v5 = vpop.f32.mrb[82].mxu0  ;;  %v1890_v6 = vsel %vm200_vm0, %v1814_v26, 0.0  ;;  %v1815_v2 = vadd.f32 %v1783_v45, %v1744_v61  ;;  %v3233_v45 = vld [vmem:[%s5825_s0 + $0xc8] sm:$0xff] }
 0x47f   :  { %v2875_v12 = vpop.f32.mrb[83].mxu0  ;;  %1891 = vadd.xlane.f32.xlu1 %v1890_v6  ;;  %v1746_v18 = vmul.f32 %v3233_v45, %v5228_v40 }
 0x480   :  { %v6020_v59 = vmax.f32 %v5497_v55, 0.0  ;;  %v5501_v24 = vadd.f32 %v2875_v12, %v2874_v5  ;;  %v1893_v22 = vsel %vm200_vm0, %v1815_v2, 0.0 }
 0x481   :  { %1894 = vadd.xlane.f32.xlu0 %v1893_v22 }
 0x482   :  { %v1784_v13 = vmul.f32 %v5235_v41, %v6020_v59  ;;  %v6023_v61 = vmax.f32 %v5501_v24, 0.0 }
 0x484   :  { %v1785_v26 = vmul.f32 %v5235_v41, %v6023_v61  ;;  %v2877_v3 = vpop.f32.mrb[84].mxu0  ;;  %v1816_v5 = vadd.f32 %v1784_v13, %v1745_v27  ;;  %v3234_v61 = vld [vmem:[%s5825_s0 + $0xd0] sm:$0xff] }
 0x485   :  { %v2878_v44 = vpop.f32.mrb[85].mxu0  ;;  %v1747_v27 = vmul.f32 %v3234_v61, %v5228_v40 }
 0x486   :  { %v5519_v6 = vadd.f32 %v2878_v44, %v2877_v3  ;;  %v2880_v2 = vpop.f32.mrb[86].mxu0  ;;  %v1896_v12 = vsel %vm200_vm0, %v1816_v5, 0.0  ;;  %v1817_v22 = vadd.f32 %v1785_v26, %v1746_v18 }
 0x487   :  { %v2881_v59 = vpop.f32.mrb[87].mxu0  ;;  %1897 = vadd.xlane.f32.xlu1 %v1896_v12 }
 0x488   :  { %v6024_v25 = vmax.f32 %v5519_v6, 0.0  ;;  %v5523_v9 = vadd.f32 %v2881_v59, %v2880_v2  ;;  %v1899_v45 = vsel %vm200_vm0, %v1817_v22, 0.0  ;;  %v3235_v59 = vld [vmem:[%s5825_s0 + $0xd8] sm:$0xff] }
 0x489   :  { %1900 = vadd.xlane.f32.xlu0 %v1899_v45  ;;  %v1748_v26 = vmul.f32 %v3235_v59, %v5228_v40 }
 0x48a   :  { %v1786_v13 = vmul.f32 %v5235_v41, %v6024_v25  ;;  %v6027_v18 = vmax.f32 %v5523_v9, 0.0 }
 0x48c   :  { %v1787_v3 = vmul.f32 %v5235_v41, %v6027_v18  ;;  %v2883_v5 = vpop.f32.mrb[88].mxu0  ;;  %v1818_v44 = vadd.f32 %v1786_v13, %v1747_v27  ;;  %v3236_v18 = vld [vmem:[%s5825_s0 + $0xe0] sm:$0xff] }
 0x48d   :  { %v2884_v61 = vpop.f32.mrb[89].mxu0  ;;  %v1749_v27 = vmul.f32 %v3236_v18, %v5228_v40 }
 0x48e   :  { %v5541_v2 = vadd.f32 %v2884_v61, %v2883_v5  ;;  %v2886_v12 = vpop.f32.mrb[90].mxu0  ;;  %v1902_v22 = vsel %vm200_vm0, %v1818_v44, 0.0  ;;  %v1819_v45 = vadd.f32 %v1787_v3, %v1748_v26 }
 0x48f   :  { %v2887_v25 = vpop.f32.mrb[91].mxu0  ;;  %1903 = vadd.xlane.f32.xlu1 %v1902_v22 }
 0x490   :  { %v6028_v54 = vmax.f32 %v5541_v2, 0.0  ;;  %v5545_v48 = vadd.f32 %v2887_v25, %v2886_v12  ;;  %v1905_v59 = vsel %vm200_vm0, %v1819_v45, 0.0  ;;  %v3237_v25 = vld [vmem:[%s5825_s0 + $0xe8] sm:$0xff] }
 0x491   :  { %1906 = vadd.xlane.f32.xlu0 %v1905_v59  ;;  %v1750_v3 = vmul.f32 %v3237_v25, %v5228_v40 }
 0x492   :  { %v1788_v13 = vmul.f32 %v5235_v41, %v6028_v54  ;;  %v6031_v26 = vmax.f32 %v5545_v48, 0.0 }
 0x494   :  { %v1789_v5 = vmul.f32 %v5235_v41, %v6031_v26  ;;  %v2889_v44 = vpop.f32.mrb[92].mxu0  ;;  %v1820_v61 = vadd.f32 %v1788_v13, %v1749_v27  ;;  %v3238_v26 = vld [vmem:[%s5825_s0 + $0xf0] sm:$0xff] }
 0x495   :  { %v2890_v18 = vpop.f32.mrb[93].mxu0  ;;  %v1751_v27 = vmul.f32 %v3238_v26, %v5228_v40 }
 0x496   :  { %v5563_v12 = vadd.f32 %v2890_v18, %v2889_v44  ;;  %v2892_v22 = vpop.f32.mrb[94].mxu0  ;;  %v1908_v45 = vsel %vm200_vm0, %v1820_v61, 0.0  ;;  %v1821_v59 = vadd.f32 %v1789_v5, %v1750_v3 }
 0x497   :  { %v2893_v54 = vpop.f32.mrb[95].mxu0  ;;  %1909 = vadd.xlane.f32.xlu1 %v1908_v45  ;;  %v5587_v45 = vld [vmem:[#allocation2] ss:$0 sm:$0xff] }
 0x498   :  { %v6032_v28 = vmax.f32 %v5563_v12, 0.0  ;;  %v5567_v10 = vadd.f32 %v2893_v54, %v2892_v22  ;;  %v1911_v25 = vsel %vm200_vm0, %v1821_v59, 0.0  ;;  %v3239_v54 = vld [vmem:[%s5825_s0 + $0xf8] sm:$0xff] }
 0x499   :  { %1912 = vadd.xlane.f32.xlu0 %v1911_v25  ;;  %v1752_v5 = vmul.f32 %v3239_v54, %v5228_v40 }
 0x49a   :  { %v1790_v13 = vmul.f32 %v5235_v41, %v6032_v28  ;;  %v6034_v3 = vmax.f32 %v5567_v10, 0.0 }
 0x49c   :  { %v1791_v44 = vmul.f32 %v5235_v41, %v6034_v3  ;;  %v1822_v61 = vadd.f32 %v1790_v13, %v1751_v27 }
 0x49e   :  { %v1914_v26 = vsel %vm200_vm0, %v1822_v61, 0.0  ;;  %v1823_v18 = vadd.f32 %v1791_v44, %v1752_v5 }
 0x49f   :  { %1915 = vadd.xlane.f32.xlu1 %v1914_v26 }
 0x4a0   :  { %v1917_v22 = vsel %vm200_vm0, %v1823_v18, 0.0 }
 0x4a1   :  { %1918 = vadd.xlane.f32.xlu0 %v1917_v22 }
 0x4b4   :  { %v1826_v59 = vpop.xlane.xlu0 %1825 }
 0x4b5   :  { %v1927_v25 = vadd.f32 %v5587_v45, %v1826_v59 }
 0x4b6   :  { %v1829_v28 = vpop.xlane.xlu1 %1828 }
 0x4b7   :  { %v2685_v30 = vmul.f32 -1.442695, %v1927_v25  ;;  %v1928_v40 = vadd.f32 %v5587_v45, %v1829_v28 }
 0x4b9   :  { %3080 = vpow2.f32 %v2685_v30  ;;  %v2686_v54 = vmul.f32 -1.442695, %v1928_v40 }
 0x4bb   :  { %3082 = vpow2.f32 %v2686_v54 }
 0x4bc   :  { %v1832_v41 = vpop.xlane.xlu0 %1831 }
 0x4bd   :  { %v1929_v27 = vadd.f32 %v5587_v45, %v1832_v41 }
 0x4bf   :  { %v2687_v13 = vmul.f32 -1.442695, %v1929_v27 }
 0x4c0   :  { %v1835_v5 = vpop.xlane.xlu0 %1834 }
 0x4c1   :  { %3084 = vpow2.f32 %v2687_v13  ;;  %v1930_v44 = vadd.f32 %v5587_v45, %v1835_v5 }
 0x4c3   :  { %v3081_v61 = vpop.eup %3080  ;;  %v2688_v26 = vmul.f32 -1.442695, %v1930_v44 }
 0x4c4   :  { %v2055_v18 = vadd.f32 1.0, %v3081_v61  ;;  %v1838_v22 = vpop.xlane.xlu1 %1837 }
 0x4c5   :  { %v3083_v59 = vpop.eup %3082  ;;  %3086 = vpow2.f32 %v2688_v26  ;;  %v1931_v25 = vadd.f32 %v5587_v45, %v1838_v22 }
 0x4c6   :  { %3088 = vrcp.f32 %v2055_v18  ;;  %v2056_v30 = vadd.f32 1.0, %v3083_v59  ;;  %v1841_v28 = vpop.xlane.xlu0 %1840 }
 0x4c7   :  { %v2689_v40 = vmul.f32 -1.442695, %v1931_v25  ;;  %v1932_v54 = vadd.f32 %v5587_v45, %v1841_v28 }
 0x4c8   :  { %3090 = vrcp.f32 %v2056_v30 }
 0x4c9   :  { %3092 = vpow2.f32 %v2689_v40  ;;  %v2690_v41 = vmul.f32 -1.442695, %v1932_v54 }
 0x4cb   :  { %v3085_v27 = vpop.eup %3084  ;;  %3094 = vpow2.f32 %v2690_v41 }
 0x4cc   :  { %v2057_v13 = vadd.f32 1.0, %v3085_v27  ;;  %v1844_v5 = vpop.xlane.xlu1 %1843 }
 0x4cd   :  { %v1933_v44 = vadd.f32 %v5587_v45, %v1844_v5 }
 0x4ce   :  { %3096 = vrcp.f32 %v2057_v13  ;;  %v1847_v61 = vpop.xlane.xlu0 %1846 }
 0x4cf   :  { %v3087_v26 = vpop.eup %3086  ;;  %v2691_v3 = vmul.f32 -1.442695, %v1933_v44  ;;  %v1934_v59 = vadd.f32 %v5587_v45, %v1847_v61 }
 0x4d0   :  { %v3089_v22 = vpop.eup %3088  ;;  %v2058_v18 = vadd.f32 1.0, %v3087_v26 }
 0x4d1   :  { %3098 = vpow2.f32 %v2691_v3  ;;  %2153 = vperm.xlu1 %2944, %v3089_v22   ;;  %v2692_v54 = vmul.f32 -1.442695, %v1934_v59  ;;  %v2343_v13 = vsub.f32 1.0, %v3089_v22 }
 0x4d2   :  { %v3091_v25 = vpop.eup %3090  ;;  %3100 = vrcp.f32 %v2058_v18 }
 0x4d3   :  { %v3093_v30 = vpop.eup %3092  ;;  %2158 = vperm.xlu0 %2945, %v3091_v25   ;;  %v2344_v28 = vsub.f32 1.0, %v3091_v25 }
 0x4d4   :  { %v2059_v40 = vadd.f32 1.0, %v3093_v30  ;;  %v1850_v41 = vpop.xlane.xlu1 %1849 }
 0x4d5   :  { %v1935_v27 = vadd.f32 %v5587_v45, %v1850_v41  ;;  %2382 = vperm.xlu1 %2944, %v2344_v28   ;;  %v3095_v5 = vpop.eup %3094 }
 0x4d6   :  { %3102 = vrcp.f32 %v2059_v40  ;;  %v2060_v3 = vadd.f32 1.0, %v3095_v5  ;;  %v1853_v61 = vpop.xlane.xlu0 %1852 }
 0x4d7   :  { %v2693_v44 = vmul.f32 -1.442695, %v1935_v27  ;;  %2377 = vperm.xlu0 %2945, %v2343_v13   ;;  %3104 = vpow2.f32 %v2692_v54  ;;  %v1936_v30 = vadd.f32 %v5587_v45, %v1853_v61 }
 0x4d8   :  { %v3097_v26 = vpop.eup %3096 }
 0x4d9   :  { %3106 = vpow2.f32 %v2693_v44  ;;  %2163 = vperm.xlu1 %2944, %v3097_v26   ;;  %v2345_v18 = vsub.f32 1.0, %v3097_v26  ;;  %v2694_v27 = vmul.f32 -1.442695, %v1936_v30 }
 0x4da   :  { %3108 = vrcp.f32 %v2060_v3 }
 0x4db   :  { %v3099_v21 = vpop.eup %3098  ;;  %2387 = vperm.xlu0 %2945, %v2345_v18  }
 0x4dc   :  { %v3101_v25 = vpop.eup %3100  ;;  %v2061_v59 = vadd.f32 1.0, %v3099_v21  ;;  %v1856_v41 = vpop.xlane.xlu1 %1855 }
 0x4dd   :  { %v1937_v22 = vadd.f32 %v5587_v45, %v1856_v41  ;;  %2168 = vperm.xlu1 %2944, %v3101_v25   ;;  %v2346_v40 = vsub.f32 1.0, %v3101_v25 }
 0x4de   :  { %3110 = vrcp.f32 %v2061_v59  ;;  %v1859_v13 = vpop.xlane.xlu0 %1858 }
 0x4df   :  { %v2695_v28 = vmul.f32 -1.442695, %v1937_v22  ;;  %v1938_v61 = vadd.f32 %v5587_v45, %v1859_v13 }
 0x4e0   :  { %v3103_v54 = vpop.eup %3102 }
 0x4e1   :  { %3112 = vpow2.f32 %v2695_v28  ;;  %2392 = vperm.xlu1 %2944, %v2346_v40   ;;  %v2347_v5 = vsub.f32 1.0, %v3103_v54  ;;  %v3105_v44 = vpop.eup %3104  ;;  %v2696_v22 = vmul.f32 -1.442695, %v1938_v61 }
 0x4e2   :  { %3114 = vpow2.f32 %v2694_v27  ;;  %v2062_v59 = vadd.f32 1.0, %v3105_v44 }
 0x4e3   :  { %v3107_v26 = vpop.eup %3106  ;;  %2397 = vperm.xlu0 %2945, %v2347_v5  }
 0x4e4   :  { %v2063_v21 = vadd.f32 1.0, %v3107_v26  ;;  %v1862_v3 = vpop.xlane.xlu1 %1861  ;;  %v3109_v25 = vpop.eup %3108 }
 0x4e5   :  { %v1939_v18 = vadd.f32 %v5587_v45, %v1862_v3  ;;  %2173 = vperm.xlu1 %2944, %v3103_v54   ;;  %v2348_v27 = vsub.f32 1.0, %v3109_v25 }
 0x4e6   :  { %3116 = vrcp.f32 %v2063_v21  ;;  %v1865_v28 = vpop.xlane.xlu0 %1864 }
 0x4e7   :  { %v2697_v41 = vmul.f32 -1.442695, %v1939_v18  ;;  %v1940_v13 = vadd.f32 %v5587_v45, %v1865_v28 }
 0x4e8   :  { %v3111_v30 = vpop.eup %3110 }
 0x4e9   :  { %3118 = vpow2.f32 %v2697_v41  ;;  %2178 = vperm.xlu1 %2944, %v3109_v25   ;;  %v2349_v40 = vsub.f32 1.0, %v3111_v30  ;;  %v2698_v18 = vmul.f32 -1.442695, %v1940_v13 }
 0x4ea   :  { %3120 = vrcp.f32 %v2062_v59 }
 0x4eb   :  { %v3113_v5 = vpop.eup %3112  ;;  %2407 = vperm.xlu0 %2945, %v2349_v40   ;;  %3122 = vpow2.f32 %v2696_v22 }
 0x4ec   :  { %v2065_v26 = vadd.f32 1.0, %v3113_v5  ;;  %v1868_v3 = vpop.xlane.xlu1 %1867  ;;  %v3115_v44 = vpop.eup %3114 }
 0x4ed   :  { %v1941_v54 = vadd.f32 %v5587_v45, %v1868_v3  ;;  %2402 = vperm.xlu1 %2944, %v2348_v27   ;;  %v2064_v41 = vadd.f32 1.0, %v3115_v44 }
 0x4ee   :  { %3124 = vrcp.f32 %v2065_v26  ;;  %v1871_v7 = vpop.xlane.xlu0 %1870 }
 0x4ef   :  { %v2699_v21 = vmul.f32 -1.442695, %v1941_v54  ;;  %v1942_v28 = vadd.f32 %v5587_v45, %v1871_v7 }
 0x4f0   :  { %v3117_v61 = vpop.eup %3116 }
 0x4f1   :  { %3126 = vpow2.f32 %v2699_v21  ;;  %2183 = vperm.xlu1 %2944, %v3111_v30   ;;  %v2351_v59 = vsub.f32 1.0, %v3117_v61  ;;  %v2700_v44 = vmul.f32 -1.442695, %v1942_v28 }
 0x4f2   :  { %3128 = vpow2.f32 %v2698_v18 }
 0x4f3   :  { %v3119_v40 = vpop.eup %3118  ;;  %2417 = vperm.xlu0 %2945, %v2351_v59   ;;  %3130 = vrcp.f32 %v2064_v41 }
 0x4f4   :  { %v3121_v25 = vpop.eup %3120  ;;  %v2067_v22 = vadd.f32 1.0, %v3119_v40  ;;  %v1874_v5 = vpop.xlane.xlu1 %1873 }
 0x4f5   :  { %v1943_v27 = vadd.f32 %v5587_v45, %v1874_v5  ;;  %2188 = vperm.xlu1 %2944, %v3121_v25   ;;  %v3123_v26 = vpop.eup %3122  ;;  %v2350_v3 = vsub.f32 1.0, %v3121_v25 }
 0x4f6   :  { %3132 = vrcp.f32 %v2067_v22  ;;  %v2066_v30 = vadd.f32 1.0, %v3123_v26  ;;  %v1877_v21 = vpop.xlane.xlu0 %1876 }
 0x4f7   :  { %v2701_v13 = vmul.f32 -1.442695, %v1943_v27  ;;  %v1944_v7 = vadd.f32 %v5587_v45, %v1877_v21 }
 0x4f8   :  { %v3125_v54 = vpop.eup %3124 }
 0x4f9   :  { %3134 = vpow2.f32 %v2701_v13  ;;  %2203 = vperm.xlu0 %2945, %v3125_v54   ;;  %2412 = vperm.xlu1 %2944, %v2350_v3   ;;  %v2353_v18 = vsub.f32 1.0, %v3125_v54  ;;  %v2702_v26 = vmul.f32 -1.442695, %v1944_v7 }
 0x4fa   :  { %3136 = vpow2.f32 %v2700_v44 }
 0x4fb   :  { %v3127_v59 = vpop.eup %3126  ;;  %3138 = vrcp.f32 %v2066_v30 }
 0x4fc   :  { %v2069_v40 = vadd.f32 1.0, %v3127_v59  ;;  %v1880_v41 = vpop.xlane.xlu1 %1879  ;;  %v3129_v25 = vpop.eup %3128 }
 0x4fd   :  { %v1945_v5 = vadd.f32 %v5587_v45, %v1880_v41  ;;  %2427 = vperm.xlu0 %2945, %v2353_v18   ;;  %2193 = vperm.xlu1 %2944, %v3117_v61   ;;  %v3131_v22 = vpop.eup %3130  ;;  %v2068_v13 = vadd.f32 1.0, %v3129_v25 }
 0x4fe   :  { %3140 = vrcp.f32 %v2069_v40  ;;  %v1883_v3 = vpop.xlane.xlu0 %1882  ;;  %v2352_v21 = vsub.f32 1.0, %v3131_v22 }
 0x4ff   :  { %v2703_v28 = vmul.f32 -1.442695, %v1945_v5  ;;  %v1946_v30 = vadd.f32 %v5587_v45, %v1883_v3 }
 0x500   :  { %v3133_v27 = vpop.eup %3132 }
 0x501   :  { %3142 = vpow2.f32 %v2703_v28  ;;  %2213 = vperm.xlu0 %2945, %v3133_v27   ;;  %2198 = vperm.xlu1 %2944, %v3131_v22   ;;  %v2355_v44 = vsub.f32 1.0, %v3133_v27  ;;  %v2704_v25 = vmul.f32 -1.442695, %v1946_v30 }
 0x502   :  { %3144 = vpow2.f32 %v2702_v26 }
 0x503   :  { %v3135_v54 = vpop.eup %3134  ;;  %3146 = vrcp.f32 %v2068_v13 }
 0x504   :  { %v2071_v59 = vadd.f32 1.0, %v3135_v54  ;;  %v1886_v18 = vpop.xlane.xlu1 %1885  ;;  %v3137_v40 = vpop.eup %3136 }
 0x505   :  { %v1947_v61 = vadd.f32 %v5587_v45, %v1886_v18  ;;  %2437 = vperm.xlu0 %2945, %v2355_v44   ;;  %2422 = vperm.xlu1 %2944, %v2352_v21   ;;  %v3139_v7 = vpop.eup %3138  ;;  %v2070_v28 = vadd.f32 1.0, %v3137_v40 }
 0x506   :  { %3148 = vrcp.f32 %v2071_v59  ;;  %v1889_v27 = vpop.xlane.xlu0 %1888  ;;  %v2354_v3 = vsub.f32 1.0, %v3139_v7 }
 0x507   :  { %v2705_v41 = vmul.f32 -1.442695, %v1947_v61  ;;  %v1948_v13 = vadd.f32 %v5587_v45, %v1889_v27 }
 0x508   :  { %v3141_v5 = vpop.eup %3140 }
 0x509   :  { %3150 = vpow2.f32 %v2705_v41  ;;  %2223 = vperm.xlu0 %2945, %v3141_v5   ;;  %2208 = vperm.xlu1 %2944, %v3139_v7   ;;  %v2357_v26 = vsub.f32 1.0, %v3141_v5  ;;  %v2706_v40 = vmul.f32 -1.442695, %v1948_v13 }
 0x50a   :  { %3152 = vpow2.f32 %v2704_v25 }
 0x50b   :  { %v3143_v22 = vpop.eup %3142  ;;  %3154 = vrcp.f32 %v2070_v28 }
 0x50c   :  { %v2073_v54 = vadd.f32 1.0, %v3143_v22  ;;  %v1892_v44 = vpop.xlane.xlu1 %1891  ;;  %v3145_v59 = vpop.eup %3144 }
 0x50d   :  { %v1949_v21 = vadd.f32 %v5587_v45, %v1892_v44  ;;  %2447 = vperm.xlu0 %2945, %v2357_v26   ;;  %2432 = vperm.xlu1 %2944, %v2354_v3   ;;  %v3147_v30 = vpop.eup %3146  ;;  %v2072_v41 = vadd.f32 1.0, %v3145_v59 }
 0x50e   :  { %3156 = vrcp.f32 %v2073_v54  ;;  %v1895_v5 = vpop.xlane.xlu0 %1894  ;;  %v2356_v27 = vsub.f32 1.0, %v3147_v30 }
 0x50f   :  { %v2707_v18 = vmul.f32 -1.442695, %v1949_v21  ;;  %v1950_v28 = vadd.f32 %v5587_v45, %v1895_v5 }
 0x510   :  { %v3149_v61 = vpop.eup %3148 }
 0x511   :  { %3158 = vpow2.f32 %v2707_v18  ;;  %2233 = vperm.xlu0 %2945, %v3149_v61   ;;  %2218 = vperm.xlu1 %2944, %v3147_v30   ;;  %v2359_v25 = vsub.f32 1.0, %v3149_v61  ;;  %v2708_v59 = vmul.f32 -1.442695, %v1950_v28 }
 0x512   :  { %3160 = vpow2.f32 %v2706_v40 }
 0x513   :  { %v3151_v7 = vpop.eup %3150  ;;  %3162 = vrcp.f32 %v2072_v41 }
 0x514   :  { %v2075_v22 = vadd.f32 1.0, %v3151_v7  ;;  %v1898_v26 = vpop.xlane.xlu1 %1897  ;;  %v3153_v54 = vpop.eup %3152 }
 0x515   :  { %v1951_v3 = vadd.f32 %v5587_v45, %v1898_v26  ;;  %2457 = vperm.xlu0 %2945, %v2359_v25   ;;  %2442 = vperm.xlu1 %2944, %v2356_v27   ;;  %v3155_v13 = vpop.eup %3154  ;;  %v2074_v37 = vadd.f32 1.0, %v3153_v54 }
 0x516   :  { %3164 = vrcp.f32 %v2075_v22  ;;  %v1901_v18 = vpop.xlane.xlu0 %1900  ;;  %v2358_v41 = vsub.f32 1.0, %v3155_v13 }
 0x517   :  { %v2709_v44 = vmul.f32 -1.442695, %v1951_v3  ;;  %v1952_v61 = vadd.f32 %v5587_v45, %v1901_v18 }
 0x518   :  { %v3157_v21 = vpop.eup %3156 }
 0x519   :  { %3166 = vpow2.f32 %v2709_v44  ;;  %2243 = vperm.xlu0 %2945, %v3157_v21   ;;  %2228 = vperm.xlu1 %2944, %v3155_v13   ;;  %v2361_v40 = vsub.f32 1.0, %v3157_v21  ;;  %v2710_v28 = vmul.f32 -1.442695, %v1952_v61 }
 0x51a   :  { %3168 = vpow2.f32 %v2708_v59 }
 0x51b   :  { %v3159_v30 = vpop.eup %3158  ;;  %3170 = vrcp.f32 %v2074_v37 }
 0x51c   :  { %v2077_v5 = vadd.f32 1.0, %v3159_v30  ;;  %v1904_v7 = vpop.xlane.xlu1 %1903  ;;  %v3161_v27 = vpop.eup %3160 }
 0x51d   :  { %v1953_v25 = vadd.f32 %v5587_v45, %v1904_v7  ;;  %2467 = vperm.xlu0 %2945, %v2361_v40   ;;  %2452 = vperm.xlu1 %2944, %v2358_v41   ;;  %v3163_v22 = vpop.eup %3162  ;;  %v2076_v44 = vadd.f32 1.0, %v3161_v27 }
 0x51e   :  { %3172 = vrcp.f32 %v2077_v5  ;;  %v1907_v54 = vpop.xlane.xlu0 %1906  ;;  %v2360_v59 = vsub.f32 1.0, %v3163_v22 }
 0x51f   :  { %v2711_v26 = vmul.f32 -1.442695, %v1953_v25  ;;  %v1954_v21 = vadd.f32 %v5587_v45, %v1907_v54 }
 0x520   :  { %v3165_v3 = vpop.eup %3164 }
 0x521   :  { %3174 = vpow2.f32 %v2711_v26  ;;  %2253 = vperm.xlu0 %2945, %v3165_v3   ;;  %2238 = vperm.xlu1 %2944, %v3163_v22   ;;  %v2363_v37 = vsub.f32 1.0, %v3165_v3  ;;  %v2712_v5 = vmul.f32 -1.442695, %v1954_v21 }
 0x522   :  { %3176 = vpow2.f32 %v2710_v28 }
 0x523   :  { %v3167_v13 = vpop.eup %3166  ;;  %3178 = vrcp.f32 %v2076_v44 }
 0x524   :  { %v2079_v18 = vadd.f32 1.0, %v3167_v13  ;;  %v1910_v30 = vpop.xlane.xlu1 %1909  ;;  %v3169_v61 = vpop.eup %3168 }
 0x525   :  { %v1955_v40 = vadd.f32 %v5587_v45, %v1910_v30  ;;  %2477 = vperm.xlu0 %2945, %v2363_v37   ;;  %2462 = vperm.xlu1 %2944, %v2360_v59   ;;  %v3171_v41 = vpop.eup %3170  ;;  %v2078_v27 = vadd.f32 1.0, %v3169_v61 }
 0x526   :  { %3180 = vrcp.f32 %v2079_v18  ;;  %v1913_v28 = vpop.xlane.xlu0 %1912  ;;  %v2362_v3 = vsub.f32 1.0, %v3171_v41 }
 0x527   :  { %v2713_v7 = vmul.f32 -1.442695, %v1955_v40  ;;  %v1956_v37 = vadd.f32 %v5587_v45, %v1913_v28 }
 0x528   :  { %v3173_v25 = vpop.eup %3172 }
 0x529   :  { %3182 = vpow2.f32 %v2713_v7  ;;  %2263 = vperm.xlu0 %2945, %v3173_v25   ;;  %2248 = vperm.xlu1 %2944, %v3171_v41   ;;  %v2365_v22 = vsub.f32 1.0, %v3173_v25  ;;  %v2714_v61 = vmul.f32 -1.442695, %v1956_v37 }
 0x52a   :  { %3184 = vpow2.f32 %v2712_v5 }
 0x52b   :  { %v3175_v26 = vpop.eup %3174  ;;  %3186 = vrcp.f32 %v2078_v27 }
 0x52c   :  { %v2081_v54 = vadd.f32 1.0, %v3175_v26  ;;  %v1916_v44 = vpop.xlane.xlu1 %1915  ;;  %v3177_v13 = vpop.eup %3176 }
 0x52d   :  { %v1957_v59 = vadd.f32 %v5587_v45, %v1916_v44  ;;  %2487 = vperm.xlu0 %2945, %v2365_v22   ;;  %2472 = vperm.xlu1 %2944, %v2362_v3   ;;  %v3179_v21 = vpop.eup %3178  ;;  %v2080_v40 = vadd.f32 1.0, %v3177_v13 }
 0x52e   :  { %3188 = vrcp.f32 %v2081_v54  ;;  %v1919_v41 = vpop.xlane.xlu0 %1918  ;;  %v2364_v25 = vsub.f32 1.0, %v3179_v21 }
 0x52f   :  { %v2715_v18 = vmul.f32 -1.442695, %v1957_v59  ;;  %v1958_v26 = vadd.f32 %v5587_v45, %v1919_v41 }
 0x530   :  { %v3181_v30 = vpop.eup %3180 }
 0x531   :  { %3190 = vpow2.f32 %v2715_v18  ;;  %2273 = vperm.xlu0 %2945, %v3181_v30   ;;  %2258 = vperm.xlu1 %2944, %v3179_v21   ;;  %v2367_v7 = vsub.f32 1.0, %v3181_v30  ;;  %v2716_v44 = vmul.f32 -1.442695, %v1958_v26 }
 0x532   :  { %3192 = vrcp.f32 %v2080_v40 }
 0x533   :  { %v3183_v5 = vpop.eup %3182  ;;  %3194 = vpow2.f32 %v2714_v61 }
 0x534   :  { %v2083_v27 = vadd.f32 1.0, %v3183_v5  ;;  %v3185_v28 = vpop.eup %3184 }
 0x535   :  { %2497 = vperm.xlu0 %2945, %v2367_v7   ;;  %2482 = vperm.xlu1 %2944, %v2364_v25   ;;  %v3187_v22 = vpop.eup %3186  ;;  %v2082_v54 = vadd.f32 1.0, %v3185_v28 }
 0x536   :  { %3196 = vrcp.f32 %v2083_v27  ;;  %v2366_v59 = vsub.f32 1.0, %v3187_v22 }
 0x537   :  { %3198 = vrcp.f32 %v2082_v54 }
 0x538   :  { %v3189_v3 = vpop.eup %3188  ;;  %3200 = vpow2.f32 %v2716_v44 }
 0x539   :  { %2283 = vperm.xlu0 %2945, %v3189_v3   ;;  %2268 = vperm.xlu1 %2944, %v3187_v22   ;;  %v2369_v37 = vsub.f32 1.0, %v3189_v3 }
 0x53b   :  { %v3191_v13 = vpop.eup %3190 }
 0x53c   :  { %v2085_v21 = vadd.f32 1.0, %v3191_v13  ;;  %v3193_v18 = vpop.eup %3192 }
 0x53d   :  { %2507 = vperm.xlu0 %2945, %v2369_v37   ;;  %2492 = vperm.xlu1 %2944, %v2366_v59   ;;  %v3195_v45 = vpop.eup %3194  ;;  %v2368_v41 = vsub.f32 1.0, %v3193_v18  ;;  %v3240_v37 = vld [vmem:[%s5825_s0 + $0x8] sm:$0xff] }
 0x53e   :  { %3202 = vrcp.f32 %v2085_v21  ;;  %v2084_v40 = vadd.f32 1.0, %v3195_v45  ;;  %v3241_v45 = vld [vmem:[%s5825_s0] sm:$0xff] }
 0x540   :  { %v3197_v30 = vpop.eup %3196  ;;  %3204 = vrcp.f32 %v2084_v40 }
 0x541   :  { %2293 = vperm.xlu0 %2945, %v3197_v30   ;;  %2278 = vperm.xlu1 %2944, %v3193_v18   ;;  %v2371_v61 = vsub.f32 1.0, %v3197_v30  ;;  %v3199_v5 = vpop.eup %3198 }
 0x542   :  { %v3201_v7 = vpop.eup %3200  ;;  %v2370_v26 = vsub.f32 1.0, %v3199_v5 }
 0x543   :  { %v2086_v27 = vadd.f32 1.0, %v3201_v7 }
 0x545   :  { %2517 = vperm.xlu0 %2945, %v2371_v61   ;;  %2502 = vperm.xlu1 %2944, %v2368_v41   ;;  %3206 = vrcp.f32 %v2086_v27 }
 0x548   :  { %v3203_v25 = vpop.eup %3202 }
 0x549   :  { %2303 = vperm.xlu0 %2945, %v3203_v25   ;;  %2288 = vperm.xlu1 %2944, %v3199_v5   ;;  %v2373_v28 = vsub.f32 1.0, %v3203_v25 }
 0x54a   :  { %v3205_v22 = vpop.eup %3204 }
 0x54b   :  { %v2372_v44 = vsub.f32 1.0, %v3205_v22 }
 0x54d   :  { %2527 = vperm.xlu0 %2945, %v2373_v28   ;;  %2512 = vperm.xlu1 %2944, %v2370_v26  }
 0x54f   :  { %v3207_v41 = vpop.eup %3206 }
 0x550   :  { %v2154_v3 = vpop.permute.xlu1 %2153  ;;  %v2374_v28 = vsub.f32 1.0, %v3207_v41 }
 0x551   :  { %2298 = vperm.xlu1 %2944, %v3205_v22   ;;  %v2311_v30 = vmul.f32 %v3241_v45, %v2154_v3  ;;  %v3243_v22 = vld [vmem:[%s5825_s0 + $0x18] sm:$0xff] }
 0x552   :  { %v2159_v54 = vpop.permute.xlu0 %2158 }
 0x553   :  { %v2312_v59 = vmul.f32 %v3240_v37, %v2159_v54 }
 0x554   :  { %v2383_v13 = vpop.permute.xlu1 %2382 }
 0x555   :  { %v2536_v21 = vmul.f32 %v2383_v13, %v1683_v57  ;;  %2522 = vperm.xlu1 %2944, %v2372_v44  }
 0x556   :  { %v2378_v18 = vpop.permute.xlu0 %2377 }
 0x557   :  { %v2568_v40 = vadd.f32 %v2536_v21, %v2312_v59  ;;  %v2535_v61 = vmul.f32 %v2378_v18, %v1682_v35 }
 0x558   :  { %v2164_v5 = vpop.permute.xlu1 %2163 }
 0x559   :  { %2600 = vst.msk [vmem:[#allocation3 + $0x8] sm:$0xff] %vm200_vm0, %v2568_v40  ;;  %v2567_v7 = vadd.f32 %v2535_v61, %v2311_v30  ;;  %2308 = vperm.xlu1 %2944, %v3207_v41   ;;  %v2313_v57 = vmul.f32 %v3242_v60, %v2164_v5  ;;  %v3246_v41 = vld [vmem:[%s5825_s0 + $0x30] sm:$0xff] }
 0x55a   :  { %v2388_v25 = vpop.permute.xlu0 %2387 }
 0x55b   :  { %2599 = vst.msk [vmem:[#allocation3] sm:$0xff] %vm200_vm0, %v2567_v7  ;;  %v2537_v27 = vmul.f32 %v2388_v25, %v1684_v49  ;;  %v3244_v49 = vld [vmem:[%s5825_s0 + $0x20] sm:$0xff] }
 0x55c   :  { %v2169_v11 = vpop.permute.xlu1 %2168 }
 0x55d   :  { %v2569_v35 = vadd.f32 %v2537_v27, %v2313_v57  ;;  %2532 = vperm.xlu1 %2944, %v2374_v28   ;;  %v2314_v3 = vmul.f32 %v3243_v22, %v2169_v11  ;;  %v3247_v57 = vld [vmem:[%s5825_s0 + $0x38] sm:$0xff] }
 0x55f   :  { %2601 = vst.msk [vmem:[#allocation3 + $0x10] sm:$0xff] %vm200_vm0, %v2569_v35 }
 0x560   :  { %v2393_v26 = vpop.permute.xlu1 %2392 }
 0x561   :  { %v2538_v54 = vmul.f32 %v2393_v26, %v1685_v52  ;;  %v3248_v26 = vld [vmem:[%s5825_s0 + $0x50] sm:$0xff] }
 0x562   :  { %v2398_v44 = vpop.permute.xlu0 %2397 }
 0x563   :  { %v2570_v13 = vadd.f32 %v2538_v54, %v2314_v3  ;;  %v2539_v17 = vmul.f32 %v2398_v44, %v1686_v1  ;;  %v3249_v3 = vld [vmem:[%s5825_s0 + $0x40] sm:$0xff] }
 0x564   :  { %v2174_v37 = vpop.permute.xlu1 %2173 }
 0x565   :  { %2602 = vst.msk [vmem:[#allocation3 + $0x18] sm:$0xff] %vm200_vm0, %v2570_v13  ;;  %v2315_v59 = vmul.f32 %v3244_v49, %v2174_v37 }
 0x567   :  { %v2571_v21 = vadd.f32 %v2539_v17, %v2315_v59  ;;  %v3250_v17 = vld [vmem:[%s5825_s0 + $0x48] sm:$0xff] }
 0x568   :  { %v2179_v18 = vpop.permute.xlu1 %2178 }
 0x569   :  { %2603 = vst.msk [vmem:[#allocation3 + $0x20] sm:$0xff] %vm200_vm0, %v2571_v21  ;;  %v2316_v52 = vmul.f32 %v3245_v38, %v2179_v18 }
 0x56a   :  { %v2408_v39 = vpop.permute.xlu0 %2407 }
 0x56b   :  { %v2541_v61 = vmul.f32 %v2408_v39, %v1688_v50 }
 0x56c   :  { %v2403_v45 = vpop.permute.xlu1 %2402 }
 0x56d   :  { %v2540_v30 = vmul.f32 %v2403_v45, %v1687_v20 }
 0x56f   :  { %v2572_v1 = vadd.f32 %v2540_v30, %v2316_v52 }
 0x570   :  { %v2184_v40 = vpop.permute.xlu1 %2183 }
 0x571   :  { %2604 = vst.msk [vmem:[#allocation3 + $0x28] sm:$0xff] %vm200_vm0, %v2572_v1  ;;  %v2317_v5 = vmul.f32 %v3246_v41, %v2184_v40  ;;  %v3252_v1 = vld [vmem:[%s5825_s0 + $0x58] sm:$0xff] }
 0x572   :  { %v2418_v25 = vpop.permute.xlu0 %2417 }
 0x573   :  { %v2573_v7 = vadd.f32 %v2541_v61, %v2317_v5  ;;  %v2543_v35 = vmul.f32 %v2418_v25, %v1690_v33  ;;  %v6360_v61 = vmax.f32 %v5387_v56, 0.0 }
 0x574   :  { %v2189_v60 = vpop.permute.xlu1 %2188 }
 0x575   :  { %2605 = vst.msk [vmem:[#allocation3 + $0x30] sm:$0xff] %vm200_vm0, %v2573_v7  ;;  %v2318_v36 = vmul.f32 %v3247_v57, %v2189_v60  ;;  %v3254_v57 = vld [vmem:[%s5825_s0 + $0x68] sm:$0xff] }
 0x578   :  { %v2413_v4 = vpop.permute.xlu1 %2412  ;;  %v2204_v20 = vpop.permute.xlu0 %2203 }
 0x579   :  { %v2542_v50 = vmul.f32 %v2413_v4, %v1689_v42  ;;  %v2321_v22 = vmul.f32 %v3248_v26, %v2204_v20 }
 0x57b   :  { %v2574_v27 = vadd.f32 %v2542_v50, %v2318_v36  ;;  %v6361_v50 = vmax.f32 %v5369_v51, 0.0  ;;  %v3257_v51 = vld [vmem:[%s5825_s0 + $0x90] sm:$0xff] }
 0x57c   :  { %v2194_v28 = vpop.permute.xlu1 %2193  ;;  %v2428_v11 = vpop.permute.xlu0 %2427 }
 0x57d   :  { %2606 = vst.msk [vmem:[#allocation3 + $0x38] sm:$0xff] %vm200_vm0, %v2574_v27  ;;  %v2319_v54 = vmul.f32 %v3249_v3, %v2194_v28  ;;  %v2545_v15 = vmul.f32 %v2428_v11, %v1692_v32  ;;  %v6362_v28 = vmax.f32 %v5409_v16, 0.0 }
 0x57f   :  { %v2575_v42 = vadd.f32 %v2543_v35, %v2319_v54  ;;  %v2577_v44 = vadd.f32 %v2545_v15, %v2321_v22 }
 0x580   :  { %v2199_v13 = vpop.permute.xlu1 %2198  ;;  %v2214_v0 = vpop.permute.xlu0 %2213 }
 0x581   :  { %2607 = vst.msk [vmem:[#allocation3 + $0x40] sm:$0xff] %vm200_vm0, %v2575_v42  ;;  %2609 = vst.msk [vmem:[#allocation3 + $0x50] sm:$0xff] %vm200_vm0, %v2577_v44  ;;  %v2320_v49 = vmul.f32 %v3250_v17, %v2199_v13  ;;  %v2323_v32 = vmul.f32 %v3251_v53, %v2214_v0  ;;  %v3256_v42 = vld [vmem:[%s5825_s0 + $0x78] sm:$0xff]  ;;  %v6363_v13 = vmax.f32 %v5391_v43, 0.0  ;;  %v3259_v43 = vld [vmem:[%s5825_s0 + $0xa0] sm:$0xff] }
 0x584   :  { %v2423_v33 = vpop.permute.xlu1 %2422  ;;  %v2438_v37 = vpop.permute.xlu0 %2437 }
 0x585   :  { %v2544_v59 = vmul.f32 %v2423_v33, %v1691_v34  ;;  %v2547_v21 = vmul.f32 %v2438_v37, %v1694_v31  ;;  %v6364_v33 = vmax.f32 %v5431_v63, 0.0 }
 0x587   :  { %v2576_v18 = vadd.f32 %v2544_v59, %v2320_v49  ;;  %v2579_v45 = vadd.f32 %v2547_v21, %v2323_v32 }
 0x588   :  { %v2209_v38 = vpop.permute.xlu1 %2208  ;;  %v2224_v52 = vpop.permute.xlu0 %2223 }
 0x589   :  { %2608 = vst.msk [vmem:[#allocation3 + $0x48] sm:$0xff] %vm200_vm0, %v2576_v18  ;;  %2611 = vst.msk [vmem:[#allocation3 + $0x60] sm:$0xff] %vm200_vm0, %v2579_v45  ;;  %v2322_v40 = vmul.f32 %v3252_v1, %v2209_v38  ;;  %v2325_v34 = vmul.f32 %v3253_v8, %v2224_v52  ;;  %v3258_v18 = vld [vmem:[%s5825_s0 + $0x88] sm:$0xff]  ;;  %v6365_v38 = vmax.f32 %v5417_v47, 0.0  ;;  %v3261_v47 = vld [vmem:[%s5825_s0 + $0xb0] sm:$0xff] }
 0x58c   :  { %v2433_v30 = vpop.permute.xlu1 %2432  ;;  %v2448_v39 = vpop.permute.xlu0 %2447 }
 0x58d   :  { %v2546_v31 = vmul.f32 %v2433_v30, %v6359_v46  ;;  %v2549_v41 = vmul.f32 %v2448_v39, %v6360_v61  ;;  %v6366_v30 = vmax.f32 %v5453_v29, 0.0  ;;  %v3260_v61 = vld [vmem:[%s5825_s0 + $0x98] sm:$0xff] }
 0x58f   :  { %v2578_v5 = vadd.f32 %v2546_v31, %v2322_v40  ;;  %v2581_v7 = vadd.f32 %v2549_v41, %v2325_v34 }
 0x590   :  { %v2219_v25 = vpop.permute.xlu1 %2218  ;;  %v2234_v60 = vpop.permute.xlu0 %2233 }
 0x591   :  { %2610 = vst.msk [vmem:[#allocation3 + $0x58] sm:$0xff] %vm200_vm0, %v2578_v5  ;;  %2613 = vst.msk [vmem:[#allocation3 + $0x70] sm:$0xff] %vm200_vm0, %v2581_v7  ;;  %v2324_v36 = vmul.f32 %v3254_v57, %v2219_v25  ;;  %v2327_v56 = vmul.f32 %v3255_v62, %v2234_v60  ;;  %v6367_v5 = vmax.f32 %v5435_v58, 0.0  ;;  %v6368_v25 = vmax.f32 %v5475_v14, 0.0  ;;  %v3263_v58 = vld [vmem:[%s5825_s0 + $0xc0] sm:$0xff] }
 0x594   :  { %v2443_v4 = vpop.permute.xlu1 %2442  ;;  %v2458_v20 = vpop.permute.xlu0 %2457 }
 0x595   :  { %v2548_v27 = vmul.f32 %v2443_v4, %v6361_v50  ;;  %v2551_v11 = vmul.f32 %v2458_v20, %v6362_v28  ;;  %v3262_v50 = vld [vmem:[%s5825_s0 + $0xa8] sm:$0xff]  ;;  %v6369_v28 = vmax.f32 %v5457_v19, 0.0  ;;  %v3265_v19 = vld [vmem:[%s5825_s0 + $0xd0] sm:$0xff] }
 0x597   :  { %v2580_v35 = vadd.f32 %v2548_v27, %v2324_v36  ;;  %v2583_v26 = vadd.f32 %v2551_v11, %v2327_v56 }
 0x598   :  { %v2229_v22 = vpop.permute.xlu1 %2228  ;;  %v2244_v3 = vpop.permute.xlu0 %2243 }
 0x599   :  { %2612 = vst.msk [vmem:[#allocation3 + $0x68] sm:$0xff] %vm200_vm0, %v2580_v35  ;;  %2615 = vst.msk [vmem:[#allocation3 + $0x80] sm:$0xff] %vm200_vm0, %v2583_v26  ;;  %v2326_v44 = vmul.f32 %v3256_v42, %v2229_v22  ;;  %v2329_v16 = vmul.f32 %v3257_v51, %v2244_v3  ;;  %v6370_v35 = vmax.f32 %v5497_v55, 0.0  ;;  %v3264_v51 = vld [vmem:[%s5825_s0 + $0xb8] sm:$0xff] }
 0x59c   :  { %v2453_v54 = vpop.permute.xlu1 %2452  ;;  %v2468_v15 = vpop.permute.xlu0 %2467 }
 0x59d   :  { %v2550_v0 = vmul.f32 %v2453_v54, %v6363_v13  ;;  %v2553_v37 = vmul.f32 %v2468_v15, %v6364_v33  ;;  %v6371_v13 = vmax.f32 %v5479_v23, 0.0  ;;  %v6372_v33 = vmax.f32 %v5519_v6, 0.0  ;;  %v3267_v23 = vld [vmem:[%s5825_s0 + $0xe0] sm:$0xff] }
 0x59f   :  { %v2582_v17 = vadd.f32 %v2550_v0, %v2326_v44  ;;  %v2585_v49 = vadd.f32 %v2553_v37, %v2329_v16 }
 0x5a0   :  { %v2239_v53 = vpop.permute.xlu1 %2238  ;;  %v2254_v32 = vpop.permute.xlu0 %2253 }
 0x5a1   :  { %2614 = vst.msk [vmem:[#allocation3 + $0x78] sm:$0xff] %vm200_vm0, %v2582_v17  ;;  %2617 = vst.msk [vmem:[#allocation3 + $0x90] sm:$0xff] %vm200_vm0, %v2585_v49  ;;  %v2328_v45 = vmul.f32 %v3258_v18, %v2239_v53  ;;  %v2331_v63 = vmul.f32 %v3259_v43, %v2254_v32  ;;  %v3266_v18 = vld [vmem:[%s5825_s0 + $0xc8] sm:$0xff]  ;;  %v6373_v43 = vmax.f32 %v5501_v24, 0.0  ;;  %v3269_v24 = vld [vmem:[%s5825_s0 + $0xf0] sm:$0xff] }
 0x5a4   :  { %v2463_v59 = vpop.permute.xlu1 %2462  ;;  %v2478_v21 = vpop.permute.xlu0 %2477 }
 0x5a5   :  { %v2552_v52 = vmul.f32 %v2463_v59, %v6365_v38  ;;  %v2555_v39 = vmul.f32 %v2478_v21, %v6366_v30  ;;  %v6374_v38 = vmax.f32 %v5541_v2, 0.0 }
 0x5a7   :  { %v2584_v1 = vadd.f32 %v2552_v52, %v2328_v45  ;;  %v2587_v40 = vadd.f32 %v2555_v39, %v2331_v63 }
 0x5a8   :  { %v2249_v8 = vpop.permute.xlu1 %2248  ;;  %v2264_v34 = vpop.permute.xlu0 %2263 }
 0x5a9   :  { %2616 = vst.msk [vmem:[#allocation3 + $0x88] sm:$0xff] %vm200_vm0, %v2584_v1  ;;  %2619 = vst.msk [vmem:[#allocation3 + $0xa0] sm:$0xff] %vm200_vm0, %v2587_v40  ;;  %v2330_v41 = vmul.f32 %v3260_v61, %v2249_v8  ;;  %v2333_v29 = vmul.f32 %v3261_v47, %v2264_v34  ;;  %v6375_v61 = vmax.f32 %v5523_v9, 0.0  ;;  %v6376_v47 = vmax.f32 %v5563_v12, 0.0 }
 0x5ac   :  { %v2473_v46 = vpop.permute.xlu1 %2472  ;;  %v2488_v31 = vpop.permute.xlu0 %2487 }
 0x5ad   :  { %v2554_v7 = vmul.f32 %v2473_v46, %v6367_v5  ;;  %v2557_v60 = vmul.f32 %v2488_v31, %v6368_v25  ;;  %v3268_v46 = vld [vmem:[%s5825_s0 + $0xd8] sm:$0xff] }
 0x5af   :  { %v2586_v4 = vadd.f32 %v2554_v7, %v2330_v41  ;;  %v2589_v20 = vadd.f32 %v2557_v60, %v2333_v29 }
 0x5b0   :  { %v2259_v57 = vpop.permute.xlu1 %2258  ;;  %v2274_v36 = vpop.permute.xlu0 %2273 }
 0x5b1   :  { %2618 = vst.msk [vmem:[#allocation3 + $0x98] sm:$0xff] %vm200_vm0, %v2586_v4  ;;  %2621 = vst.msk [vmem:[#allocation3 + $0xb0] sm:$0xff] %vm200_vm0, %v2589_v20  ;;  %v2332_v27 = vmul.f32 %v3262_v50, %v2259_v57  ;;  %v2335_v14 = vmul.f32 %v3263_v58, %v2274_v36  ;;  %v3270_v4 = vld [vmem:[%s5825_s0 + $0xe8] sm:$0xff]  ;;  %v6377_v57 = vmax.f32 %v5545_v48, 0.0 }
 0x5b4   :  { %v2483_v62 = vpop.permute.xlu1 %2482  ;;  %v2498_v56 = vpop.permute.xlu0 %2497 }
 0x5b5   :  { %v2556_v11 = vmul.f32 %v2483_v62, %v6369_v28  ;;  %v2559_v26 = vmul.f32 %v2498_v56, %v6370_v35  ;;  %v3271_v56 = vld [vmem:[%s5825_s0 + $0xf8] sm:$0xff] }
 0x5b7   :  { %v2588_v22 = vadd.f32 %v2556_v11, %v2332_v27  ;;  %v2591_v3 = vadd.f32 %v2559_v26, %v2335_v14  ;;  %v6378_v27 = vmax.f32 %v5567_v10, 0.0 }
 0x5b8   :  { %v2269_v54 = vpop.permute.xlu1 %2268  ;;  %v2284_v15 = vpop.permute.xlu0 %2283 }
 0x5b9   :  { %2620 = vst.msk [vmem:[#allocation3 + $0xa8] sm:$0xff] %vm200_vm0, %v2588_v22  ;;  %2623 = vst.msk [vmem:[#allocation3 + $0xc0] sm:$0xff] %vm200_vm0, %v2591_v3  ;;  %v2334_v16 = vmul.f32 %v3264_v51, %v2269_v54  ;;  %v2337_v55 = vmul.f32 %v3265_v19, %v2284_v15 }
 0x5bc   :  { %v2493_v42 = vpop.permute.xlu1 %2492  ;;  %v2508_v44 = vpop.permute.xlu0 %2507 }
 0x5bd   :  { %v2558_v0 = vmul.f32 %v2493_v42, %v6371_v13  ;;  %v2561_v37 = vmul.f32 %v2508_v44, %v6372_v33 }
 0x5bf   :  { %v2590_v17 = vadd.f32 %v2558_v0, %v2334_v16  ;;  %v2593_v49 = vadd.f32 %v2561_v37, %v2337_v55 }
 0x5c0   :  { %v2279_v53 = vpop.permute.xlu1 %2278  ;;  %v2294_v32 = vpop.permute.xlu0 %2293 }
 0x5c1   :  { %2622 = vst.msk [vmem:[#allocation3 + $0xb8] sm:$0xff] %vm200_vm0, %v2590_v17  ;;  %2625 = vst.msk [vmem:[#allocation3 + $0xd0] sm:$0xff] %vm200_vm0, %v2593_v49  ;;  %v2336_v45 = vmul.f32 %v3266_v18, %v2279_v53  ;;  %v2339_v6 = vmul.f32 %v3267_v23, %v2294_v32 }
 0x5c4   :  { %v2503_v59 = vpop.permute.xlu1 %2502  ;;  %v2518_v21 = vpop.permute.xlu0 %2517 }
 0x5c5   :  { %v2560_v63 = vmul.f32 %v2503_v59, %v6373_v43  ;;  %v2563_v52 = vmul.f32 %v2518_v21, %v6374_v38 }
 0x5c7   :  { %v2592_v30 = vadd.f32 %v2560_v63, %v2336_v45  ;;  %v2595_v39 = vadd.f32 %v2563_v52, %v2339_v6 }
 0x5c8   :  { %v2289_v1 = vpop.permute.xlu1 %2288  ;;  %v2304_v40 = vpop.permute.xlu0 %2303 }
 0x5c9   :  { %2624 = vst.msk [vmem:[#allocation3 + $0xc8] sm:$0xff] %vm200_vm0, %v2592_v30  ;;  %2627 = vst.msk [vmem:[#allocation3 + $0xe0] sm:$0xff] %vm200_vm0, %v2595_v39  ;;  %v2338_v31 = vmul.f32 %v3268_v46, %v2289_v1  ;;  %v2341_v2 = vmul.f32 %v3269_v24, %v2304_v40 }
 0x5cc   :  { %v2513_v8 = vpop.permute.xlu1 %2512  ;;  %v2528_v34 = vpop.permute.xlu0 %2527 }
 0x5cd   :  { %v2562_v41 = vmul.f32 %v2513_v8, %v6375_v61  ;;  %v2565_v29 = vmul.f32 %v2528_v34, %v6376_v47 }
 0x5cf   :  { %v2594_v5 = vadd.f32 %v2562_v41, %v2338_v31  ;;  %v2597_v7 = vadd.f32 %v2565_v29, %v2341_v2 }
 0x5d0   :  { %v2299_v25 = vpop.permute.xlu1 %2298 }
 0x5d1   :  { %2626 = vst.msk [vmem:[#allocation3 + $0xd8] sm:$0xff] %vm200_vm0, %v2594_v5  ;;  %2629 = vst.msk [vmem:[#allocation3 + $0xf0] sm:$0xff] %vm200_vm0, %v2597_v7  ;;  %v2340_v20 = vmul.f32 %v3270_v4, %v2299_v25 }
 0x5d4   :  { %v2523_v60 = vpop.permute.xlu1 %2522 }
 0x5d5   :  { %v2564_v9 = vmul.f32 %v2523_v60, %v6377_v57 }
 0x5d7   :  { %v2596_v36 = vadd.f32 %v2564_v9, %v2340_v20 }
 0x5d8   :  { %v2309_v62 = vpop.permute.xlu1 %2308 }
 0x5d9   :  { %2628 = vst.msk [vmem:[#allocation3 + $0xe8] sm:$0xff] %vm200_vm0, %v2596_v36  ;;  %v2342_v50 = vmul.f32 %v3271_v56, %v2309_v62 }
 0x5dc   :  { %v2533_v12 = vpop.permute.xlu1 %2532 }
 0x5dd   :  { %v2566_v58 = vmul.f32 %v2533_v12, %v6378_v27 }
 0x5df   :  { %v2598_v14 = vadd.f32 %v2566_v58, %v2342_v50 }
 0x5e1   :  { %2630 = vst.msk [vmem:[#allocation3 + $0xf8] sm:$0xff] %vm200_vm0, %v2598_v14 }
 0x5e2   :  { %3283 = shalt.err (!%p3280_p4)
}
 0x5e3   :  { %s3284_s1 = scalar_lea.hbm %s5833_s8, 4096 }
 0x5e4   :  { %p3285_p5 = scmp.ne.s32.totalorder %s5833_s8, %s3284_s1  ;;  %p3288_p6 = scmp.lt.u32.totalorder %s3284_s1, %s5833_s8 }
 0x5e6   :  { %p3290_p7 = pnand %p3288_p6, %p3285_p5 }
 0x5e8   :  { %3293 = shalt.err (!%p3290_p7)
}
 0x5e9   :  { %s3299_s16 = smov 128   ;;  %s3300_s17 = smov 8  }
 0x5ea   :  { %2642 = dma.vmem_to_hbm [thread:$0]  %s2637_s30, 4096, %s5833_s8, [#allocation4], %s3299_s16, %s3299_s16, %s3300_s17  }
 0x5eb   :  { %3294 = dma.done.wait [#allocation4], 4096  }
 0x5ec   :  { %3295 = vsyncadd [#allocation4], 4294963200 }
 0x5ed   :  { %2646 = vsyncpa [#allocation4], 1 }

</bundles_post_ra>
